<compile_context>
chip_gen: v7x
topology: tpu7x:2x2x1
jax: 0.10.0
libtpu: 0.0.40
codegen_flags: <defaults>
</compile_context>

<pallas_src>
import functools

import jax
import jax.numpy as jnp
from jax.experimental import pallas as pl
from jax.experimental.pallas import tpu as pltpu
import numpy as np


# float32 keeps the strict 1e-4 check below; use jnp.bfloat16 on v6e/v7x.
MATMUL_DTYPE = jnp.float32


# ----------------------------------------------------------------------------
# Fused kernel: the whole 6-conv block for one batch element.
#   x_ref          : (1, Cin, NROWS)   zero-padded, flattened input
#   w_i refs       : (9, Cout_i, Cin_i)  tap-major transposed weights
#   b_i refs       : (Cout_i, 1)
#   o_ref          : (1, Cout, L)      lane-dense output (L = H*(W+2))
#   buf_a / buf_b  : (Cbuf, NROWS)     ping-pong activation buffers in VMEM
# ----------------------------------------------------------------------------
def block_kernel(x_ref, *refs, H, W, chans):
    WP = W + 2                       # padded row stride
    L = H * WP                       # conv outputs computed per layer
    NROWS = (H + 2) * WP + 2         # padded grid + 2 slack lanes (junk-only)
    OFF = WP + 1                     # interior offset: act pixel q -> lane q+OFF
    n_layers = len(chans) - 1

    w_refs = [refs[2 * i] for i in range(n_layers)]
    b_refs = [refs[2 * i + 1] for i in range(n_layers)]
    o_ref = refs[2 * n_layers]
    buf_a = refs[2 * n_layers + 1]
    buf_b = refs[2 * n_layers + 2]
    bufs = (buf_a, buf_b)
    cbuf = buf_a.shape[0]

    # Zero only the halo lanes the per-layer stores never touch (top ring row +
    # left halo of the first interior row, and the bottom ring row + slack).
    # Everything else is fully overwritten every layer -> no full memset.
    tail_start = (H + 1) * WP + 1
    zeros_head = jnp.zeros((cbuf, OFF), buf_a.dtype)
    zeros_tail = jnp.zeros((cbuf, NROWS - tail_start), buf_a.dtype)
    for buf in bufs:
        buf[:, 0:OFF] = zeros_head
        buf[:, tail_start:NROWS] = zeros_tail

    # Lane-validity mask: lane q is a real output pixel iff (q mod WP) < W.
    # Junk columns are zeroed so that, after the +OFF shifted store, they land
    # exactly on the halo ring of the destination buffer (keeping it zero).
    q_idx = jax.lax.broadcasted_iota(jnp.int32, (1, L), 1)
    valid = (q_idx % WP) < W

    src = None                       # layer 0 reads its taps straight from x_ref
    for layer in range(n_layers):
        cin, cout = chans[layer], chans[layer + 1]
        dst = bufs[layer % 2]

        # 3x3 same-padding conv: 9 lane-shifted (cout,cin) x (cin,L) matmuls
        # accumulated in f32.  Lane shifts hit the XLU slot (cheap).
        acc = jnp.zeros((cout, L), jnp.float32)
        for dh in range(3):
            for dw in range(3):
                s = dh * WP + dw
                if layer == 0:
                    tap = x_ref[0, 0:cin, pl.ds(s, L)]
                else:
                    tap = src[0:cin, pl.ds(s, L)]
                acc += jnp.dot(w_refs[layer][dh * 3 + dw], tap,
                               preferred_element_type=jnp.float32)

        acc = acc + b_refs[layer][...]           # (cout, 1) broadcast over lanes

        if layer < n_layers - 1:
            acc = jnp.maximum(acc, 0.0)                      # fused ReLU
            acc = jnp.where(valid, acc, 0.0)                 # zero junk columns
            # act pixel q -> dst lane q+OFF = interior of the padded grid;
            # zeroed junk columns land on the halo ring; halo rows stay zero.
            dst[0:cout, pl.ds(OFF, L)] = acc.astype(dst.dtype)
            src = dst
        else:
            # last conv: no ReLU; one lane-dense store to HBM for the block.
            o_ref[0] = jnp.where(valid, acc, 0.0).astype(o_ref.dtype)


# ----------------------------------------------------------------------------
# Wrapper: one pallas_call for the whole block.
# ----------------------------------------------------------------------------
def _block_forward_impl(x_nchw, params):
    B, Cin, H, W = x_nchw.shape
    n_layers = len(params)
    chans = (Cin,) + tuple(int(w.shape[-1]) for w, _ in params)
    Cout = chans[-1]
    cbuf = max(chans[1:])
    WP = W + 2
    L = H * WP
    NROWS = (H + 2) * WP + 2

    # One small HBM-side zero pad of the *input only* (intermediate activations
    # never leave VMEM).  Flattening (H+2)*(W+2) onto one axis makes the input
    # DMA lane-dense and lets the kernel address 3x3 taps as lane-offset
    # slices; the 2 slack lanes are only read by masked junk columns.
    xp = jnp.pad(x_nchw, ((0, 0), (0, 0), (1, 1), (1, 1)))
    xp = xp.reshape(B, Cin, (H + 2) * WP)
    xp = jnp.pad(xp, ((0, 0), (0, 0), (0, 2))).astype(MATMUL_DTYPE)

    flat_inputs = [xp]
    in_specs = [pl.BlockSpec((1, Cin, NROWS), lambda b: (b, 0, 0))]
    for w, bias in params:
        cin_i, cout_i = int(w.shape[2]), int(w.shape[3])
        # Tap-major, transposed (9, cout, cin) weights, cast once here (not per
        # tap in the inner loop).  Grid-invariant index_map -> no per-step DMA.
        w_t = jnp.transpose(w, (0, 1, 3, 2)).reshape(9, cout_i, cin_i)
        flat_inputs.append(w_t.astype(MATMUL_DTYPE))
        flat_inputs.append(bias.reshape(cout_i, 1).astype(jnp.float32))
        in_specs.append(pl.BlockSpec((9, cout_i, cin_i), lambda b: (0, 0, 0)))
        in_specs.append(pl.BlockSpec((cout_i, 1), lambda b: (0, 0)))

    kernel = functools.partial(block_kernel, H=H, W=W, chans=chans)

    out_flat = pl.pallas_call(
        kernel,
        out_shape=jax.ShapeDtypeStruct((B, Cout, L), x_nchw.dtype),
        grid=(B,),
        in_specs=in_specs,
        out_specs=pl.BlockSpec((1, Cout, L), lambda b: (b, 0, 0)),
        scratch_shapes=[pltpu.VMEM((cbuf, NROWS), MATMUL_DTYPE),
                        pltpu.VMEM((cbuf, NROWS), MATMUL_DTYPE)],
        compiler_params=pltpu.CompilerParams(
            dimension_semantics=("parallel",)),
    )(*flat_inputs)

    # (B, Cout, H, W+2) -> drop the 2 junk columns per row -> NCHW directly.
    return out_flat.reshape(B, Cout, H, WP)[:, :, :, :W]


block_forward = jax.jit(_block_forward_impl)


# ----------------------------------------------------------------------------
# Parameter init (shapes match nn.Conv2d(_, _, 3, padding=1), HWIO layout).
# ----------------------------------------------------------------------------
def init_block_params(key, in_ch, out_ch, dtype=jnp.float32):
    params = []
    chans = [in_ch] + [out_ch] * 6
    for i in range(6):
        key, kw, kb = jax.random.split(key, 3)
        cin, cout = chans[i], chans[i + 1]
        fan_in = 9 * cin
        w = (jax.random.normal(kw, (3, 3, cin, cout), dtype)
             * (1.0 / np.sqrt(fan_in)))
        b = jax.random.normal(kb, (cout,), dtype) * 0.01
        params.append((w, b))
    return params


# Pure-JAX reference (lax conv) for the correctness check.
def block_forward_ref(x_nchw, params):
    x = jnp.transpose(x_nchw, (0, 2, 3, 1))
    dn = jax.lax.conv_dimension_numbers(x.shape, params[0][0].shape,
                                        ("NHWC", "HWIO", "NHWC"))
    n_layers = len(params)
    for i, (w, b) in enumerate(params):
        x = jax.lax.conv_general_dilated(x, w, (1, 1), "SAME",
                                         dimension_numbers=dn) + b
        if i < n_layers - 1:
            x = jnp.maximum(x, 0.0)
    return jnp.transpose(x, (0, 3, 1, 2))


if __name__ == "__main__":
    key = jax.random.PRNGKey(0)
    kx, kp = jax.random.split(key)

    B, in_ch, out_ch, H, W = 2, 4, 8, 16, 16
    x = jax.random.normal(kx, (B, in_ch, H, W), jnp.float32)
    params = init_block_params(kp, in_ch, out_ch)

    out = jax.block_until_ready(block_forward(x, params))

    ref = block_forward_ref(x, params)
    assert out.shape == (B, out_ch, H, W), out.shape
    np.testing.assert_allclose(np.asarray(out), np.asarray(ref),
                               rtol=1e-4, atol=1e-4)
    print("KERNEL_OK")
</pallas_src>

<mosaic_0001>
module attributes {stable_mosaic.version = 11 : i64} {
  func.func @block_kernel(%arg0: i32, %arg1: memref<1x4x326xf32, #tpu.memory_space<vmem>>, %arg2: memref<9x8x4xf32, #tpu.memory_space<vmem>>, %arg3: memref<8x1xf32, #tpu.memory_space<vmem>>, %arg4: memref<9x8x8xf32, #tpu.memory_space<vmem>>, %arg5: memref<8x1xf32, #tpu.memory_space<vmem>>, %arg6: memref<9x8x8xf32, #tpu.memory_space<vmem>>, %arg7: memref<8x1xf32, #tpu.memory_space<vmem>>, %arg8: memref<9x8x8xf32, #tpu.memory_space<vmem>>, %arg9: memref<8x1xf32, #tpu.memory_space<vmem>>, %arg10: memref<9x8x8xf32, #tpu.memory_space<vmem>>, %arg11: memref<8x1xf32, #tpu.memory_space<vmem>>, %arg12: memref<9x8x8xf32, #tpu.memory_space<vmem>>, %arg13: memref<8x1xf32, #tpu.memory_space<vmem>>, %arg14: memref<1x8x288xf32, #tpu.memory_space<vmem>>, %arg15: memref<8x326xf32, #tpu.memory_space<vmem>>, %arg16: memref<8x326xf32, #tpu.memory_space<vmem>>) attributes {dimension_semantics = [#tpu.dimension_semantics<parallel>], iteration_bounds = array<i64: 2>, scalar_prefetch = 0 : i64, scratch_operands = 2 : i64, tpu.core_type = #tpu.core_type<tc>, window_params = [{transform_indices = @transform_0, window_bounds = array<i64: 1, 4, 326>}, {pipeline_mode = #tpu.pipeline_mode<synchronous>, transform_indices = @transform_1, window_bounds = array<i64: 9, 8, 4>}, {pipeline_mode = #tpu.pipeline_mode<synchronous>, transform_indices = @transform_2, window_bounds = array<i64: 8, 1>}, {pipeline_mode = #tpu.pipeline_mode<synchronous>, transform_indices = @transform_3, window_bounds = array<i64: 9, 8, 8>}, {pipeline_mode = #tpu.pipeline_mode<synchronous>, transform_indices = @transform_4, window_bounds = array<i64: 8, 1>}, {pipeline_mode = #tpu.pipeline_mode<synchronous>, transform_indices = @transform_5, window_bounds = array<i64: 9, 8, 8>}, {pipeline_mode = #tpu.pipeline_mode<synchronous>, transform_indices = @transform_6, window_bounds = array<i64: 8, 1>}, {pipeline_mode = #tpu.pipeline_mode<synchronous>, transform_indices = @transform_7, window_bounds = array<i64: 9, 8, 8>}, {pipeline_mode = #tpu.pipeline_mode<synchronous>, transform_indices = @transform_8, window_bounds = array<i64: 8, 1>}, {pipeline_mode = #tpu.pipeline_mode<synchronous>, transform_indices = @transform_9, window_bounds = array<i64: 9, 8, 8>}, {pipeline_mode = #tpu.pipeline_mode<synchronous>, transform_indices = @transform_10, window_bounds = array<i64: 8, 1>}, {pipeline_mode = #tpu.pipeline_mode<synchronous>, transform_indices = @transform_11, window_bounds = array<i64: 9, 8, 8>}, {pipeline_mode = #tpu.pipeline_mode<synchronous>, transform_indices = @transform_12, window_bounds = array<i64: 8, 1>}, {transform_indices = @transform_13, window_bounds = array<i64: 1, 8, 288>}]} {
    %cst = arith.constant 0.000000e+00 : f32
    %0 = vector.broadcast %cst : f32 to vector<8x19xf32>
    %cst_0 = arith.constant 0.000000e+00 : f32
    %1 = vector.broadcast %cst_0 : f32 to vector<8x19xf32>
    %c0 = arith.constant 0 : index
    %c0_1 = arith.constant 0 : index
    %2 = vector.load %arg15[%c0, %c0_1] : memref<8x326xf32, #tpu.memory_space<vmem>>, vector<8x19xf32>
    tpu.vector_store %arg15[%c0, %c0_1], %0 {strides = array<i32>} : memref<8x326xf32, #tpu.memory_space<vmem>>, vector<8x19xf32>,
    %c0_2 = arith.constant 0 : index
    %c307 = arith.constant 307 : index
    %3 = vector.load %arg15[%c0_2, %c307] : memref<8x326xf32, #tpu.memory_space<vmem>>, vector<8x19xf32>
    tpu.vector_store %arg15[%c0_2, %c307], %1 {strides = array<i32>} : memref<8x326xf32, #tpu.memory_space<vmem>>, vector<8x19xf32>,
    %c0_3 = arith.constant 0 : index
    %c0_4 = arith.constant 0 : index
    %4 = vector.load %arg16[%c0_3, %c0_4] : memref<8x326xf32, #tpu.memory_space<vmem>>, vector<8x19xf32>
    tpu.vector_store %arg16[%c0_3, %c0_4], %0 {strides = array<i32>} : memref<8x326xf32, #tpu.memory_space<vmem>>, vector<8x19xf32>,
    %c0_5 = arith.constant 0 : index
    %c307_6 = arith.constant 307 : index
    %5 = vector.load %arg16[%c0_5, %c307_6] : memref<8x326xf32, #tpu.memory_space<vmem>>, vector<8x19xf32>
    tpu.vector_store %arg16[%c0_5, %c307_6], %1 {strides = array<i32>} : memref<8x326xf32, #tpu.memory_space<vmem>>, vector<8x19xf32>,
    %6 = tpu.iota {dimensions = array<i32: 1>} : vector<1x288xi32>
    %c18_i32 = arith.constant 18 : i32
    %c0_i32 = arith.constant 0 : i32
    %7 = arith.cmpi eq, %c18_i32, %c0_i32 : i32
    %c1_i32 = arith.constant 1 : i32
    %8 = arith.select %7, %c1_i32, %c18_i32 : i32
    %9 = vector.broadcast %8 : i32 to vector<1x288xi32>
    %10 = arith.remsi %6, %9 : vector<1x288xi32>
    %c0_i32_7 = arith.constant 0 : i32
    %11 = vector.broadcast %c0_i32_7 : i32 to vector<1x288xi32>
    %12 = arith.cmpi ne, %10, %11 : vector<1x288xi32>
    %c0_i32_8 = arith.constant 0 : i32
    %13 = vector.broadcast %c0_i32_8 : i32 to vector<1x288xi32>
    %14 = arith.cmpi slt, %10, %13 : vector<1x288xi32>
    %c0_i32_9 = arith.constant 0 : i32
    %15 = arith.cmpi slt, %8, %c0_i32_9 : i32
    %16 = vector.broadcast %15 : i1 to vector<1x288xi1>
    %17 = vector.broadcast %16 : vector<1x288xi1> to vector<1x288xi1>
    %18 = arith.xori %14, %17 : vector<1x288xi1>
    %19 = arith.andi %18, %12 : vector<1x288xi1>
    %20 = vector.broadcast %8 : i32 to vector<1x288xi32>
    %21 = arith.addi %10, %20 : vector<1x288xi32>
    %22 = arith.select %19, %21, %10 : vector<1x288xi1>, vector<1x288xi32>
    %c16_i32 = arith.constant 16 : i32
    %23 = vector.broadcast %c16_i32 : i32 to vector<1x288xi32>
    %24 = arith.cmpi slt, %22, %23 : vector<1x288xi32>
    %cst_10 = arith.constant 0.000000e+00 : f32
    %25 = vector.broadcast %cst_10 : f32 to vector<8x288xf32>
    %c0_11 = arith.constant 0 : index
    %c0_12 = arith.constant 0 : index
    %c0_13 = arith.constant 0 : index
    %26 = vector.load %arg1[%c0_11, %c0_12, %c0_13] : memref<1x4x326xf32, #tpu.memory_space<vmem>>, vector<1x4x288xf32>
    %27 = vector.shape_cast %26 : vector<1x4x288xf32> to vector<4x288xf32>
    %c0_14 = arith.constant 0 : index
    %c0_15 = arith.constant 0 : index
    %c0_16 = arith.constant 0 : index
    %28 = vector.load %arg2[%c0_14, %c0_15, %c0_16] : memref<9x8x4xf32, #tpu.memory_space<vmem>>, vector<1x8x4xf32>
    %29 = vector.shape_cast %28 : vector<1x8x4xf32> to vector<8x4xf32>
    %cst_17 = arith.constant dense<0.000000e+00> : vector<8x288xf32>
    %30 = tpu.matmul %29, %27, %cst_17 {dimension_numbers = #tpu.dot_dimension_numbers<[1], [0], [0], [1], [0, 0, 1, 1], [], []>} : vector<8x4xf32>, vector<4x288xf32>, vector<8x288xf32> -> vector<8x288xf32>
    %31 = arith.addf %25, %30 : vector<8x288xf32>
    %c0_18 = arith.constant 0 : index
    %c0_19 = arith.constant 0 : index
    %c1 = arith.constant 1 : index
    %32 = vector.load %arg1[%c0_18, %c0_19, %c1] : memref<1x4x326xf32, #tpu.memory_space<vmem>>, vector<1x4x288xf32>
    %33 = vector.shape_cast %32 : vector<1x4x288xf32> to vector<4x288xf32>
    %c1_20 = arith.constant 1 : index
    %c0_21 = arith.constant 0 : index
    %c0_22 = arith.constant 0 : index
    %34 = vector.load %arg2[%c1_20, %c0_21, %c0_22] : memref<9x8x4xf32, #tpu.memory_space<vmem>>, vector<1x8x4xf32>
    %35 = vector.shape_cast %34 : vector<1x8x4xf32> to vector<8x4xf32>
    %cst_23 = arith.constant dense<0.000000e+00> : vector<8x288xf32>
    %36 = tpu.matmul %35, %33, %cst_23 {dimension_numbers = #tpu.dot_dimension_numbers<[1], [0], [0], [1], [0, 0, 1, 1], [], []>} : vector<8x4xf32>, vector<4x288xf32>, vector<8x288xf32> -> vector<8x288xf32>
    %37 = arith.addf %31, %36 : vector<8x288xf32>
    %c0_24 = arith.constant 0 : index
    %c0_25 = arith.constant 0 : index
    %c2 = arith.constant 2 : index
    %38 = vector.load %arg1[%c0_24, %c0_25, %c2] : memref<1x4x326xf32, #tpu.memory_space<vmem>>, vector<1x4x288xf32>
    %39 = vector.shape_cast %38 : vector<1x4x288xf32> to vector<4x288xf32>
    %c2_26 = arith.constant 2 : index
    %c0_27 = arith.constant 0 : index
    %c0_28 = arith.constant 0 : index
    %40 = vector.load %arg2[%c2_26, %c0_27, %c0_28] : memref<9x8x4xf32, #tpu.memory_space<vmem>>, vector<1x8x4xf32>
    %41 = vector.shape_cast %40 : vector<1x8x4xf32> to vector<8x4xf32>
    %cst_29 = arith.constant dense<0.000000e+00> : vector<8x288xf32>
    %42 = tpu.matmul %41, %39, %cst_29 {dimension_numbers = #tpu.dot_dimension_numbers<[1], [0], [0], [1], [0, 0, 1, 1], [], []>} : vector<8x4xf32>, vector<4x288xf32>, vector<8x288xf32> -> vector<8x288xf32>
    %43 = arith.addf %37, %42 : vector<8x288xf32>
    %c0_30 = arith.constant 0 : index
    %c0_31 = arith.constant 0 : index
    %c18 = arith.constant 18 : index
    %44 = vector.load %arg1[%c0_30, %c0_31, %c18] : memref<1x4x326xf32, #tpu.memory_space<vmem>>, vector<1x4x288xf32>
    %45 = vector.shape_cast %44 : vector<1x4x288xf32> to vector<4x288xf32>
    %c3 = arith.constant 3 : index
    %c0_32 = arith.constant 0 : index
    %c0_33 = arith.constant 0 : index
    %46 = vector.load %arg2[%c3, %c0_32, %c0_33] : memref<9x8x4xf32, #tpu.memory_space<vmem>>, vector<1x8x4xf32>
    %47 = vector.shape_cast %46 : vector<1x8x4xf32> to vector<8x4xf32>
    %cst_34 = arith.constant dense<0.000000e+00> : vector<8x288xf32>
    %48 = tpu.matmul %47, %45, %cst_34 {dimension_numbers = #tpu.dot_dimension_numbers<[1], [0], [0], [1], [0, 0, 1, 1], [], []>} : vector<8x4xf32>, vector<4x288xf32>, vector<8x288xf32> -> vector<8x288xf32>
    %49 = arith.addf %43, %48 : vector<8x288xf32>
    %c0_35 = arith.constant 0 : index
    %c0_36 = arith.constant 0 : index
    %c19 = arith.constant 19 : index
    %50 = vector.load %arg1[%c0_35, %c0_36, %c19] : memref<1x4x326xf32, #tpu.memory_space<vmem>>, vector<1x4x288xf32>
    %51 = vector.shape_cast %50 : vector<1x4x288xf32> to vector<4x288xf32>
    %c4 = arith.constant 4 : index
    %c0_37 = arith.constant 0 : index
    %c0_38 = arith.constant 0 : index
    %52 = vector.load %arg2[%c4, %c0_37, %c0_38] : memref<9x8x4xf32, #tpu.memory_space<vmem>>, vector<1x8x4xf32>
    %53 = vector.shape_cast %52 : vector<1x8x4xf32> to vector<8x4xf32>
    %cst_39 = arith.constant dense<0.000000e+00> : vector<8x288xf32>
    %54 = tpu.matmul %53, %51, %cst_39 {dimension_numbers = #tpu.dot_dimension_numbers<[1], [0], [0], [1], [0, 0, 1, 1], [], []>} : vector<8x4xf32>, vector<4x288xf32>, vector<8x288xf32> -> vector<8x288xf32>
    %55 = arith.addf %49, %54 : vector<8x288xf32>
    %c0_40 = arith.constant 0 : index
    %c0_41 = arith.constant 0 : index
    %c20 = arith.constant 20 : index
    %56 = vector.load %arg1[%c0_40, %c0_41, %c20] : memref<1x4x326xf32, #tpu.memory_space<vmem>>, vector<1x4x288xf32>
    %57 = vector.shape_cast %56 : vector<1x4x288xf32> to vector<4x288xf32>
    %c5 = arith.constant 5 : index
    %c0_42 = arith.constant 0 : index
    %c0_43 = arith.constant 0 : index
    %58 = vector.load %arg2[%c5, %c0_42, %c0_43] : memref<9x8x4xf32, #tpu.memory_space<vmem>>, vector<1x8x4xf32>
    %59 = vector.shape_cast %58 : vector<1x8x4xf32> to vector<8x4xf32>
    %cst_44 = arith.constant dense<0.000000e+00> : vector<8x288xf32>
    %60 = tpu.matmul %59, %57, %cst_44 {dimension_numbers = #tpu.dot_dimension_numbers<[1], [0], [0], [1], [0, 0, 1, 1], [], []>} : vector<8x4xf32>, vector<4x288xf32>, vector<8x288xf32> -> vector<8x288xf32>
    %61 = arith.addf %55, %60 : vector<8x288xf32>
    %c0_45 = arith.constant 0 : index
    %c0_46 = arith.constant 0 : index
    %c36 = arith.constant 36 : index
    %62 = vector.load %arg1[%c0_45, %c0_46, %c36] : memref<1x4x326xf32, #tpu.memory_space<vmem>>, vector<1x4x288xf32>
    %63 = vector.shape_cast %62 : vector<1x4x288xf32> to vector<4x288xf32>
    %c6 = arith.constant 6 : index
    %c0_47 = arith.constant 0 : index
    %c0_48 = arith.constant 0 : index
    %64 = vector.load %arg2[%c6, %c0_47, %c0_48] : memref<9x8x4xf32, #tpu.memory_space<vmem>>, vector<1x8x4xf32>
    %65 = vector.shape_cast %64 : vector<1x8x4xf32> to vector<8x4xf32>
    %cst_49 = arith.constant dense<0.000000e+00> : vector<8x288xf32>
    %66 = tpu.matmul %65, %63, %cst_49 {dimension_numbers = #tpu.dot_dimension_numbers<[1], [0], [0], [1], [0, 0, 1, 1], [], []>} : vector<8x4xf32>, vector<4x288xf32>, vector<8x288xf32> -> vector<8x288xf32>
    %67 = arith.addf %61, %66 : vector<8x288xf32>
    %c0_50 = arith.constant 0 : index
    %c0_51 = arith.constant 0 : index
    %c37 = arith.constant 37 : index
    %68 = vector.load %arg1[%c0_50, %c0_51, %c37] : memref<1x4x326xf32, #tpu.memory_space<vmem>>, vector<1x4x288xf32>
    %69 = vector.shape_cast %68 : vector<1x4x288xf32> to vector<4x288xf32>
    %c7 = arith.constant 7 : index
    %c0_52 = arith.constant 0 : index
    %c0_53 = arith.constant 0 : index
    %70 = vector.load %arg2[%c7, %c0_52, %c0_53] : memref<9x8x4xf32, #tpu.memory_space<vmem>>, vector<1x8x4xf32>
    %71 = vector.shape_cast %70 : vector<1x8x4xf32> to vector<8x4xf32>
    %cst_54 = arith.constant dense<0.000000e+00> : vector<8x288xf32>
    %72 = tpu.matmul %71, %69, %cst_54 {dimension_numbers = #tpu.dot_dimension_numbers<[1], [0], [0], [1], [0, 0, 1, 1], [], []>} : vector<8x4xf32>, vector<4x288xf32>, vector<8x288xf32> -> vector<8x288xf32>
    %73 = arith.addf %67, %72 : vector<8x288xf32>
    %c0_55 = arith.constant 0 : index
    %c0_56 = arith.constant 0 : index
    %c38 = arith.constant 38 : index
    %74 = vector.load %arg1[%c0_55, %c0_56, %c38] : memref<1x4x326xf32, #tpu.memory_space<vmem>>, vector<1x4x288xf32>
    %75 = vector.shape_cast %74 : vector<1x4x288xf32> to vector<4x288xf32>
    %c8 = arith.constant 8 : index
    %c0_57 = arith.constant 0 : index
    %c0_58 = arith.constant 0 : index
    %76 = vector.load %arg2[%c8, %c0_57, %c0_58] : memref<9x8x4xf32, #tpu.memory_space<vmem>>, vector<1x8x4xf32>
    %77 = vector.shape_cast %76 : vector<1x8x4xf32> to vector<8x4xf32>
    %cst_59 = arith.constant dense<0.000000e+00> : vector<8x288xf32>
    %78 = tpu.matmul %77, %75, %cst_59 {dimension_numbers = #tpu.dot_dimension_numbers<[1], [0], [0], [1], [0, 0, 1, 1], [], []>} : vector<8x4xf32>, vector<4x288xf32>, vector<8x288xf32> -> vector<8x288xf32>
    %79 = arith.addf %73, %78 : vector<8x288xf32>
    %c0_60 = arith.constant 0 : index
    %c0_61 = arith.constant 0 : index
    %80 = vector.load %arg3[%c0_60, %c0_61] : memref<8x1xf32, #tpu.memory_space<vmem>>, vector<8x1xf32>
    %81 = vector.broadcast %80 : vector<8x1xf32> to vector<8x288xf32>
    %82 = arith.addf %79, %81 : vector<8x288xf32>
    %cst_62 = arith.constant 0.000000e+00 : f32
    %83 = vector.broadcast %cst_62 : f32 to vector<8x288xf32>
    %84 = arith.maximumf %82, %83 : vector<8x288xf32>
    %cst_63 = arith.constant 0.000000e+00 : f32
    %85 = vector.shape_cast %24 : vector<1x288xi1> to vector<1x288xi1>
    %86 = vector.broadcast %85 : vector<1x288xi1> to vector<8x288xi1>
    %87 = vector.broadcast %cst_63 : f32 to vector<8x288xf32>
    %88 = arith.select %86, %84, %87 : vector<8x288xi1>, vector<8x288xf32>
    %c0_64 = arith.constant 0 : index
    %c19_65 = arith.constant 19 : index
    %89 = vector.load %arg15[%c0_64, %c19_65] : memref<8x326xf32, #tpu.memory_space<vmem>>, vector<8x288xf32>
    tpu.vector_store %arg15[%c0_64, %c19_65], %88 {strides = array<i32>} : memref<8x326xf32, #tpu.memory_space<vmem>>, vector<8x288xf32>,
    %cst_66 = arith.constant 0.000000e+00 : f32
    %90 = vector.broadcast %cst_66 : f32 to vector<8x288xf32>
    %c0_67 = arith.constant 0 : index
    %c0_68 = arith.constant 0 : index
    %91 = vector.load %arg15[%c0_67, %c0_68] : memref<8x326xf32, #tpu.memory_space<vmem>>, vector<8x288xf32>
    %c0_69 = arith.constant 0 : index
    %c0_70 = arith.constant 0 : index
    %c0_71 = arith.constant 0 : index
    %92 = vector.load %arg4[%c0_69, %c0_70, %c0_71] : memref<9x8x8xf32, #tpu.memory_space<vmem>>, vector<1x8x8xf32>
    %93 = vector.shape_cast %92 : vector<1x8x8xf32> to vector<8x8xf32>
    %cst_72 = arith.constant dense<0.000000e+00> : vector<8x288xf32>
    %94 = tpu.matmul %93, %91, %cst_72 {dimension_numbers = #tpu.dot_dimension_numbers<[1], [0], [0], [1], [0, 0, 1, 1], [], []>} : vector<8x8xf32>, vector<8x288xf32>, vector<8x288xf32> -> vector<8x288xf32>
    %95 = arith.addf %90, %94 : vector<8x288xf32>
    %c0_73 = arith.constant 0 : index
    %c1_74 = arith.constant 1 : index
    %96 = vector.load %arg15[%c0_73, %c1_74] : memref<8x326xf32, #tpu.memory_space<vmem>>, vector<8x288xf32>
    %c1_75 = arith.constant 1 : index
    %c0_76 = arith.constant 0 : index
    %c0_77 = arith.constant 0 : index
    %97 = vector.load %arg4[%c1_75, %c0_76, %c0_77] : memref<9x8x8xf32, #tpu.memory_space<vmem>>, vector<1x8x8xf32>
    %98 = vector.shape_cast %97 : vector<1x8x8xf32> to vector<8x8xf32>
    %cst_78 = arith.constant dense<0.000000e+00> : vector<8x288xf32>
    %99 = tpu.matmul %98, %96, %cst_78 {dimension_numbers = #tpu.dot_dimension_numbers<[1], [0], [0], [1], [0, 0, 1, 1], [], []>} : vector<8x8xf32>, vector<8x288xf32>, vector<8x288xf32> -> vector<8x288xf32>
    %100 = arith.addf %95, %99 : vector<8x288xf32>
    %c0_79 = arith.constant 0 : index
    %c2_80 = arith.constant 2 : index
    %101 = vector.load %arg15[%c0_79, %c2_80] : memref<8x326xf32, #tpu.memory_space<vmem>>, vector<8x288xf32>
    %c2_81 = arith.constant 2 : index
    %c0_82 = arith.constant 0 : index
    %c0_83 = arith.constant 0 : index
    %102 = vector.load %arg4[%c2_81, %c0_82, %c0_83] : memref<9x8x8xf32, #tpu.memory_space<vmem>>, vector<1x8x8xf32>
    %103 = vector.shape_cast %102 : vector<1x8x8xf32> to vector<8x8xf32>
    %cst_84 = arith.constant dense<0.000000e+00> : vector<8x288xf32>
    %104 = tpu.matmul %103, %101, %cst_84 {dimension_numbers = #tpu.dot_dimension_numbers<[1], [0], [0], [1], [0, 0, 1, 1], [], []>} : vector<8x8xf32>, vector<8x288xf32>, vector<8x288xf32> -> vector<8x288xf32>
    %105 = arith.addf %100, %104 : vector<8x288xf32>
    %c0_85 = arith.constant 0 : index
    %c18_86 = arith.constant 18 : index
    %106 = vector.load %arg15[%c0_85, %c18_86] : memref<8x326xf32, #tpu.memory_space<vmem>>, vector<8x288xf32>
    %c3_87 = arith.constant 3 : index
    %c0_88 = arith.constant 0 : index
    %c0_89 = arith.constant 0 : index
    %107 = vector.load %arg4[%c3_87, %c0_88, %c0_89] : memref<9x8x8xf32, #tpu.memory_space<vmem>>, vector<1x8x8xf32>
    %108 = vector.shape_cast %107 : vector<1x8x8xf32> to vector<8x8xf32>
    %cst_90 = arith.constant dense<0.000000e+00> : vector<8x288xf32>
    %109 = tpu.matmul %108, %106, %cst_90 {dimension_numbers = #tpu.dot_dimension_numbers<[1], [0], [0], [1], [0, 0, 1, 1], [], []>} : vector<8x8xf32>, vector<8x288xf32>, vector<8x288xf32> -> vector<8x288xf32>
    %110 = arith.addf %105, %109 : vector<8x288xf32>
    %c0_91 = arith.constant 0 : index
    %c19_92 = arith.constant 19 : index
    %111 = vector.load %arg15[%c0_91, %c19_92] : memref<8x326xf32, #tpu.memory_space<vmem>>, vector<8x288xf32>
    %c4_93 = arith.constant 4 : index
    %c0_94 = arith.constant 0 : index
    %c0_95 = arith.constant 0 : index
    %112 = vector.load %arg4[%c4_93, %c0_94, %c0_95] : memref<9x8x8xf32, #tpu.memory_space<vmem>>, vector<1x8x8xf32>
    %113 = vector.shape_cast %112 : vector<1x8x8xf32> to vector<8x8xf32>
    %cst_96 = arith.constant dense<0.000000e+00> : vector<8x288xf32>
    %114 = tpu.matmul %113, %111, %cst_96 {dimension_numbers = #tpu.dot_dimension_numbers<[1], [0], [0], [1], [0, 0, 1, 1], [], []>} : vector<8x8xf32>, vector<8x288xf32>, vector<8x288xf32> -> vector<8x288xf32>
    %115 = arith.addf %110, %114 : vector<8x288xf32>
    %c0_97 = arith.constant 0 : index
    %c20_98 = arith.constant 20 : index
    %116 = vector.load %arg15[%c0_97, %c20_98] : memref<8x326xf32, #tpu.memory_space<vmem>>, vector<8x288xf32>
    %c5_99 = arith.constant 5 : index
    %c0_100 = arith.constant 0 : index
    %c0_101 = arith.constant 0 : index
    %117 = vector.load %arg4[%c5_99, %c0_100, %c0_101] : memref<9x8x8xf32, #tpu.memory_space<vmem>>, vector<1x8x8xf32>
    %118 = vector.shape_cast %117 : vector<1x8x8xf32> to vector<8x8xf32>
    %cst_102 = arith.constant dense<0.000000e+00> : vector<8x288xf32>
    %119 = tpu.matmul %118, %116, %cst_102 {dimension_numbers = #tpu.dot_dimension_numbers<[1], [0], [0], [1], [0, 0, 1, 1], [], []>} : vector<8x8xf32>, vector<8x288xf32>, vector<8x288xf32> -> vector<8x288xf32>
    %120 = arith.addf %115, %119 : vector<8x288xf32>
    %c0_103 = arith.constant 0 : index
    %c36_104 = arith.constant 36 : index
    %121 = vector.load %arg15[%c0_103, %c36_104] : memref<8x326xf32, #tpu.memory_space<vmem>>, vector<8x288xf32>
    %c6_105 = arith.constant 6 : index
    %c0_106 = arith.constant 0 : index
    %c0_107 = arith.constant 0 : index
    %122 = vector.load %arg4[%c6_105, %c0_106, %c0_107] : memref<9x8x8xf32, #tpu.memory_space<vmem>>, vector<1x8x8xf32>
    %123 = vector.shape_cast %122 : vector<1x8x8xf32> to vector<8x8xf32>
    %cst_108 = arith.constant dense<0.000000e+00> : vector<8x288xf32>
    %124 = tpu.matmul %123, %121, %cst_108 {dimension_numbers = #tpu.dot_dimension_numbers<[1], [0], [0], [1], [0, 0, 1, 1], [], []>} : vector<8x8xf32>, vector<8x288xf32>, vector<8x288xf32> -> vector<8x288xf32>
    %125 = arith.addf %120, %124 : vector<8x288xf32>
    %c0_109 = arith.constant 0 : index
    %c37_110 = arith.constant 37 : index
    %126 = vector.load %arg15[%c0_109, %c37_110] : memref<8x326xf32, #tpu.memory_space<vmem>>, vector<8x288xf32>
    %c7_111 = arith.constant 7 : index
    %c0_112 = arith.constant 0 : index
    %c0_113 = arith.constant 0 : index
    %127 = vector.load %arg4[%c7_111, %c0_112, %c0_113] : memref<9x8x8xf32, #tpu.memory_space<vmem>>, vector<1x8x8xf32>
    %128 = vector.shape_cast %127 : vector<1x8x8xf32> to vector<8x8xf32>
    %cst_114 = arith.constant dense<0.000000e+00> : vector<8x288xf32>
    %129 = tpu.matmul %128, %126, %cst_114 {dimension_numbers = #tpu.dot_dimension_numbers<[1], [0], [0], [1], [0, 0, 1, 1], [], []>} : vector<8x8xf32>, vector<8x288xf32>, vector<8x288xf32> -> vector<8x288xf32>
    %130 = arith.addf %125, %129 : vector<8x288xf32>
    %c0_115 = arith.constant 0 : index
    %c38_116 = arith.constant 38 : index
    %131 = vector.load %arg15[%c0_115, %c38_116] : memref<8x326xf32, #tpu.memory_space<vmem>>, vector<8x288xf32>
    %c8_117 = arith.constant 8 : index
    %c0_118 = arith.constant 0 : index
    %c0_119 = arith.constant 0 : index
    %132 = vector.load %arg4[%c8_117, %c0_118, %c0_119] : memref<9x8x8xf32, #tpu.memory_space<vmem>>, vector<1x8x8xf32>
    %133 = vector.shape_cast %132 : vector<1x8x8xf32> to vector<8x8xf32>
    %cst_120 = arith.constant dense<0.000000e+00> : vector<8x288xf32>
    %134 = tpu.matmul %133, %131, %cst_120 {dimension_numbers = #tpu.dot_dimension_numbers<[1], [0], [0], [1], [0, 0, 1, 1], [], []>} : vector<8x8xf32>, vector<8x288xf32>, vector<8x288xf32> -> vector<8x288xf32>
    %135 = arith.addf %130, %134 : vector<8x288xf32>
    %c0_121 = arith.constant 0 : index
    %c0_122 = arith.constant 0 : index
    %136 = vector.load %arg5[%c0_121, %c0_122] : memref<8x1xf32, #tpu.memory_space<vmem>>, vector<8x1xf32>
    %137 = vector.broadcast %136 : vector<8x1xf32> to vector<8x288xf32>
    %138 = arith.addf %135, %137 : vector<8x288xf32>
    %cst_123 = arith.constant 0.000000e+00 : f32
    %139 = vector.broadcast %cst_123 : f32 to vector<8x288xf32>
    %140 = arith.maximumf %138, %139 : vector<8x288xf32>
    %cst_124 = arith.constant 0.000000e+00 : f32
    %141 = vector.shape_cast %24 : vector<1x288xi1> to vector<1x288xi1>
    %142 = vector.broadcast %141 : vector<1x288xi1> to vector<8x288xi1>
    %143 = vector.broadcast %cst_124 : f32 to vector<8x288xf32>
    %144 = arith.select %142, %140, %143 : vector<8x288xi1>, vector<8x288xf32>
    %c0_125 = arith.constant 0 : index
    %c19_126 = arith.constant 19 : index
    %145 = vector.load %arg16[%c0_125, %c19_126] : memref<8x326xf32, #tpu.memory_space<vmem>>, vector<8x288xf32>
    tpu.vector_store %arg16[%c0_125, %c19_126], %144 {strides = array<i32>} : memref<8x326xf32, #tpu.memory_space<vmem>>, vector<8x288xf32>,
    %cst_127 = arith.constant 0.000000e+00 : f32
    %146 = vector.broadcast %cst_127 : f32 to vector<8x288xf32>
    %c0_128 = arith.constant 0 : index
    %c0_129 = arith.constant 0 : index
    %147 = vector.load %arg16[%c0_128, %c0_129] : memref<8x326xf32, #tpu.memory_space<vmem>>, vector<8x288xf32>
    %c0_130 = arith.constant 0 : index
    %c0_131 = arith.constant 0 : index
    %c0_132 = arith.constant 0 : index
    %148 = vector.load %arg6[%c0_130, %c0_131, %c0_132] : memref<9x8x8xf32, #tpu.memory_space<vmem>>, vector<1x8x8xf32>
    %149 = vector.shape_cast %148 : vector<1x8x8xf32> to vector<8x8xf32>
    %cst_133 = arith.constant dense<0.000000e+00> : vector<8x288xf32>
    %150 = tpu.matmul %149, %147, %cst_133 {dimension_numbers = #tpu.dot_dimension_numbers<[1], [0], [0], [1], [0, 0, 1, 1], [], []>} : vector<8x8xf32>, vector<8x288xf32>, vector<8x288xf32> -> vector<8x288xf32>
    %151 = arith.addf %146, %150 : vector<8x288xf32>
    %c0_134 = arith.constant 0 : index
    %c1_135 = arith.constant 1 : index
    %152 = vector.load %arg16[%c0_134, %c1_135] : memref<8x326xf32, #tpu.memory_space<vmem>>, vector<8x288xf32>
    %c1_136 = arith.constant 1 : index
    %c0_137 = arith.constant 0 : index
    %c0_138 = arith.constant 0 : index
    %153 = vector.load %arg6[%c1_136, %c0_137, %c0_138] : memref<9x8x8xf32, #tpu.memory_space<vmem>>, vector<1x8x8xf32>
    %154 = vector.shape_cast %153 : vector<1x8x8xf32> to vector<8x8xf32>
    %cst_139 = arith.constant dense<0.000000e+00> : vector<8x288xf32>
    %155 = tpu.matmul %154, %152, %cst_139 {dimension_numbers = #tpu.dot_dimension_numbers<[1], [0], [0], [1], [0, 0, 1, 1], [], []>} : vector<8x8xf32>, vector<8x288xf32>, vector<8x288xf32> -> vector<8x288xf32>
    %156 = arith.addf %151, %155 : vector<8x288xf32>
    %c0_140 = arith.constant 0 : index
    %c2_141 = arith.constant 2 : index
    %157 = vector.load %arg16[%c0_140, %c2_141] : memref<8x326xf32, #tpu.memory_space<vmem>>, vector<8x288xf32>
    %c2_142 = arith.constant 2 : index
    %c0_143 = arith.constant 0 : index
    %c0_144 = arith.constant 0 : index
    %158 = vector.load %arg6[%c2_142, %c0_143, %c0_144] : memref<9x8x8xf32, #tpu.memory_space<vmem>>, vector<1x8x8xf32>
    %159 = vector.shape_cast %158 : vector<1x8x8xf32> to vector<8x8xf32>
    %cst_145 = arith.constant dense<0.000000e+00> : vector<8x288xf32>
    %160 = tpu.matmul %159, %157, %cst_145 {dimension_numbers = #tpu.dot_dimension_numbers<[1], [0], [0], [1], [0, 0, 1, 1], [], []>} : vector<8x8xf32>, vector<8x288xf32>, vector<8x288xf32> -> vector<8x288xf32>
    %161 = arith.addf %156, %160 : vector<8x288xf32>
    %c0_146 = arith.constant 0 : index
    %c18_147 = arith.constant 18 : index
    %162 = vector.load %arg16[%c0_146, %c18_147] : memref<8x326xf32, #tpu.memory_space<vmem>>, vector<8x288xf32>
    %c3_148 = arith.constant 3 : index
    %c0_149 = arith.constant 0 : index
    %c0_150 = arith.constant 0 : index
    %163 = vector.load %arg6[%c3_148, %c0_149, %c0_150] : memref<9x8x8xf32, #tpu.memory_space<vmem>>, vector<1x8x8xf32>
    %164 = vector.shape_cast %163 : vector<1x8x8xf32> to vector<8x8xf32>
    %cst_151 = arith.constant dense<0.000000e+00> : vector<8x288xf32>
    %165 = tpu.matmul %164, %162, %cst_151 {dimension_numbers = #tpu.dot_dimension_numbers<[1], [0], [0], [1], [0, 0, 1, 1], [], []>} : vector<8x8xf32>, vector<8x288xf32>, vector<8x288xf32> -> vector<8x288xf32>
    %166 = arith.addf %161, %165 : vector<8x288xf32>
    %c0_152 = arith.constant 0 : index
    %c19_153 = arith.constant 19 : index
    %167 = vector.load %arg16[%c0_152, %c19_153] : memref<8x326xf32, #tpu.memory_space<vmem>>, vector<8x288xf32>
    %c4_154 = arith.constant 4 : index
    %c0_155 = arith.constant 0 : index
    %c0_156 = arith.constant 0 : index
    %168 = vector.load %arg6[%c4_154, %c0_155, %c0_156] : memref<9x8x8xf32, #tpu.memory_space<vmem>>, vector<1x8x8xf32>
    %169 = vector.shape_cast %168 : vector<1x8x8xf32> to vector<8x8xf32>
    %cst_157 = arith.constant dense<0.000000e+00> : vector<8x288xf32>
    %170 = tpu.matmul %169, %167, %cst_157 {dimension_numbers = #tpu.dot_dimension_numbers<[1], [0], [0], [1], [0, 0, 1, 1], [], []>} : vector<8x8xf32>, vector<8x288xf32>, vector<8x288xf32> -> vector<8x288xf32>
    %171 = arith.addf %166, %170 : vector<8x288xf32>
    %c0_158 = arith.constant 0 : index
    %c20_159 = arith.constant 20 : index
    %172 = vector.load %arg16[%c0_158, %c20_159] : memref<8x326xf32, #tpu.memory_space<vmem>>, vector<8x288xf32>
    %c5_160 = arith.constant 5 : index
    %c0_161 = arith.constant 0 : index
    %c0_162 = arith.constant 0 : index
    %173 = vector.load %arg6[%c5_160, %c0_161, %c0_162] : memref<9x8x8xf32, #tpu.memory_space<vmem>>, vector<1x8x8xf32>
    %174 = vector.shape_cast %173 : vector<1x8x8xf32> to vector<8x8xf32>
    %cst_163 = arith.constant dense<0.000000e+00> : vector<8x288xf32>
    %175 = tpu.matmul %174, %172, %cst_163 {dimension_numbers = #tpu.dot_dimension_numbers<[1], [0], [0], [1], [0, 0, 1, 1], [], []>} : vector<8x8xf32>, vector<8x288xf32>, vector<8x288xf32> -> vector<8x288xf32>
    %176 = arith.addf %171, %175 : vector<8x288xf32>
    %c0_164 = arith.constant 0 : index
    %c36_165 = arith.constant 36 : index
    %177 = vector.load %arg16[%c0_164, %c36_165] : memref<8x326xf32, #tpu.memory_space<vmem>>, vector<8x288xf32>
    %c6_166 = arith.constant 6 : index
    %c0_167 = arith.constant 0 : index
    %c0_168 = arith.constant 0 : index
    %178 = vector.load %arg6[%c6_166, %c0_167, %c0_168] : memref<9x8x8xf32, #tpu.memory_space<vmem>>, vector<1x8x8xf32>
    %179 = vector.shape_cast %178 : vector<1x8x8xf32> to vector<8x8xf32>
    %cst_169 = arith.constant dense<0.000000e+00> : vector<8x288xf32>
    %180 = tpu.matmul %179, %177, %cst_169 {dimension_numbers = #tpu.dot_dimension_numbers<[1], [0], [0], [1], [0, 0, 1, 1], [], []>} : vector<8x8xf32>, vector<8x288xf32>, vector<8x288xf32> -> vector<8x288xf32>
    %181 = arith.addf %176, %180 : vector<8x288xf32>
    %c0_170 = arith.constant 0 : index
    %c37_171 = arith.constant 37 : index
    %182 = vector.load %arg16[%c0_170, %c37_171] : memref<8x326xf32, #tpu.memory_space<vmem>>, vector<8x288xf32>
    %c7_172 = arith.constant 7 : index
    %c0_173 = arith.constant 0 : index
    %c0_174 = arith.constant 0 : index
    %183 = vector.load %arg6[%c7_172, %c0_173, %c0_174] : memref<9x8x8xf32, #tpu.memory_space<vmem>>, vector<1x8x8xf32>
    %184 = vector.shape_cast %183 : vector<1x8x8xf32> to vector<8x8xf32>
    %cst_175 = arith.constant dense<0.000000e+00> : vector<8x288xf32>
    %185 = tpu.matmul %184, %182, %cst_175 {dimension_numbers = #tpu.dot_dimension_numbers<[1], [0], [0], [1], [0, 0, 1, 1], [], []>} : vector<8x8xf32>, vector<8x288xf32>, vector<8x288xf32> -> vector<8x288xf32>
    %186 = arith.addf %181, %185 : vector<8x288xf32>
    %c0_176 = arith.constant 0 : index
    %c38_177 = arith.constant 38 : index
    %187 = vector.load %arg16[%c0_176, %c38_177] : memref<8x326xf32, #tpu.memory_space<vmem>>, vector<8x288xf32>
    %c8_178 = arith.constant 8 : index
    %c0_179 = arith.constant 0 : index
    %c0_180 = arith.constant 0 : index
    %188 = vector.load %arg6[%c8_178, %c0_179, %c0_180] : memref<9x8x8xf32, #tpu.memory_space<vmem>>, vector<1x8x8xf32>
    %189 = vector.shape_cast %188 : vector<1x8x8xf32> to vector<8x8xf32>
    %cst_181 = arith.constant dense<0.000000e+00> : vector<8x288xf32>
    %190 = tpu.matmul %189, %187, %cst_181 {dimension_numbers = #tpu.dot_dimension_numbers<[1], [0], [0], [1], [0, 0, 1, 1], [], []>} : vector<8x8xf32>, vector<8x288xf32>, vector<8x288xf32> -> vector<8x288xf32>
    %191 = arith.addf %186, %190 : vector<8x288xf32>
    %c0_182 = arith.constant 0 : index
    %c0_183 = arith.constant 0 : index
    %192 = vector.load %arg7[%c0_182, %c0_183] : memref<8x1xf32, #tpu.memory_space<vmem>>, vector<8x1xf32>
    %193 = vector.broadcast %192 : vector<8x1xf32> to vector<8x288xf32>
    %194 = arith.addf %191, %193 : vector<8x288xf32>
    %cst_184 = arith.constant 0.000000e+00 : f32
    %195 = vector.broadcast %cst_184 : f32 to vector<8x288xf32>
    %196 = arith.maximumf %194, %195 : vector<8x288xf32>
    %cst_185 = arith.constant 0.000000e+00 : f32
    %197 = vector.shape_cast %24 : vector<1x288xi1> to vector<1x288xi1>
    %198 = vector.broadcast %197 : vector<1x288xi1> to vector<8x288xi1>
    %199 = vector.broadcast %cst_185 : f32 to vector<8x288xf32>
    %200 = arith.select %198, %196, %199 : vector<8x288xi1>, vector<8x288xf32>
    %c0_186 = arith.constant 0 : index
    %c19_187 = arith.constant 19 : index
    %201 = vector.load %arg15[%c0_186, %c19_187] : memref<8x326xf32, #tpu.memory_space<vmem>>, vector<8x288xf32>
    tpu.vector_store %arg15[%c0_186, %c19_187], %200 {strides = array<i32>} : memref<8x326xf32, #tpu.memory_space<vmem>>, vector<8x288xf32>,
    %cst_188 = arith.constant 0.000000e+00 : f32
    %202 = vector.broadcast %cst_188 : f32 to vector<8x288xf32>
    %c0_189 = arith.constant 0 : index
    %c0_190 = arith.constant 0 : index
    %203 = vector.load %arg15[%c0_189, %c0_190] : memref<8x326xf32, #tpu.memory_space<vmem>>, vector<8x288xf32>
    %c0_191 = arith.constant 0 : index
    %c0_192 = arith.constant 0 : index
    %c0_193 = arith.constant 0 : index
    %204 = vector.load %arg8[%c0_191, %c0_192, %c0_193] : memref<9x8x8xf32, #tpu.memory_space<vmem>>, vector<1x8x8xf32>
    %205 = vector.shape_cast %204 : vector<1x8x8xf32> to vector<8x8xf32>
    %cst_194 = arith.constant dense<0.000000e+00> : vector<8x288xf32>
    %206 = tpu.matmul %205, %203, %cst_194 {dimension_numbers = #tpu.dot_dimension_numbers<[1], [0], [0], [1], [0, 0, 1, 1], [], []>} : vector<8x8xf32>, vector<8x288xf32>, vector<8x288xf32> -> vector<8x288xf32>
    %207 = arith.addf %202, %206 : vector<8x288xf32>
    %c0_195 = arith.constant 0 : index
    %c1_196 = arith.constant 1 : index
    %208 = vector.load %arg15[%c0_195, %c1_196] : memref<8x326xf32, #tpu.memory_space<vmem>>, vector<8x288xf32>
    %c1_197 = arith.constant 1 : index
    %c0_198 = arith.constant 0 : index
    %c0_199 = arith.constant 0 : index
    %209 = vector.load %arg8[%c1_197, %c0_198, %c0_199] : memref<9x8x8xf32, #tpu.memory_space<vmem>>, vector<1x8x8xf32>
    %210 = vector.shape_cast %209 : vector<1x8x8xf32> to vector<8x8xf32>
    %cst_200 = arith.constant dense<0.000000e+00> : vector<8x288xf32>
    %211 = tpu.matmul %210, %208, %cst_200 {dimension_numbers = #tpu.dot_dimension_numbers<[1], [0], [0], [1], [0, 0, 1, 1], [], []>} : vector<8x8xf32>, vector<8x288xf32>, vector<8x288xf32> -> vector<8x288xf32>
    %212 = arith.addf %207, %211 : vector<8x288xf32>
    %c0_201 = arith.constant 0 : index
    %c2_202 = arith.constant 2 : index
    %213 = vector.load %arg15[%c0_201, %c2_202] : memref<8x326xf32, #tpu.memory_space<vmem>>, vector<8x288xf32>
    %c2_203 = arith.constant 2 : index
    %c0_204 = arith.constant 0 : index
    %c0_205 = arith.constant 0 : index
    %214 = vector.load %arg8[%c2_203, %c0_204, %c0_205] : memref<9x8x8xf32, #tpu.memory_space<vmem>>, vector<1x8x8xf32>
    %215 = vector.shape_cast %214 : vector<1x8x8xf32> to vector<8x8xf32>
    %cst_206 = arith.constant dense<0.000000e+00> : vector<8x288xf32>
    %216 = tpu.matmul %215, %213, %cst_206 {dimension_numbers = #tpu.dot_dimension_numbers<[1], [0], [0], [1], [0, 0, 1, 1], [], []>} : vector<8x8xf32>, vector<8x288xf32>, vector<8x288xf32> -> vector<8x288xf32>
    %217 = arith.addf %212, %216 : vector<8x288xf32>
    %c0_207 = arith.constant 0 : index
    %c18_208 = arith.constant 18 : index
    %218 = vector.load %arg15[%c0_207, %c18_208] : memref<8x326xf32, #tpu.memory_space<vmem>>, vector<8x288xf32>
    %c3_209 = arith.constant 3 : index
    %c0_210 = arith.constant 0 : index
    %c0_211 = arith.constant 0 : index
    %219 = vector.load %arg8[%c3_209, %c0_210, %c0_211] : memref<9x8x8xf32, #tpu.memory_space<vmem>>, vector<1x8x8xf32>
    %220 = vector.shape_cast %219 : vector<1x8x8xf32> to vector<8x8xf32>
    %cst_212 = arith.constant dense<0.000000e+00> : vector<8x288xf32>
    %221 = tpu.matmul %220, %218, %cst_212 {dimension_numbers = #tpu.dot_dimension_numbers<[1], [0], [0], [1], [0, 0, 1, 1], [], []>} : vector<8x8xf32>, vector<8x288xf32>, vector<8x288xf32> -> vector<8x288xf32>
    %222 = arith.addf %217, %221 : vector<8x288xf32>
    %c0_213 = arith.constant 0 : index
    %c19_214 = arith.constant 19 : index
    %223 = vector.load %arg15[%c0_213, %c19_214] : memref<8x326xf32, #tpu.memory_space<vmem>>, vector<8x288xf32>
    %c4_215 = arith.constant 4 : index
    %c0_216 = arith.constant 0 : index
    %c0_217 = arith.constant 0 : index
    %224 = vector.load %arg8[%c4_215, %c0_216, %c0_217] : memref<9x8x8xf32, #tpu.memory_space<vmem>>, vector<1x8x8xf32>
    %225 = vector.shape_cast %224 : vector<1x8x8xf32> to vector<8x8xf32>
    %cst_218 = arith.constant dense<0.000000e+00> : vector<8x288xf32>
    %226 = tpu.matmul %225, %223, %cst_218 {dimension_numbers = #tpu.dot_dimension_numbers<[1], [0], [0], [1], [0, 0, 1, 1], [], []>} : vector<8x8xf32>, vector<8x288xf32>, vector<8x288xf32> -> vector<8x288xf32>
    %227 = arith.addf %222, %226 : vector<8x288xf32>
    %c0_219 = arith.constant 0 : index
    %c20_220 = arith.constant 20 : index
    %228 = vector.load %arg15[%c0_219, %c20_220] : memref<8x326xf32, #tpu.memory_space<vmem>>, vector<8x288xf32>
    %c5_221 = arith.constant 5 : index
    %c0_222 = arith.constant 0 : index
    %c0_223 = arith.constant 0 : index
    %229 = vector.load %arg8[%c5_221, %c0_222, %c0_223] : memref<9x8x8xf32, #tpu.memory_space<vmem>>, vector<1x8x8xf32>
    %230 = vector.shape_cast %229 : vector<1x8x8xf32> to vector<8x8xf32>
    %cst_224 = arith.constant dense<0.000000e+00> : vector<8x288xf32>
    %231 = tpu.matmul %230, %228, %cst_224 {dimension_numbers = #tpu.dot_dimension_numbers<[1], [0], [0], [1], [0, 0, 1, 1], [], []>} : vector<8x8xf32>, vector<8x288xf32>, vector<8x288xf32> -> vector<8x288xf32>
    %232 = arith.addf %227, %231 : vector<8x288xf32>
    %c0_225 = arith.constant 0 : index
    %c36_226 = arith.constant 36 : index
    %233 = vector.load %arg15[%c0_225, %c36_226] : memref<8x326xf32, #tpu.memory_space<vmem>>, vector<8x288xf32>
    %c6_227 = arith.constant 6 : index
    %c0_228 = arith.constant 0 : index
    %c0_229 = arith.constant 0 : index
    %234 = vector.load %arg8[%c6_227, %c0_228, %c0_229] : memref<9x8x8xf32, #tpu.memory_space<vmem>>, vector<1x8x8xf32>
    %235 = vector.shape_cast %234 : vector<1x8x8xf32> to vector<8x8xf32>
    %cst_230 = arith.constant dense<0.000000e+00> : vector<8x288xf32>
    %236 = tpu.matmul %235, %233, %cst_230 {dimension_numbers = #tpu.dot_dimension_numbers<[1], [0], [0], [1], [0, 0, 1, 1], [], []>} : vector<8x8xf32>, vector<8x288xf32>, vector<8x288xf32> -> vector<8x288xf32>
    %237 = arith.addf %232, %236 : vector<8x288xf32>
    %c0_231 = arith.constant 0 : index
    %c37_232 = arith.constant 37 : index
    %238 = vector.load %arg15[%c0_231, %c37_232] : memref<8x326xf32, #tpu.memory_space<vmem>>, vector<8x288xf32>
    %c7_233 = arith.constant 7 : index
    %c0_234 = arith.constant 0 : index
    %c0_235 = arith.constant 0 : index
    %239 = vector.load %arg8[%c7_233, %c0_234, %c0_235] : memref<9x8x8xf32, #tpu.memory_space<vmem>>, vector<1x8x8xf32>
    %240 = vector.shape_cast %239 : vector<1x8x8xf32> to vector<8x8xf32>
    %cst_236 = arith.constant dense<0.000000e+00> : vector<8x288xf32>
    %241 = tpu.matmul %240, %238, %cst_236 {dimension_numbers = #tpu.dot_dimension_numbers<[1], [0], [0], [1], [0, 0, 1, 1], [], []>} : vector<8x8xf32>, vector<8x288xf32>, vector<8x288xf32> -> vector<8x288xf32>
    %242 = arith.addf %237, %241 : vector<8x288xf32>
    %c0_237 = arith.constant 0 : index
    %c38_238 = arith.constant 38 : index
    %243 = vector.load %arg15[%c0_237, %c38_238] : memref<8x326xf32, #tpu.memory_space<vmem>>, vector<8x288xf32>
    %c8_239 = arith.constant 8 : index
    %c0_240 = arith.constant 0 : index
    %c0_241 = arith.constant 0 : index
    %244 = vector.load %arg8[%c8_239, %c0_240, %c0_241] : memref<9x8x8xf32, #tpu.memory_space<vmem>>, vector<1x8x8xf32>
    %245 = vector.shape_cast %244 : vector<1x8x8xf32> to vector<8x8xf32>
    %cst_242 = arith.constant dense<0.000000e+00> : vector<8x288xf32>
    %246 = tpu.matmul %245, %243, %cst_242 {dimension_numbers = #tpu.dot_dimension_numbers<[1], [0], [0], [1], [0, 0, 1, 1], [], []>} : vector<8x8xf32>, vector<8x288xf32>, vector<8x288xf32> -> vector<8x288xf32>
    %247 = arith.addf %242, %246 : vector<8x288xf32>
    %c0_243 = arith.constant 0 : index
    %c0_244 = arith.constant 0 : index
    %248 = vector.load %arg9[%c0_243, %c0_244] : memref<8x1xf32, #tpu.memory_space<vmem>>, vector<8x1xf32>
    %249 = vector.broadcast %248 : vector<8x1xf32> to vector<8x288xf32>
    %250 = arith.addf %247, %249 : vector<8x288xf32>
    %cst_245 = arith.constant 0.000000e+00 : f32
    %251 = vector.broadcast %cst_245 : f32 to vector<8x288xf32>
    %252 = arith.maximumf %250, %251 : vector<8x288xf32>
    %cst_246 = arith.constant 0.000000e+00 : f32
    %253 = vector.shape_cast %24 : vector<1x288xi1> to vector<1x288xi1>
    %254 = vector.broadcast %253 : vector<1x288xi1> to vector<8x288xi1>
    %255 = vector.broadcast %cst_246 : f32 to vector<8x288xf32>
    %256 = arith.select %254, %252, %255 : vector<8x288xi1>, vector<8x288xf32>
    %c0_247 = arith.constant 0 : index
    %c19_248 = arith.constant 19 : index
    %257 = vector.load %arg16[%c0_247, %c19_248] : memref<8x326xf32, #tpu.memory_space<vmem>>, vector<8x288xf32>
    tpu.vector_store %arg16[%c0_247, %c19_248], %256 {strides = array<i32>} : memref<8x326xf32, #tpu.memory_space<vmem>>, vector<8x288xf32>,
    %cst_249 = arith.constant 0.000000e+00 : f32
    %258 = vector.broadcast %cst_249 : f32 to vector<8x288xf32>
    %c0_250 = arith.constant 0 : index
    %c0_251 = arith.constant 0 : index
    %259 = vector.load %arg16[%c0_250, %c0_251] : memref<8x326xf32, #tpu.memory_space<vmem>>, vector<8x288xf32>
    %c0_252 = arith.constant 0 : index
    %c0_253 = arith.constant 0 : index
    %c0_254 = arith.constant 0 : index
    %260 = vector.load %arg10[%c0_252, %c0_253, %c0_254] : memref<9x8x8xf32, #tpu.memory_space<vmem>>, vector<1x8x8xf32>
    %261 = vector.shape_cast %260 : vector<1x8x8xf32> to vector<8x8xf32>
    %cst_255 = arith.constant dense<0.000000e+00> : vector<8x288xf32>
    %262 = tpu.matmul %261, %259, %cst_255 {dimension_numbers = #tpu.dot_dimension_numbers<[1], [0], [0], [1], [0, 0, 1, 1], [], []>} : vector<8x8xf32>, vector<8x288xf32>, vector<8x288xf32> -> vector<8x288xf32>
    %263 = arith.addf %258, %262 : vector<8x288xf32>
    %c0_256 = arith.constant 0 : index
    %c1_257 = arith.constant 1 : index
    %264 = vector.load %arg16[%c0_256, %c1_257] : memref<8x326xf32, #tpu.memory_space<vmem>>, vector<8x288xf32>
    %c1_258 = arith.constant 1 : index
    %c0_259 = arith.constant 0 : index
    %c0_260 = arith.constant 0 : index
    %265 = vector.load %arg10[%c1_258, %c0_259, %c0_260] : memref<9x8x8xf32, #tpu.memory_space<vmem>>, vector<1x8x8xf32>
    %266 = vector.shape_cast %265 : vector<1x8x8xf32> to vector<8x8xf32>
    %cst_261 = arith.constant dense<0.000000e+00> : vector<8x288xf32>
    %267 = tpu.matmul %266, %264, %cst_261 {dimension_numbers = #tpu.dot_dimension_numbers<[1], [0], [0], [1], [0, 0, 1, 1], [], []>} : vector<8x8xf32>, vector<8x288xf32>, vector<8x288xf32> -> vector<8x288xf32>
    %268 = arith.addf %263, %267 : vector<8x288xf32>
    %c0_262 = arith.constant 0 : index
    %c2_263 = arith.constant 2 : index
    %269 = vector.load %arg16[%c0_262, %c2_263] : memref<8x326xf32, #tpu.memory_space<vmem>>, vector<8x288xf32>
    %c2_264 = arith.constant 2 : index
    %c0_265 = arith.constant 0 : index
    %c0_266 = arith.constant 0 : index
    %270 = vector.load %arg10[%c2_264, %c0_265, %c0_266] : memref<9x8x8xf32, #tpu.memory_space<vmem>>, vector<1x8x8xf32>
    %271 = vector.shape_cast %270 : vector<1x8x8xf32> to vector<8x8xf32>
    %cst_267 = arith.constant dense<0.000000e+00> : vector<8x288xf32>
    %272 = tpu.matmul %271, %269, %cst_267 {dimension_numbers = #tpu.dot_dimension_numbers<[1], [0], [0], [1], [0, 0, 1, 1], [], []>} : vector<8x8xf32>, vector<8x288xf32>, vector<8x288xf32> -> vector<8x288xf32>
    %273 = arith.addf %268, %272 : vector<8x288xf32>
    %c0_268 = arith.constant 0 : index
    %c18_269 = arith.constant 18 : index
    %274 = vector.load %arg16[%c0_268, %c18_269] : memref<8x326xf32, #tpu.memory_space<vmem>>, vector<8x288xf32>
    %c3_270 = arith.constant 3 : index
    %c0_271 = arith.constant 0 : index
    %c0_272 = arith.constant 0 : index
    %275 = vector.load %arg10[%c3_270, %c0_271, %c0_272] : memref<9x8x8xf32, #tpu.memory_space<vmem>>, vector<1x8x8xf32>
    %276 = vector.shape_cast %275 : vector<1x8x8xf32> to vector<8x8xf32>
    %cst_273 = arith.constant dense<0.000000e+00> : vector<8x288xf32>
    %277 = tpu.matmul %276, %274, %cst_273 {dimension_numbers = #tpu.dot_dimension_numbers<[1], [0], [0], [1], [0, 0, 1, 1], [], []>} : vector<8x8xf32>, vector<8x288xf32>, vector<8x288xf32> -> vector<8x288xf32>
    %278 = arith.addf %273, %277 : vector<8x288xf32>
    %c0_274 = arith.constant 0 : index
    %c19_275 = arith.constant 19 : index
    %279 = vector.load %arg16[%c0_274, %c19_275] : memref<8x326xf32, #tpu.memory_space<vmem>>, vector<8x288xf32>
    %c4_276 = arith.constant 4 : index
    %c0_277 = arith.constant 0 : index
    %c0_278 = arith.constant 0 : index
    %280 = vector.load %arg10[%c4_276, %c0_277, %c0_278] : memref<9x8x8xf32, #tpu.memory_space<vmem>>, vector<1x8x8xf32>
    %281 = vector.shape_cast %280 : vector<1x8x8xf32> to vector<8x8xf32>
    %cst_279 = arith.constant dense<0.000000e+00> : vector<8x288xf32>
    %282 = tpu.matmul %281, %279, %cst_279 {dimension_numbers = #tpu.dot_dimension_numbers<[1], [0], [0], [1], [0, 0, 1, 1], [], []>} : vector<8x8xf32>, vector<8x288xf32>, vector<8x288xf32> -> vector<8x288xf32>
    %283 = arith.addf %278, %282 : vector<8x288xf32>
    %c0_280 = arith.constant 0 : index
    %c20_281 = arith.constant 20 : index
    %284 = vector.load %arg16[%c0_280, %c20_281] : memref<8x326xf32, #tpu.memory_space<vmem>>, vector<8x288xf32>
    %c5_282 = arith.constant 5 : index
    %c0_283 = arith.constant 0 : index
    %c0_284 = arith.constant 0 : index
    %285 = vector.load %arg10[%c5_282, %c0_283, %c0_284] : memref<9x8x8xf32, #tpu.memory_space<vmem>>, vector<1x8x8xf32>
    %286 = vector.shape_cast %285 : vector<1x8x8xf32> to vector<8x8xf32>
    %cst_285 = arith.constant dense<0.000000e+00> : vector<8x288xf32>
    %287 = tpu.matmul %286, %284, %cst_285 {dimension_numbers = #tpu.dot_dimension_numbers<[1], [0], [0], [1], [0, 0, 1, 1], [], []>} : vector<8x8xf32>, vector<8x288xf32>, vector<8x288xf32> -> vector<8x288xf32>
    %288 = arith.addf %283, %287 : vector<8x288xf32>
    %c0_286 = arith.constant 0 : index
    %c36_287 = arith.constant 36 : index
    %289 = vector.load %arg16[%c0_286, %c36_287] : memref<8x326xf32, #tpu.memory_space<vmem>>, vector<8x288xf32>
    %c6_288 = arith.constant 6 : index
    %c0_289 = arith.constant 0 : index
    %c0_290 = arith.constant 0 : index
    %290 = vector.load %arg10[%c6_288, %c0_289, %c0_290] : memref<9x8x8xf32, #tpu.memory_space<vmem>>, vector<1x8x8xf32>
    %291 = vector.shape_cast %290 : vector<1x8x8xf32> to vector<8x8xf32>
    %cst_291 = arith.constant dense<0.000000e+00> : vector<8x288xf32>
    %292 = tpu.matmul %291, %289, %cst_291 {dimension_numbers = #tpu.dot_dimension_numbers<[1], [0], [0], [1], [0, 0, 1, 1], [], []>} : vector<8x8xf32>, vector<8x288xf32>, vector<8x288xf32> -> vector<8x288xf32>
    %293 = arith.addf %288, %292 : vector<8x288xf32>
    %c0_292 = arith.constant 0 : index
    %c37_293 = arith.constant 37 : index
    %294 = vector.load %arg16[%c0_292, %c37_293] : memref<8x326xf32, #tpu.memory_space<vmem>>, vector<8x288xf32>
    %c7_294 = arith.constant 7 : index
    %c0_295 = arith.constant 0 : index
    %c0_296 = arith.constant 0 : index
    %295 = vector.load %arg10[%c7_294, %c0_295, %c0_296] : memref<9x8x8xf32, #tpu.memory_space<vmem>>, vector<1x8x8xf32>
    %296 = vector.shape_cast %295 : vector<1x8x8xf32> to vector<8x8xf32>
    %cst_297 = arith.constant dense<0.000000e+00> : vector<8x288xf32>
    %297 = tpu.matmul %296, %294, %cst_297 {dimension_numbers = #tpu.dot_dimension_numbers<[1], [0], [0], [1], [0, 0, 1, 1], [], []>} : vector<8x8xf32>, vector<8x288xf32>, vector<8x288xf32> -> vector<8x288xf32>
    %298 = arith.addf %293, %297 : vector<8x288xf32>
    %c0_298 = arith.constant 0 : index
    %c38_299 = arith.constant 38 : index
    %299 = vector.load %arg16[%c0_298, %c38_299] : memref<8x326xf32, #tpu.memory_space<vmem>>, vector<8x288xf32>
    %c8_300 = arith.constant 8 : index
    %c0_301 = arith.constant 0 : index
    %c0_302 = arith.constant 0 : index
    %300 = vector.load %arg10[%c8_300, %c0_301, %c0_302] : memref<9x8x8xf32, #tpu.memory_space<vmem>>, vector<1x8x8xf32>
    %301 = vector.shape_cast %300 : vector<1x8x8xf32> to vector<8x8xf32>
    %cst_303 = arith.constant dense<0.000000e+00> : vector<8x288xf32>
    %302 = tpu.matmul %301, %299, %cst_303 {dimension_numbers = #tpu.dot_dimension_numbers<[1], [0], [0], [1], [0, 0, 1, 1], [], []>} : vector<8x8xf32>, vector<8x288xf32>, vector<8x288xf32> -> vector<8x288xf32>
    %303 = arith.addf %298, %302 : vector<8x288xf32>
    %c0_304 = arith.constant 0 : index
    %c0_305 = arith.constant 0 : index
    %304 = vector.load %arg11[%c0_304, %c0_305] : memref<8x1xf32, #tpu.memory_space<vmem>>, vector<8x1xf32>
    %305 = vector.broadcast %304 : vector<8x1xf32> to vector<8x288xf32>
    %306 = arith.addf %303, %305 : vector<8x288xf32>
    %cst_306 = arith.constant 0.000000e+00 : f32
    %307 = vector.broadcast %cst_306 : f32 to vector<8x288xf32>
    %308 = arith.maximumf %306, %307 : vector<8x288xf32>
    %cst_307 = arith.constant 0.000000e+00 : f32
    %309 = vector.shape_cast %24 : vector<1x288xi1> to vector<1x288xi1>
    %310 = vector.broadcast %309 : vector<1x288xi1> to vector<8x288xi1>
    %311 = vector.broadcast %cst_307 : f32 to vector<8x288xf32>
    %312 = arith.select %310, %308, %311 : vector<8x288xi1>, vector<8x288xf32>
    %c0_308 = arith.constant 0 : index
    %c19_309 = arith.constant 19 : index
    %313 = vector.load %arg15[%c0_308, %c19_309] : memref<8x326xf32, #tpu.memory_space<vmem>>, vector<8x288xf32>
    tpu.vector_store %arg15[%c0_308, %c19_309], %312 {strides = array<i32>} : memref<8x326xf32, #tpu.memory_space<vmem>>, vector<8x288xf32>,
    %cst_310 = arith.constant 0.000000e+00 : f32
    %314 = vector.broadcast %cst_310 : f32 to vector<8x288xf32>
    %c0_311 = arith.constant 0 : index
    %c0_312 = arith.constant 0 : index
    %315 = vector.load %arg15[%c0_311, %c0_312] : memref<8x326xf32, #tpu.memory_space<vmem>>, vector<8x288xf32>
    %c0_313 = arith.constant 0 : index
    %c0_314 = arith.constant 0 : index
    %c0_315 = arith.constant 0 : index
    %316 = vector.load %arg12[%c0_313, %c0_314, %c0_315] : memref<9x8x8xf32, #tpu.memory_space<vmem>>, vector<1x8x8xf32>
    %317 = vector.shape_cast %316 : vector<1x8x8xf32> to vector<8x8xf32>
    %cst_316 = arith.constant dense<0.000000e+00> : vector<8x288xf32>
    %318 = tpu.matmul %317, %315, %cst_316 {dimension_numbers = #tpu.dot_dimension_numbers<[1], [0], [0], [1], [0, 0, 1, 1], [], []>} : vector<8x8xf32>, vector<8x288xf32>, vector<8x288xf32> -> vector<8x288xf32>
    %319 = arith.addf %314, %318 : vector<8x288xf32>
    %c0_317 = arith.constant 0 : index
    %c1_318 = arith.constant 1 : index
    %320 = vector.load %arg15[%c0_317, %c1_318] : memref<8x326xf32, #tpu.memory_space<vmem>>, vector<8x288xf32>
    %c1_319 = arith.constant 1 : index
    %c0_320 = arith.constant 0 : index
    %c0_321 = arith.constant 0 : index
    %321 = vector.load %arg12[%c1_319, %c0_320, %c0_321] : memref<9x8x8xf32, #tpu.memory_space<vmem>>, vector<1x8x8xf32>
    %322 = vector.shape_cast %321 : vector<1x8x8xf32> to vector<8x8xf32>
    %cst_322 = arith.constant dense<0.000000e+00> : vector<8x288xf32>
    %323 = tpu.matmul %322, %320, %cst_322 {dimension_numbers = #tpu.dot_dimension_numbers<[1], [0], [0], [1], [0, 0, 1, 1], [], []>} : vector<8x8xf32>, vector<8x288xf32>, vector<8x288xf32> -> vector<8x288xf32>
    %324 = arith.addf %319, %323 : vector<8x288xf32>
    %c0_323 = arith.constant 0 : index
    %c2_324 = arith.constant 2 : index
    %325 = vector.load %arg15[%c0_323, %c2_324] : memref<8x326xf32, #tpu.memory_space<vmem>>, vector<8x288xf32>
    %c2_325 = arith.constant 2 : index
    %c0_326 = arith.constant 0 : index
    %c0_327 = arith.constant 0 : index
    %326 = vector.load %arg12[%c2_325, %c0_326, %c0_327] : memref<9x8x8xf32, #tpu.memory_space<vmem>>, vector<1x8x8xf32>
    %327 = vector.shape_cast %326 : vector<1x8x8xf32> to vector<8x8xf32>
    %cst_328 = arith.constant dense<0.000000e+00> : vector<8x288xf32>
    %328 = tpu.matmul %327, %325, %cst_328 {dimension_numbers = #tpu.dot_dimension_numbers<[1], [0], [0], [1], [0, 0, 1, 1], [], []>} : vector<8x8xf32>, vector<8x288xf32>, vector<8x288xf32> -> vector<8x288xf32>
    %329 = arith.addf %324, %328 : vector<8x288xf32>
    %c0_329 = arith.constant 0 : index
    %c18_330 = arith.constant 18 : index
    %330 = vector.load %arg15[%c0_329, %c18_330] : memref<8x326xf32, #tpu.memory_space<vmem>>, vector<8x288xf32>
    %c3_331 = arith.constant 3 : index
    %c0_332 = arith.constant 0 : index
    %c0_333 = arith.constant 0 : index
    %331 = vector.load %arg12[%c3_331, %c0_332, %c0_333] : memref<9x8x8xf32, #tpu.memory_space<vmem>>, vector<1x8x8xf32>
    %332 = vector.shape_cast %331 : vector<1x8x8xf32> to vector<8x8xf32>
    %cst_334 = arith.constant dense<0.000000e+00> : vector<8x288xf32>
    %333 = tpu.matmul %332, %330, %cst_334 {dimension_numbers = #tpu.dot_dimension_numbers<[1], [0], [0], [1], [0, 0, 1, 1], [], []>} : vector<8x8xf32>, vector<8x288xf32>, vector<8x288xf32> -> vector<8x288xf32>
    %334 = arith.addf %329, %333 : vector<8x288xf32>
    %c0_335 = arith.constant 0 : index
    %c19_336 = arith.constant 19 : index
    %335 = vector.load %arg15[%c0_335, %c19_336] : memref<8x326xf32, #tpu.memory_space<vmem>>, vector<8x288xf32>
    %c4_337 = arith.constant 4 : index
    %c0_338 = arith.constant 0 : index
    %c0_339 = arith.constant 0 : index
    %336 = vector.load %arg12[%c4_337, %c0_338, %c0_339] : memref<9x8x8xf32, #tpu.memory_space<vmem>>, vector<1x8x8xf32>
    %337 = vector.shape_cast %336 : vector<1x8x8xf32> to vector<8x8xf32>
    %cst_340 = arith.constant dense<0.000000e+00> : vector<8x288xf32>
    %338 = tpu.matmul %337, %335, %cst_340 {dimension_numbers = #tpu.dot_dimension_numbers<[1], [0], [0], [1], [0, 0, 1, 1], [], []>} : vector<8x8xf32>, vector<8x288xf32>, vector<8x288xf32> -> vector<8x288xf32>
    %339 = arith.addf %334, %338 : vector<8x288xf32>
    %c0_341 = arith.constant 0 : index
    %c20_342 = arith.constant 20 : index
    %340 = vector.load %arg15[%c0_341, %c20_342] : memref<8x326xf32, #tpu.memory_space<vmem>>, vector<8x288xf32>
    %c5_343 = arith.constant 5 : index
    %c0_344 = arith.constant 0 : index
    %c0_345 = arith.constant 0 : index
    %341 = vector.load %arg12[%c5_343, %c0_344, %c0_345] : memref<9x8x8xf32, #tpu.memory_space<vmem>>, vector<1x8x8xf32>
    %342 = vector.shape_cast %341 : vector<1x8x8xf32> to vector<8x8xf32>
    %cst_346 = arith.constant dense<0.000000e+00> : vector<8x288xf32>
    %343 = tpu.matmul %342, %340, %cst_346 {dimension_numbers = #tpu.dot_dimension_numbers<[1], [0], [0], [1], [0, 0, 1, 1], [], []>} : vector<8x8xf32>, vector<8x288xf32>, vector<8x288xf32> -> vector<8x288xf32>
    %344 = arith.addf %339, %343 : vector<8x288xf32>
    %c0_347 = arith.constant 0 : index
    %c36_348 = arith.constant 36 : index
    %345 = vector.load %arg15[%c0_347, %c36_348] : memref<8x326xf32, #tpu.memory_space<vmem>>, vector<8x288xf32>
    %c6_349 = arith.constant 6 : index
    %c0_350 = arith.constant 0 : index
    %c0_351 = arith.constant 0 : index
    %346 = vector.load %arg12[%c6_349, %c0_350, %c0_351] : memref<9x8x8xf32, #tpu.memory_space<vmem>>, vector<1x8x8xf32>
    %347 = vector.shape_cast %346 : vector<1x8x8xf32> to vector<8x8xf32>
    %cst_352 = arith.constant dense<0.000000e+00> : vector<8x288xf32>
    %348 = tpu.matmul %347, %345, %cst_352 {dimension_numbers = #tpu.dot_dimension_numbers<[1], [0], [0], [1], [0, 0, 1, 1], [], []>} : vector<8x8xf32>, vector<8x288xf32>, vector<8x288xf32> -> vector<8x288xf32>
    %349 = arith.addf %344, %348 : vector<8x288xf32>
    %c0_353 = arith.constant 0 : index
    %c37_354 = arith.constant 37 : index
    %350 = vector.load %arg15[%c0_353, %c37_354] : memref<8x326xf32, #tpu.memory_space<vmem>>, vector<8x288xf32>
    %c7_355 = arith.constant 7 : index
    %c0_356 = arith.constant 0 : index
    %c0_357 = arith.constant 0 : index
    %351 = vector.load %arg12[%c7_355, %c0_356, %c0_357] : memref<9x8x8xf32, #tpu.memory_space<vmem>>, vector<1x8x8xf32>
    %352 = vector.shape_cast %351 : vector<1x8x8xf32> to vector<8x8xf32>
    %cst_358 = arith.constant dense<0.000000e+00> : vector<8x288xf32>
    %353 = tpu.matmul %352, %350, %cst_358 {dimension_numbers = #tpu.dot_dimension_numbers<[1], [0], [0], [1], [0, 0, 1, 1], [], []>} : vector<8x8xf32>, vector<8x288xf32>, vector<8x288xf32> -> vector<8x288xf32>
    %354 = arith.addf %349, %353 : vector<8x288xf32>
    %c0_359 = arith.constant 0 : index
    %c38_360 = arith.constant 38 : index
    %355 = vector.load %arg15[%c0_359, %c38_360] : memref<8x326xf32, #tpu.memory_space<vmem>>, vector<8x288xf32>
    %c8_361 = arith.constant 8 : index
    %c0_362 = arith.constant 0 : index
    %c0_363 = arith.constant 0 : index
    %356 = vector.load %arg12[%c8_361, %c0_362, %c0_363] : memref<9x8x8xf32, #tpu.memory_space<vmem>>, vector<1x8x8xf32>
    %357 = vector.shape_cast %356 : vector<1x8x8xf32> to vector<8x8xf32>
    %cst_364 = arith.constant dense<0.000000e+00> : vector<8x288xf32>
    %358 = tpu.matmul %357, %355, %cst_364 {dimension_numbers = #tpu.dot_dimension_numbers<[1], [0], [0], [1], [0, 0, 1, 1], [], []>} : vector<8x8xf32>, vector<8x288xf32>, vector<8x288xf32> -> vector<8x288xf32>
    %359 = arith.addf %354, %358 : vector<8x288xf32>
    %c0_365 = arith.constant 0 : index
    %c0_366 = arith.constant 0 : index
    %360 = vector.load %arg13[%c0_365, %c0_366] : memref<8x1xf32, #tpu.memory_space<vmem>>, vector<8x1xf32>
    %361 = vector.broadcast %360 : vector<8x1xf32> to vector<8x288xf32>
    %362 = arith.addf %359, %361 : vector<8x288xf32>
    %cst_367 = arith.constant 0.000000e+00 : f32
    %363 = vector.shape_cast %24 : vector<1x288xi1> to vector<1x288xi1>
    %364 = vector.broadcast %363 : vector<1x288xi1> to vector<8x288xi1>
    %365 = vector.broadcast %cst_367 : f32 to vector<8x288xf32>
    %366 = arith.select %364, %362, %365 : vector<8x288xi1>, vector<8x288xf32>
    %c0_368 = arith.constant 0 : index
    %c0_369 = arith.constant 0 : index
    %c0_370 = arith.constant 0 : index
    %367 = vector.load %arg14[%c0_368, %c0_369, %c0_370] : memref<1x8x288xf32, #tpu.memory_space<vmem>>, vector<1x8x288xf32>
    %368 = vector.shape_cast %367 : vector<1x8x288xf32> to vector<8x288xf32>
    %369 = vector.shape_cast %366 : vector<8x288xf32> to vector<1x8x288xf32>
    tpu.vector_store %arg14[%c0_368, %c0_369, %c0_370], %369 {strides = array<i32>} : memref<1x8x288xf32, #tpu.memory_space<vmem>>, vector<1x8x288xf32>,
    return
  }
  func.func @transform_0(%arg0: i32) -> (i32, i32, i32) {
    %c0_i32 = arith.constant 0 : i32
    %c0_i32_0 = arith.constant 0 : i32
    %c0_i32_1 = arith.constant 0 : i32
    return %arg0, %c0_i32, %c0_i32_0 : i32, i32, i32
  }
  func.func @transform_1(%arg0: i32) -> (i32, i32, i32) {
    %c0_i32 = arith.constant 0 : i32
    %c0_i32_0 = arith.constant 0 : i32
    %c0_i32_1 = arith.constant 0 : i32
    %c0_i32_2 = arith.constant 0 : i32
    return %c0_i32, %c0_i32_0, %c0_i32_1 : i32, i32, i32
  }
  func.func @transform_2(%arg0: i32) -> (i32, i32) {
    %c0_i32 = arith.constant 0 : i32
    %c0_i32_0 = arith.constant 0 : i32
    %c0_i32_1 = arith.constant 0 : i32
    return %c0_i32, %c0_i32_0 : i32, i32
  }
  func.func @transform_3(%arg0: i32) -> (i32, i32, i32) {
    %c0_i32 = arith.constant 0 : i32
    %c0_i32_0 = arith.constant 0 : i32
    %c0_i32_1 = arith.constant 0 : i32
    %c0_i32_2 = arith.constant 0 : i32
    return %c0_i32, %c0_i32_0, %c0_i32_1 : i32, i32, i32
  }
  func.func @transform_4(%arg0: i32) -> (i32, i32) {
    %c0_i32 = arith.constant 0 : i32
    %c0_i32_0 = arith.constant 0 : i32
    %c0_i32_1 = arith.constant 0 : i32
    return %c0_i32, %c0_i32_0 : i32, i32
  }
  func.func @transform_5(%arg0: i32) -> (i32, i32, i32) {
    %c0_i32 = arith.constant 0 : i32
    %c0_i32_0 = arith.constant 0 : i32
    %c0_i32_1 = arith.constant 0 : i32
    %c0_i32_2 = arith.constant 0 : i32
    return %c0_i32, %c0_i32_0, %c0_i32_1 : i32, i32, i32
  }
  func.func @transform_6(%arg0: i32) -> (i32, i32) {
    %c0_i32 = arith.constant 0 : i32
    %c0_i32_0 = arith.constant 0 : i32
    %c0_i32_1 = arith.constant 0 : i32
    return %c0_i32, %c0_i32_0 : i32, i32
  }
  func.func @transform_7(%arg0: i32) -> (i32, i32, i32) {
    %c0_i32 = arith.constant 0 : i32
    %c0_i32_0 = arith.constant 0 : i32
    %c0_i32_1 = arith.constant 0 : i32
    %c0_i32_2 = arith.constant 0 : i32
    return %c0_i32, %c0_i32_0, %c0_i32_1 : i32, i32, i32
  }
  func.func @transform_8(%arg0: i32) -> (i32, i32) {
    %c0_i32 = arith.constant 0 : i32
    %c0_i32_0 = arith.constant 0 : i32
    %c0_i32_1 = arith.constant 0 : i32
    return %c0_i32, %c0_i32_0 : i32, i32
  }
  func.func @transform_9(%arg0: i32) -> (i32, i32, i32) {
    %c0_i32 = arith.constant 0 : i32
    %c0_i32_0 = arith.constant 0 : i32
    %c0_i32_1 = arith.constant 0 : i32
    %c0_i32_2 = arith.constant 0 : i32
    return %c0_i32, %c0_i32_0, %c0_i32_1 : i32, i32, i32
  }
  func.func @transform_10(%arg0: i32) -> (i32, i32) {
    %c0_i32 = arith.constant 0 : i32
    %c0_i32_0 = arith.constant 0 : i32
    %c0_i32_1 = arith.constant 0 : i32
    return %c0_i32, %c0_i32_0 : i32, i32
  }
  func.func @transform_11(%arg0: i32) -> (i32, i32, i32) {
    %c0_i32 = arith.constant 0 : i32
    %c0_i32_0 = arith.constant 0 : i32
    %c0_i32_1 = arith.constant 0 : i32
    %c0_i32_2 = arith.constant 0 : i32
    return %c0_i32, %c0_i32_0, %c0_i32_1 : i32, i32, i32
  }
  func.func @transform_12(%arg0: i32) -> (i32, i32) {
    %c0_i32 = arith.constant 0 : i32
    %c0_i32_0 = arith.constant 0 : i32
    %c0_i32_1 = arith.constant 0 : i32
    return %c0_i32, %c0_i32_0 : i32, i32
  }
  func.func @transform_13(%arg0: i32) -> (i32, i32, i32) {
    %c0_i32 = arith.constant 0 : i32
    %c0_i32_0 = arith.constant 0 : i32
    %c0_i32_1 = arith.constant 0 : i32
    return %arg0, %c0_i32, %c0_i32_0 : i32, i32, i32
  }
}

</mosaic_0001>

<bundles_post_ra>
// kernel: _block_forward_impl.1
= control target key start
LH: loop header
LB: loop body
LE: loop exit
PB: predicated region body
PF: predicated region fallthrough
CT: control target
= control target key end

     0   :  { %s10171_s25 = smov 0   ;;  %s11092_s0 = inlined_call_operand.vmem [shape: f32[2,4,326], index: 0, kind: input, shape index: {}]   ;;  %s11093_s1 = inlined_call_operand.vmem [shape: f32[9,8,4], index: 1, kind: input, shape index: {}]   ;;  %s11094_s2 = inlined_call_operand.vmem [shape: f32[8,1], index: 2, kind: input, shape index: {}]   ;;  %s11095_s3 = inlined_call_operand.vmem [shape: f32[9,8,8], index: 3, kind: input, shape index: {}]   ;;  %s11096_s4 = inlined_call_operand.vmem [shape: f32[8,1], index: 4, kind: input, shape index: {}]   ;;  %s11097_s5 = inlined_call_operand.vmem [shape: f32[9,8,8], index: 5, kind: input, shape index: {}]   ;;  %s11098_s6 = inlined_call_operand.vmem [shape: f32[8,1], index: 6, kind: input, shape index: {}]   ;;  %s11099_s7 = inlined_call_operand.vmem [shape: f32[9,8,8], index: 7, kind: input, shape index: {}]   ;;  %s11100_s8 = inlined_call_operand.vmem [shape: f32[8,1], index: 8, kind: input, shape index: {}]   ;;  %s11101_s9 = inlined_call_operand.vmem [shape: f32[9,8,8], index: 9, kind: input, shape index: {}]   ;;  %s11102_s10 = inlined_call_operand.vmem [shape: f32[8,1], index: 10, kind: input, shape index: {}]   ;;  %s11103_s11 = inlined_call_operand.vmem [shape: f32[9,8,8], index: 11, kind: input, shape index: {}]   ;;  %s11104_s12 = inlined_call_operand.vmem [shape: f32[8,1], index: 12, kind: input, shape index: {}]   ;;  %s11105_s13 = inlined_call_operand.vmem [shape: f32[2,8,288], index: 13, kind: output, shape index: {}]  }
   0x1 LB: > { %s9384_s26 = sadd.s32 4294967295, %s10087_s25   ;;  %p9388_p0 = scmp.ge.s32.totalorder %s10087_s25, 1  ;;  %s10087_s25 = sphi %s10171_s25, %s23_s25  }
   0x2   : > { %p387_p1 = scmp.lt.s32.totalorder %s10087_s25, 3 }
   0x4   : > { %p388_p2 = pnand %p9388_p0, %p387_p1 }
   0x5   : > { %p431_p3 = scmp.lt.s32.totalorder (!%p388_p2), %s9384_s26, 1  ;;  %v10089_v0 = vmov (!%p388_p2), 0.0   ;;  %vm10090_vm0 = vmmov (!%p388_p2), 0   ;;  %s10091_s14 = smov (!%p388_p2), 127   ;;  %v2004_v11 = vld [vmem:[%s11094_s2] sm:$0xff] (!%p388_p2)  ;;  %v10099_v12 = vmov (!%p388_p2), 0  }
   0x6   : > { %391 = sbr.rel (%p388_p2) target bundleno = 3058 (0xbf2), region = 72  ;;  %9684 = vmatprep.subr.mxu1 (!%p388_p2), %v10089_v0  ;;  %594 = vmatprep.mubr.f32.mxu0 (!%p388_p2), %v10089_v0  ;;  %s10092_s15 = smov (!%p388_p2), 126   ;;  %vm523_vm1 = vcmask (!%p388_p2), 1043456   ;;  %vm516_vm2 = vcmask (!%p388_p2), 1039360   ;;  %v9391_v18 = vld [vmem:[%s11093_s1 + $0x8] sm:$0xff] (!%p388_p2)  ;;  %vm519_vm3 = vcmask (!%p388_p2), 31744  }
   0x7   : > { %9686 = vmatprep.mubr.msk.f32.mxu1 (!%p388_p2), %vm10090_vm0, %v10089_v0  ;;  %s10093_s16 = smov (!%p388_p2), 110   ;;  %s10094_s17 = smov (!%p388_p2), 109   ;;  %10078 = vset.pattern.permute.xlu0 (!%p388_p2), %v10099_v12  ;;  %vm834_vm4 = vcmask (!%p388_p2), 1031168   ;;  %v504_v24 = vld [vmem:[%s11093_s1] sm:$0xff] (!%p388_p2)  ;;  %vm1003_vm5 = vcmask (!%p388_p2), 900096   ;;  %v9402_v29 = vld [vmem:[%s11093_s1 + $0x10] sm:$0xff] (!%p388_p2) }
   0x8   : > { %s10095_s18 = smov (!%p388_p2), 108   ;;  %s10096_s19 = smov (!%p388_p2), 92   ;;  %10079 = vset.pattern.permute.xlu1 (!%p388_p2), %v10099_v12  ;;  %v9408_v32 = vld [vmem:[%s11093_s1 + $0x18] sm:$0xff] (!%p388_p2)  ;;  %vm1172_vm6 = vcmask (!%p388_p2), 891904   ;;  %v9414_v34 = vld [vmem:[%s11093_s1 + $0x20] sm:$0xff] (!%p388_p2)  ;;  %v9420_v39 = vld [vmem:[%s11093_s1 + $0x28] sm:$0xff] (!%p388_p2) }
   0x9   : > { %s10097_s20 = smov (!%p388_p2), 91   ;;  %s10098_s21 = smov (!%p388_p2), 90   ;;  %vm11109_vm7 = vcmask (!%p388_p2), 883712   ;;  %v9426_v46 = vld [vmem:[%s11093_s1 + $0x30] sm:$0xff] (!%p388_p2)  ;;  %vm11108_vm8 = vcmask (!%p388_p2), 752640   ;;  %v9432_v49 = vld [vmem:[%s11093_s1 + $0x38] sm:$0xff] (!%p388_p2) }
   0xa   : > { %v9438_v53 = vld [vmem:[%s11093_s1 + $0x40] sm:$0xff] (!%p388_p2)  ;;  %vm11107_vm9 = vcmask (!%p388_p2), 744448   ;;  %vm11106_vm10 = vcmask (!%p388_p2), 736256   ;;  %vm441_vm11 = vcmask (!%p388_p2), 154624  }
   0xb   : > { %442 = vst.msk [vmem:[#allocation2] sm:$0xff] (!%p388_p2), %vm441_vm11, %v10089_v0  ;;  %445 = vst.msk [vmem:[#allocation3] sm:$0xff] (!%p388_p2), %vm441_vm11, %v10089_v0 }
   0xd   : > { %s11155_s26 = smov (!%p431_p3, %s9384_s26), 1 }
   0xe   : > { %s10050_s27 = smul.u32 12, %s11155_s26 }
  0x10   : > { %s10187_s30 = scalar_lea.vmem %s11092_s0, %s10050_s27 }
  0x11   : > { %v10192_v1 = vld [vmem:[%s10187_s30] sm:$0xff]  ;;  %v10200_v3 = vld [vmem:[%s10187_s30 + $0x8] sm:$0xf] }
  0x12   : > { %510 = vrot.lane.b32.xlu1 %v10192_v1, %s10091_s14  ;;  %v509_v2 = vcombine.high %v10192_v1, %v10192_v1  ;;  %v822_v4 = vld [vmem:[%s10187_s30 + $0x8] sm:$0xf] }
  0x13   : > { %v991_v5 = vld [vmem:[%s10187_s30 + $0x8] sm:$0xf] }
  0x14   : > { %512 = vrot.lane.b32.xlu0 %v509_v2, %s10091_s14  ;;  %v1160_v6 = vld [vmem:[%s10187_s30 + $0x8] sm:$0xf] }
  0x15   : > { %v1329_v7 = vld [vmem:[%s10187_s30 + $0x8] sm:$0xf] }
  0x16   : > { %830 = vrot.lane.b32.xlu1 %v509_v2, %s10092_s15  ;;  %v1498_v8 = vld [vmem:[%s10187_s30 + $0x8] sm:$0xf] }
  0x17   : > { %v1667_v9 = vld [vmem:[%s10187_s30 + $0x8] sm:$0xf] }
  0x18   : > { %514 = vrot.lane.b32.xlu0 %v10200_v3, %s10091_s14  ;;  %v1836_v10 = vld [vmem:[%s10187_s30 + $0x8] sm:$0xf]  ;;  %s10100_s30 = smov 19  }
  0x1a   : > { %828 = vrot.lane.b32.xlu1 %v10192_v1, %s10092_s15 }
  0x1c   : > { %832 = vrot.lane.b32.xlu0 %v822_v4, %s10092_s15 }
  0x1e   : > { %1001 = vrot.lane.b32.xlu1 %v991_v5, %s10093_s16 }
  0x20   : > { %999 = vrot.lane.b32.xlu0 %v509_v2, %s10093_s16 }
  0x22   : > { %1168 = vrot.lane.b32.xlu1 %v509_v2, %s10094_s17 }
  0x24   : > { %997 = vrot.lane.b32.xlu0 %v10192_v1, %s10093_s16 }
  0x26   : > { %1166 = vrot.lane.b32.xlu1 %v10192_v1, %s10094_s17 }
  0x28   : > { %1170 = vrot.lane.b32.xlu0 %v1160_v6, %s10094_s17 }
  0x2a   : > { %1339 = vrot.lane.b32.xlu1 %v1329_v7, %s10095_s18 }
  0x2c   : > { %1337 = vrot.lane.b32.xlu0 %v509_v2, %s10095_s18 }
  0x2e   : > { %1506 = vrot.lane.b32.xlu1 %v509_v2, %s10096_s19 }
  0x30   : > { %1335 = vrot.lane.b32.xlu0 %v10192_v1, %s10095_s18 }
  0x32   : > { %1504 = vrot.lane.b32.xlu1 %v10192_v1, %s10096_s19 }
  0x34   : > { %1508 = vrot.lane.b32.xlu0 %v1498_v8, %s10096_s19 }
  0x36   : > { %1677 = vrot.lane.b32.xlu1 %v1667_v9, %s10097_s20 }
  0x38   : > { %1675 = vrot.lane.b32.xlu0 %v509_v2, %s10097_s20 }
  0x3a   : > { %1844 = vrot.lane.b32.xlu1 %v509_v2, %s10098_s21 }
  0x3c   : > { %1673 = vrot.lane.b32.xlu0 %v10192_v1, %s10097_s20 }
  0x3e   : > { %1842 = vrot.lane.b32.xlu1 %v10192_v1, %s10098_s21 }
  0x40   : > { %1846 = vrot.lane.b32.xlu0 %v1836_v10, %s10098_s21 }
  0x44   : > { %2007 = vperm.xlu0 %10078, %v2004_v11  }
  0x84   : > { %v511_v13 = vpop.permute.xlu1 %510 }
  0x86   : > { %v513_v14 = vpop.permute.xlu0 %512 }
  0x87   : > { %v517_v19 = vsel %vm516_vm2, %v511_v13, %v513_v14 }
  0x88   : > { %v831_v15 = vpop.permute.xlu1 %830 }
  0x8a   : > { %v515_v16 = vpop.permute.xlu0 %514 }
  0x8b   : > { %9685 = vmatpush3.msk.msra.mxu1 %vm523_vm1, %v515_v16  ;;  %v518_v17 = vsel %vm516_vm2, %v513_v14, %v515_v16 }
  0x8c   : > { %9392 = vmatprep.subr.msk.mxu0 %vm523_vm1, %v518_v17  ;;  %v829_v20 = vpop.permute.xlu1 %828  ;;  %9687 = vmatmul.mubr.msk.f32.vlgmr.msra.gmra.mrb[0].mxu1 %vm519_vm3, %v9391_v18 }
  0x8d   : > { %9393 = vmatpush1.msk.msra.mxu0 %vm523_vm1, %v517_v19  ;;  %9689 = vmatprep.subr.mxu1 %v10089_v0  ;;  %v835_v26 = vsel %vm834_vm4, %v829_v20, %v831_v15 }
  0x8e   : > { %9394 = vmatmul.mubr.msk.f32.vlgmr.msra.gmra.mrb[0].mxu0 %vm519_vm3, %v9391_v18  ;;  %9397 = vmatprep.subr.msk.mxu0 %vm523_vm1, %v509_v2  ;;  %v833_v21 = vpop.permute.xlu0 %832 }
  0x8f   : > { %9398 = vmatpush1.msk.msra.mxu0 %vm523_vm1, %v10192_v1  ;;  %744 = vmatprep.mubr.f32.mxu0 %v10089_v0  ;;  %v836_v22 = vsel %vm834_vm4, %v831_v15, %v833_v21  ;;  %v447_v1 = vlaneseq }
  0x90   : > { %9690 = vmatpush3.msk.msra.mxu1 %vm523_vm1, %v10200_v3  ;;  %9403 = vmatprep.subr.msk.mxu0 %vm523_vm1, %v836_v22  ;;  %v1002_v23 = vpop.permute.xlu1 %1001 }
  0x91   : > { %9691 = vmatprep.mubr.msk.f32.mxu1 %vm10090_vm0, %v10089_v0  ;;  %9694 = vmatprep.subr.mxu1 %v10089_v0  ;;  %v448_v5 = vand.u32 127, %v447_v1 }
  0x92   : > { %9692 = vmatmul.mubr.msk.f32.vlgmr.msra.gmra.mrb[2].mxu1 %vm519_vm3, %v504_v24  ;;  %v1000_v25 = vpop.permute.xlu0 %999 }
  0x93   : > { %9695 = vmatpush3.msk.msra.mxu1 %vm523_vm1, %v833_v21  ;;  %9696 = vmatprep.mubr.msk.f32.mxu1 %vm10090_vm0, %v10089_v0  ;;  %v1005_v28 = vsel %vm1003_vm5, %v1000_v25, %v1002_v23  ;;  %v450_v9 = vadd.s32 256, %v448_v5 }
  0x94   : > { %9699 = vmatprep.subr.mxu1 %v10089_v0  ;;  %v1169_v27 = vpop.permute.xlu1 %1168 }
  0x95   : > { %v10368_v13 = vmul.u32.u64.low 3817748708, %v450_v9  ;;  %v10369_v14 = vmul.u32.u64.high 3817748708, %v450_v9, %v10368_v13 }
  0x96   : > { %9399 = vmatmul.mubr.msk.f32.vlgmr.msra.gmra.mrb[0].mxu0 %vm519_vm3, %v504_v24  ;;  %v998_v30 = vpop.permute.xlu0 %997  ;;  %9697 = vmatmul.mubr.msk.f32.vlgmr.msra.gmra.mrb[4].mxu1 %vm519_vm3, %v9402_v29  ;;  %v9444_v13 = vld [vmem:[%s11095_s3 + $0x8] sm:$0xff] }
  0x97   : > { %9404 = vmatpush1.msk.msra.mxu0 %vm523_vm1, %v835_v26  ;;  %910 = vmatprep.mubr.f32.mxu0 %v10089_v0  ;;  %v1004_v35 = vsel %vm1003_vm5, %v998_v30, %v1000_v25  ;;  %v479_v21 = vshrl.u32 %v10369_v14, 4 }
  0x98   : > { %9409 = vmatprep.subr.msk.mxu0 %vm523_vm1, %v1005_v28  ;;  %9700 = vmatpush3.msk.msra.mxu1 %vm523_vm1, %v1002_v23  ;;  %v1167_v31 = vpop.permute.xlu1 %1166 }
  0x99   : > { %9701 = vmatprep.mubr.msk.f32.mxu1 %vm10090_vm0, %v10089_v0  ;;  %9704 = vmatprep.subr.mxu1 %v10089_v0  ;;  %v1173_v42 = vsel %vm1172_vm6, %v1167_v31, %v1169_v27  ;;  %v480_v22 = vmul.u32 18, %v479_v21 }
  0x9a   : > { %v1171_v33 = vpop.permute.xlu0 %1170  ;;  %9702 = vmatmul.mubr.msk.f32.vlgmr.msra.gmra.mrb[6].mxu1 %vm519_vm3, %v9408_v32 }
  0x9b   : > { %9705 = vmatpush3.msk.msra.mxu1 %vm523_vm1, %v1171_v33  ;;  %9706 = vmatprep.mubr.msk.f32.mxu1 %vm10090_vm0, %v10089_v0  ;;  %v1174_v37 = vsel %vm1172_vm6, %v1169_v27, %v1171_v33  ;;  %v481_v26 = vsub.s32 %v450_v9, %v480_v22  ;;  %v449_v33 = vadd.s32 128, %v448_v5  ;;  %v3473_v9 = vld [vmem:[%s11096_s4] sm:$0xff]  ;;  %v9449_v22 = vld [vmem:[%s11095_s3 + $0x10] sm:$0xff] }
  0x9c   : > { %v1340_v36 = vpop.permute.xlu1 %1339  ;;  %9709 = vmatprep.subr.mxu1 %v10089_v0 }
  0x9d   : > { %vm486_vm12 = vcmp.ne.s32.totalorder %v481_v26, 0  ;;  %vm489_vm13 = vcmp.lt.s32.totalorder %v481_v26, 0  ;;  %v495_v30 = vadd.s32 18, %v481_v26 }
  0x9e   : > { %9405 = vmatmul.mubr.msk.f32.vlgmr.msra.gmra.mrb[0].mxu0 %vm519_vm3, %v9402_v29  ;;  %v1338_v38 = vpop.permute.xlu0 %1337  ;;  %9707 = vmatmul.mubr.msk.f32.vlgmr.msra.gmra.mrb[8].mxu1 %vm519_vm3, %v9414_v34  ;;  %vm492_vm14 = vmand %vm489_vm13, %vm486_vm12  ;;  %vm443_vm12 = vcmask 572824  }
  0x9f   : > { %9410 = vmatpush1.msk.msra.mxu0 %vm523_vm1, %v1004_v35  ;;  %1079 = vmatprep.mubr.f32.mxu0 %v10089_v0  ;;  %v1343_v44 = vsel %vm11109_vm7, %v1338_v38, %v1340_v36  ;;  %444 = vst.msk [vmem:[#allocation2 + $0x10] sm:$0xff] %vm443_vm12, %v10089_v0  ;;  %446 = vst.msk [vmem:[#allocation3 + $0x10] sm:$0xff] %vm443_vm12, %v10089_v0  ;;  %vm11116_vm12 = vcmask 752640  }
  0xa0   : > { %9415 = vmatprep.subr.msk.mxu0 %vm523_vm1, %v1174_v37  ;;  %v1507_v40 = vpop.permute.xlu1 %1506  ;;  %9710 = vmatpush3.msk.msra.mxu1 %vm523_vm1, %v1340_v36  ;;  %v498_v37 = vsel %vm492_vm14, %v495_v30, %v481_v26 }
  0xa1   : > { %9711 = vmatprep.mubr.msk.f32.mxu1 %vm10090_vm0, %v10089_v0  ;;  %9714 = vmatprep.subr.mxu1 %v10089_v0  ;;  %vm10382_vm15 = vcmp.lt.s32.totalorder %v498_v37, 16 }
  0xa2   : > { %v1336_v41 = vpop.permute.xlu0 %1335  ;;  %9712 = vmatmul.mubr.msk.f32.vlgmr.msra.gmra.mrb[10].mxu1 %vm519_vm3, %v9420_v39 }
  0xa3   : > { %9716 = vmatprep.mubr.msk.f32.mxu1 %vm10090_vm0, %v10089_v0  ;;  %v1342_v50 = vsel %vm11109_vm7, %v1336_v41, %v1338_v38 }
  0xa4   : > { %v1505_v43 = vpop.permute.xlu1 %1504 }
  0xa5   : > { %v1511_v55 = vsel %vm11108_vm8, %v1505_v43, %v1507_v40 }
  0xa6   : > { %9411 = vmatmul.mubr.msk.f32.vlgmr.msra.gmra.mrb[0].mxu0 %vm519_vm3, %v9408_v32  ;;  %v1509_v45 = vpop.permute.xlu0 %1508  ;;  %v10376_v31 = vmul.u32.u64.low 3817748708, %v448_v5  ;;  %v10377_v32 = vmul.u32.u64.high 3817748708, %v448_v5, %v10376_v31 }
  0xa7   : > { %9416 = vmatpush1.msk.msra.mxu0 %vm523_vm1, %v1173_v42  ;;  %1248 = vmatprep.mubr.f32.mxu0 %v10089_v0  ;;  %v1512_v51 = vsel %vm11108_vm8, %v1507_v40, %v1509_v45  ;;  %v10379_v40 = vmul.u32.u64.low 3817748708, %v449_v33  ;;  %v10380_v41 = vmul.u32.u64.high 3817748708, %v449_v33, %v10379_v40  ;;  %v9455_v31 = vld [vmem:[%s11095_s3 + $0x20] sm:$0xff] }
  0xa8   : > { %9421 = vmatprep.subr.msk.mxu0 %vm523_vm1, %v1343_v44  ;;  %9715 = vmatpush3.msk.msra.mxu1 %vm523_vm1, %v1509_v45  ;;  %v1678_v47 = vpop.permute.xlu1 %1677  ;;  %v457_v45 = vshrl.u32 %v10377_v32, 4 }
  0xa9   : > { %9717 = vmatmul.mubr.msk.f32.vlgmr.msra.gmra.mrb[12].mxu1 %vm519_vm3, %v9426_v46  ;;  %9719 = vmatprep.subr.mxu1 %v10089_v0 }
  0xaa   : > { %v1676_v48 = vpop.permute.xlu0 %1675  ;;  %9720 = vmatpush3.msk.msra.mxu1 %vm523_vm1, %v1678_v47  ;;  %9721 = vmatprep.mubr.msk.f32.mxu1 %vm10090_vm0, %v10089_v0 }
  0xab   : > { %9724 = vmatprep.subr.mxu1 %v10089_v0  ;;  %v1681_v56 = vsel %vm11107_vm9, %v1676_v48, %v1678_v47  ;;  %v468_v47 = vshrl.u32 %v10380_v41, 4 }
  0xac   : > { %v1845_v57 = vpop.permute.xlu1 %1844 }
  0xad   : > { %9722 = vmatmul.mubr.msk.f32.vlgmr.msra.gmra.mrb[14].mxu1 %vm519_vm3, %v9432_v49 }
  0xae   : > { %9417 = vmatmul.mubr.msk.f32.vlgmr.msra.gmra.mrb[0].mxu0 %vm519_vm3, %v9414_v34  ;;  %v1674_v52 = vpop.permute.xlu0 %1673  ;;  %9726 = vmatprep.mubr.msk.f32.mxu1 %vm10090_vm0, %v10089_v0 }
  0xaf   : > { %9422 = vmatpush1.msk.msra.mxu0 %vm523_vm1, %v1342_v50  ;;  %1417 = vmatprep.mubr.f32.mxu0 %v10089_v0  ;;  %v1680_v58 = vsel %vm11107_vm9, %v1674_v52, %v1676_v48 }
  0xb0   : > { %9427 = vmatprep.subr.msk.mxu0 %vm523_vm1, %v1512_v51  ;;  %v1843_v60 = vpop.permute.xlu1 %1842 }
  0xb1   : > { %v1849_v61 = vsel %vm11106_vm10, %v1843_v60, %v1845_v57 }
  0xb2   : > { %v1847_v54 = vpop.permute.xlu0 %1846 }
  0xb3   : > { %9725 = vmatpush3.msk.msra.mxu1 %vm523_vm1, %v1847_v54  ;;  %v1850_v59 = vsel %vm11106_vm10, %v1845_v57, %v1847_v54 }
  0xb4   : > { %9727 = vmatmul.mubr.msk.f32.vlgmr.msra.gmra.mrb[16].mxu1 %vm519_vm3, %v9438_v53  ;;  %9729 = vmatprep.subr.mxu1 %v10089_v0 }
  0xb5   : > { %9731 = vmatprep.mubr.msk.f32.mxu1 %vm10090_vm0, %v10089_v0 }
  0xb6   : > { %9423 = vmatmul.mubr.msk.f32.vlgmr.msra.gmra.mrb[0].mxu0 %vm519_vm3, %v9420_v39 }
  0xb7   : > { %9428 = vmatpush1.msk.msra.mxu0 %vm523_vm1, %v1511_v55  ;;  %1586 = vmatprep.mubr.f32.mxu0 %v10089_v0 }
  0xb8   : > { %9433 = vmatprep.subr.msk.mxu0 %vm523_vm1, %v1681_v56 }
  0xbe   : > { %9429 = vmatmul.mubr.msk.f32.vlgmr.msra.gmra.mrb[0].mxu0 %vm519_vm3, %v9426_v46  ;;  %v458_v46 = vmul.u32 18, %v457_v45 }
  0xbf   : > { %9434 = vmatpush1.msk.msra.mxu0 %vm523_vm1, %v1680_v58  ;;  %1755 = vmatprep.mubr.f32.mxu0 %v10089_v0 }
  0xc0   : > { %9439 = vmatprep.subr.msk.mxu0 %vm523_vm1, %v1850_v59  ;;  %v459_v48 = vsub.s32 %v448_v5, %v458_v46 }
  0xc2   : > { %v493_v51 = vadd.s32 18, %v459_v48 }
  0xc3   : > { %v2008_v35 = vpop.permute.xlu0 %2007 }
  0xc6   : > { %9435 = vmatmul.mubr.msk.f32.vlgmr.msra.gmra.mrb[0].mxu0 %vm519_vm3, %v9432_v49  ;;  %v469_v49 = vmul.u32 18, %v468_v47 }
  0xc7   : > { %9440 = vmatpush1.msk.msra.mxu0 %vm523_vm1, %v1849_v61  ;;  %1924 = vmatprep.mubr.f32.mxu0 %v10089_v0  ;;  %vm484_vm1 = vcmp.ne.s32.totalorder %v459_v48, 0 }
  0xc8   : > { %v470_v50 = vsub.s32 %v449_v33, %v469_v49  ;;  %v9464_v49 = vld [vmem:[%s11095_s3 + $0x38] sm:$0xff] }
  0xca   : > { %vm485_vm14 = vcmp.ne.s32.totalorder %v470_v50, 0  ;;  %vm488_vm10 = vcmp.lt.s32.totalorder %v470_v50, 0 }
  0xcb   : > { %vm491_vm9 = vmand %vm488_vm10, %vm485_vm14  ;;  %vm2039_vm10 = vcmask 1047704   ;;  %vm11118_vm14 = vcmask 744448  }
  0xce   : > { %9441 = vmatmul.mubr.msk.f32.vlgmr.msra.gmra.mrb[0].mxu0 %vm519_vm3, %v9438_v53  ;;  %vm487_vm3 = vcmp.lt.s32.totalorder %v459_v48, 0  ;;  %v494_v53 = vadd.s32 18, %v470_v50 }
  0xcf   : > { %2132 = vmatprep.mubr.f32.mxu0 %v10089_v0  ;;  %vm490_vm13 = vmand %vm487_vm3, %vm484_vm1  ;;  %vm2064_vm3 = vcmask 64512  }
  0xd0   : > { %v496_v52 = vsel %vm490_vm13, %v493_v51, %v459_v48  ;;  %v497_v60 = vsel %vm491_vm9, %v494_v53, %v470_v50  ;;  %vm2042_vm9 = vcmask 416768   ;;  %vm11117_vm13 = vmmov %vm11116_vm12 }
  0xd1   : > { %vm10393_vm8 = vcmp.lt.s32.totalorder %v496_v52, 16  ;;  %vm10400_vm1 = vcmp.lt.s32.totalorder %v497_v60, 16  ;;  %v9467_v52 = vld [vmem:[%s11095_s3 + $0x40] sm:$0xff] }
 0x15f   : > { %v667_v62 = vpop.f32.mrb[0].mxu1 }
 0x160   : > { %v9688_v63 = vpop.f32.mrb[1].mxu1 }
 0x165   : > { %v817_v2 = vpop.f32.mrb[2].mxu1 }
 0x166   : > { %v818_v3 = vadd.f32 %v817_v2, %v667_v62  ;;  %v9693_v4 = vpop.f32.mrb[3].mxu1 }
 0x169   : > { %v983_v6 = vpop.f32.mrb[4].mxu1 }
 0x16a   : > { %v989_v7 = vadd.f32 %v983_v6, %v818_v3  ;;  %v9698_v8 = vpop.f32.mrb[5].mxu1 }
 0x16d   : > { %v1152_v10 = vpop.f32.mrb[6].mxu1 }
 0x16e   : > { %v1158_v11 = vadd.f32 %v1152_v10, %v989_v7  ;;  %v9703_v12 = vpop.f32.mrb[7].mxu1 }
 0x171   : > { %v1321_v15 = vpop.f32.mrb[8].mxu1 }
 0x172   : > { %v1327_v16 = vadd.f32 %v1321_v15, %v1158_v11  ;;  %v9708_v17 = vpop.f32.mrb[9].mxu1 }
 0x175   : > { %v1490_v18 = vpop.f32.mrb[10].mxu1 }
 0x176   : > { %v1496_v19 = vadd.f32 %v1490_v18, %v1327_v16  ;;  %v9713_v20 = vpop.f32.mrb[11].mxu1  ;;  %v2047_v18 = vld [vmem:[%s11095_s3] sm:$0xff] }
 0x17c   : > { %v1659_v23 = vpop.f32.mrb[12].mxu1 }
 0x17d   : > { %v1665_v24 = vadd.f32 %v1659_v23, %v1496_v19  ;;  %v9718_v25 = vpop.f32.mrb[13].mxu1 }
 0x180   : > { %v1828_v27 = vpop.f32.mrb[14].mxu1 }
 0x181   : > { %v1834_v28 = vadd.f32 %v1828_v27, %v1665_v24  ;;  %v9723_v29 = vpop.f32.mrb[15].mxu1  ;;  %v9452_v27 = vld [vmem:[%s11095_s3 + $0x18] sm:$0xff] }
 0x187   : > { %v1997_v34 = vpop.f32.mrb[16].mxu1 }
 0x188   : > { %v2003_v36 = vadd.f32 %v1997_v34, %v1834_v28  ;;  %v9728_v38 = vpop.f32.mrb[17].mxu1 }
 0x18a   : > { %v2012_v39 = vadd.f32 %v2008_v35, %v2003_v36  ;;  %v9458_v36 = vld [vmem:[%s11095_s3 + $0x28] sm:$0xff] }
 0x18c   : > { %v2015_v43 = vmax.f32 %v2012_v39, 0.0  ;;  %v9461_v39 = vld [vmem:[%s11095_s3 + $0x30] sm:$0xff] }
 0x18e   : > { %v2024_v44 = vsel %vm10382_vm15, %v2015_v43, 0.0 }
 0x18f   : > { %2032 = vrot.lane.b32.xlu0 %v2024_v44, %s10100_s30 }
 0x1a1   : > { %v1926_v54 = vpop.f32.mrb[0].mxu0 }
 0x1a2   : > { %v2010_v55 = vadd.f32 %v2008_v35, %v1926_v54  ;;  %v1928_v56 = vpop.f32.mrb[1].mxu0 }
 0x1a3   : > { %v2011_v57 = vadd.f32 %v2008_v35, %v1928_v56 }
 0x1a4   : > { %v2013_v59 = vmax.f32 %v2010_v55, 0.0 }
 0x1a5   : > { %v2014_v61 = vmax.f32 %v2011_v57, 0.0 }
 0x1a6   : > { %v2022_v62 = vsel %vm10393_vm8, %v2013_v59, 0.0 }
 0x1a7   : > { %2028 = vrot.lane.b32.xlu1 %v2022_v62, %s10100_s30  ;;  %v2023_v1 = vsel %vm10400_vm1, %v2014_v61, 0.0 }
 0x1ab   : > { %2030 = vrot.lane.b32.xlu1 %v2023_v1, %s10100_s30 }
 0x201   : > { %v2033_v3 = vpop.permute.xlu0 %2032 }
 0x219   : > { %v2029_v2 = vpop.permute.xlu1 %2028 }
 0x21a   : > { %2040 = vst.msk [vmem:[#allocation2] sm:$0xff] %vm2039_vm10, %v2029_v2 }
 0x21d   : > { %v2031_v4 = vpop.permute.xlu1 %2030 }
 0x21e   : > { %v2034_v5 = vsel %vm441_vm11, %v2029_v2, %v2031_v4  ;;  %v2035_v6 = vsel %vm441_vm11, %v2031_v4, %v2033_v3 }
 0x21f   : > { %2043 = vst.msk [vmem:[#allocation2 + $0x10] sm:$0xff] %vm2042_vm9, %v2035_v6  ;;  %2055 = vrot.lane.b32.xlu1 %v2034_v5, %s10091_s14 }
 0x221   : > { %v2044_v7 = vld [vmem:[#allocation2] sm:$0xff] }
 0x223   : > { %2053 = vrot.lane.b32.xlu1 %v2044_v7, %s10091_s14 }
 0x226   : > { %v2046_v8 = vld [vmem:[#allocation2 + $0x10] sm:$0xff] }
 0x227   : > { %2057 = vrot.lane.b32.xlu0 %v2046_v8, %s10091_s14  ;;  %2359 = vrot.lane.b32.xlu1 %v2046_v8, %s10092_s15 }
 0x22b   : > { %2357 = vrot.lane.b32.xlu0 %v2034_v5, %s10092_s15  ;;  %2517 = vrot.lane.b32.xlu1 %v2034_v5, %s10093_s16 }
 0x22f   : > { %2355 = vrot.lane.b32.xlu0 %v2044_v7, %s10092_s15  ;;  %2515 = vrot.lane.b32.xlu1 %v2044_v7, %s10093_s16 }
 0x233   : > { %2519 = vrot.lane.b32.xlu0 %v2046_v8, %s10093_s16  ;;  %2679 = vrot.lane.b32.xlu1 %v2046_v8, %s10094_s17 }
 0x237   : > { %2677 = vrot.lane.b32.xlu0 %v2034_v5, %s10094_s17  ;;  %2837 = vrot.lane.b32.xlu1 %v2034_v5, %s10095_s18 }
 0x23b   : > { %2675 = vrot.lane.b32.xlu0 %v2044_v7, %s10094_s17  ;;  %2835 = vrot.lane.b32.xlu1 %v2044_v7, %s10095_s18 }
 0x23f   : > { %2839 = vrot.lane.b32.xlu0 %v2046_v8, %s10095_s18  ;;  %2999 = vrot.lane.b32.xlu1 %v2046_v8, %s10096_s19 }
 0x243   : > { %2997 = vrot.lane.b32.xlu0 %v2034_v5, %s10096_s19  ;;  %3157 = vrot.lane.b32.xlu1 %v2034_v5, %s10097_s20 }
 0x247   : > { %2995 = vrot.lane.b32.xlu0 %v2044_v7, %s10096_s19  ;;  %3155 = vrot.lane.b32.xlu1 %v2044_v7, %s10097_s20 }
 0x24b   : > { %3159 = vrot.lane.b32.xlu0 %v2046_v8, %s10097_s20  ;;  %3319 = vrot.lane.b32.xlu1 %v2046_v8, %s10098_s21 }
 0x24f   : > { %3317 = vrot.lane.b32.xlu0 %v2034_v5, %s10098_s21  ;;  %3476 = vperm.xlu1 %10079, %v3473_v9  }
 0x253   : > { %3315 = vrot.lane.b32.xlu0 %v2044_v7, %s10098_s21 }
 0x291   : > { %v2056_v10 = vpop.permute.xlu1 %2055 }
 0x295   : > { %v2054_v11 = vpop.permute.xlu1 %2053 }
 0x296   : > { %v2059_v16 = vsel %vm516_vm2, %v2054_v11, %v2056_v10 }
 0x299   : > { %v2058_v12 = vpop.permute.xlu0 %2057  ;;  %v2360_v14 = vpop.permute.xlu1 %2359 }
 0x29a   : > { %9730 = vmatpush3.msra.mxu1 %v2058_v12  ;;  %v2060_v15 = vsel %vm516_vm2, %v2056_v10, %v2058_v12 }
 0x29b   : > { %2068 = vmatprep.subr.mxu0 %v2060_v15  ;;  %9734 = vmatprep.subr.mxu1 %v10089_v0 }
 0x29c   : > { %9732 = vmatmul.mubr.msk.f32.vlgmr.msra.gmra.mrb[18].mxu1 %vm2064_vm3, %v9444_v13  ;;  %2069 = vmatpush1.msra.mxu0 %v2059_v16 }
 0x29d   : > { %9735 = vmatpush3.msra.mxu1 %v2046_v8  ;;  %v2358_v17 = vpop.permute.xlu0 %2357  ;;  %9445 = vmatmul.mubr.msk.f32.vlgmr.msra.gmra.mrb[2].mxu0 %vm2064_vm3, %v9444_v13  ;;  %v2518_v19 = vpop.permute.xlu1 %2517 }
 0x29e   : > { %2212 = vmatprep.subr.mxu0 %v2034_v5  ;;  %9736 = vmatprep.mubr.msk.f32.mxu1 %vm10090_vm0, %v10089_v0  ;;  %v2362_v20 = vsel %vm834_vm4, %v2358_v17, %v2360_v14 }
 0x29f   : > { %9739 = vmatprep.subr.mxu1 %v10089_v0  ;;  %2213 = vmatpush1.msra.mxu0 %v2044_v7 }
 0x2a0   : > { %9737 = vmatmul.mubr.msk.f32.vlgmr.msra.gmra.mrb[20].mxu1 %vm2064_vm3, %v2047_v18  ;;  %2369 = vmatprep.subr.mxu0 %v2362_v20 }
 0x2a1   : > { %v2356_v21 = vpop.permute.xlu0 %2355  ;;  %9740 = vmatpush3.msra.mxu1 %v2360_v14  ;;  %9741 = vmatprep.mubr.msk.f32.mxu1 %vm10090_vm0, %v10089_v0  ;;  %v2516_v23 = vpop.permute.xlu1 %2515 }
 0x2a2   : > { %9744 = vmatprep.subr.mxu1 %v10089_v0  ;;  %2276 = vmatprep.mubr.f32.mxu0 %v10089_v0  ;;  %v2361_v24 = vsel %vm834_vm4, %v2356_v21, %v2358_v17  ;;  %v2521_v32 = vsel %vm1003_vm5, %v2516_v23, %v2518_v19 }
 0x2a4   : > { %9742 = vmatmul.mubr.msk.f32.vlgmr.msra.gmra.mrb[22].mxu1 %vm2064_vm3, %v9449_v22 }
 0x2a5   : > { %v2520_v25 = vpop.permute.xlu0 %2519  ;;  %9447 = vmatmul.mubr.msk.f32.vlgmr.msra.gmra.mrb[2].mxu0 %vm2064_vm3, %v2047_v18  ;;  %9746 = vmatprep.mubr.msk.f32.mxu1 %vm10090_vm0, %v10089_v0  ;;  %v2680_v26 = vpop.permute.xlu1 %2679 }
 0x2a6   : > { %9745 = vmatpush3.msra.mxu1 %v2520_v25  ;;  %2370 = vmatpush1.msra.mxu0 %v2361_v24  ;;  %v2522_v28 = vsel %vm1003_vm5, %v2518_v19, %v2520_v25 }
 0x2a7   : > { %2529 = vmatprep.subr.mxu0 %v2522_v28  ;;  %9749 = vmatprep.subr.mxu1 %v10089_v0 }
 0x2a8   : > { %9747 = vmatmul.mubr.msk.f32.vlgmr.msra.gmra.mrb[24].mxu1 %vm2064_vm3, %v9452_v27  ;;  %2433 = vmatprep.mubr.f32.mxu0 %v10089_v0 }
 0x2a9   : > { %v2678_v29 = vpop.permute.xlu0 %2677  ;;  %9750 = vmatpush3.msra.mxu1 %v2680_v26  ;;  %9751 = vmatprep.mubr.msk.f32.mxu1 %vm10090_vm0, %v10089_v0  ;;  %v2838_v30 = vpop.permute.xlu1 %2837 }
 0x2aa   : > { %9754 = vmatprep.subr.mxu1 %v10089_v0  ;;  %v2682_v35 = vsel %vm1172_vm6, %v2678_v29, %v2680_v26 }
 0x2ac   : > { %9752 = vmatmul.mubr.msk.f32.vlgmr.msra.gmra.mrb[26].mxu1 %vm2064_vm3, %v9455_v31 }
 0x2ad   : > { %v2676_v33 = vpop.permute.xlu0 %2675  ;;  %9450 = vmatmul.mubr.msk.f32.vlgmr.msra.gmra.mrb[2].mxu0 %vm2064_vm3, %v9449_v22  ;;  %v2836_v34 = vpop.permute.xlu1 %2835  ;;  %9756 = vmatprep.mubr.msk.f32.mxu1 %vm10090_vm0, %v10089_v0 }
 0x2ae   : > { %2530 = vmatpush1.msra.mxu0 %v2521_v32  ;;  %2593 = vmatprep.mubr.f32.mxu0 %v10089_v0  ;;  %v2681_v40 = vsel %vm1172_vm6, %v2676_v33, %v2678_v29  ;;  %v2841_v47 = vsel %vm11109_vm7, %v2836_v34, %v2838_v30 }
 0x2af   : > { %2689 = vmatprep.subr.mxu0 %v2682_v35 }
 0x2b1   : > { %v2840_v37 = vpop.permute.xlu0 %2839  ;;  %v3000_v38 = vpop.permute.xlu1 %2999 }
 0x2b2   : > { %9755 = vmatpush3.msra.mxu1 %v2840_v37  ;;  %v2842_v44 = vsel %vm11109_vm7, %v2838_v30, %v2840_v37  ;;  %vm11120_vm7 = vcmask 736256  }
 0x2b3   : > { %9759 = vmatprep.subr.mxu1 %v10089_v0  ;;  %9757 = vmatmul.mubr.msk.f32.vlgmr.msra.gmra.mrb[28].mxu1 %vm2064_vm3, %v9458_v36 }
 0x2b4   : > { %9760 = vmatpush3.msra.mxu1 %v3000_v38  ;;  %9761 = vmatprep.mubr.msk.f32.mxu1 %vm10090_vm0, %v10089_v0 }
 0x2b5   : > { %v2998_v41 = vpop.permute.xlu0 %2997  ;;  %9453 = vmatmul.mubr.msk.f32.vlgmr.msra.gmra.mrb[2].mxu0 %vm2064_vm3, %v9452_v27  ;;  %9764 = vmatprep.subr.mxu1 %v10089_v0  ;;  %v3158_v43 = vpop.permute.xlu1 %3157 }
 0x2b6   : > { %2690 = vmatpush1.msra.mxu0 %v2681_v40  ;;  %2753 = vmatprep.mubr.f32.mxu0 %v10089_v0  ;;  %v3002_v50 = vsel %vm11116_vm12, %v2998_v41, %v3000_v38  ;;  %vm11119_vm12 = vmmov %vm11118_vm14 }
 0x2b7   : > { %2849 = vmatprep.subr.mxu0 %v2842_v44  ;;  %9762 = vmatmul.mubr.msk.f32.vlgmr.msra.gmra.mrb[30].mxu1 %vm2064_vm3, %v9461_v39 }
 0x2b8   : > { %9766 = vmatprep.mubr.msk.f32.mxu1 %vm10090_vm0, %v10089_v0 }
 0x2b9   : > { %v2996_v45 = vpop.permute.xlu0 %2995  ;;  %v3156_v46 = vpop.permute.xlu1 %3155 }
 0x2ba   : > { %v3001_v53 = vsel %vm11117_vm13, %v2996_v45, %v2998_v41  ;;  %v3161_v56 = vsel %vm11119_vm12, %v3156_v46, %v3158_v43  ;;  %vm11121_vm13 = vmmov %vm11120_vm7  ;;  %v4933_v45 = vld [vmem:[%s11098_s6] sm:$0xff]  ;;  %vm11124_vm12 = vcmask 752640  }
 0x2bd   : > { %v3160_v48 = vpop.permute.xlu0 %3159  ;;  %9456 = vmatmul.mubr.msk.f32.vlgmr.msra.gmra.mrb[2].mxu0 %vm2064_vm3, %v9455_v31  ;;  %v3320_v51 = vpop.permute.xlu1 %3319 }
 0x2be   : > { %9765 = vmatpush3.msra.mxu1 %v3160_v48  ;;  %2850 = vmatpush1.msra.mxu0 %v2841_v47  ;;  %v3162_v54 = vsel %vm11118_vm14, %v3158_v43, %v3160_v48  ;;  %v9470_v48 = vld [vmem:[%s11097_s5 + $0x8] sm:$0xff] }
 0x2bf   : > { %3009 = vmatprep.subr.mxu0 %v3002_v50  ;;  %9769 = vmatprep.subr.mxu1 %v10089_v0 }
 0x2c0   : > { %9767 = vmatmul.mubr.msk.f32.vlgmr.msra.gmra.mrb[32].mxu1 %vm2064_vm3, %v9464_v49  ;;  %2913 = vmatprep.mubr.f32.mxu0 %v10089_v0 }
 0x2c1   : > { %9770 = vmatpush3.msra.mxu1 %v3320_v51  ;;  %9771 = vmatprep.mubr.msk.f32.mxu1 %vm10090_vm0, %v10089_v0  ;;  %v3318_v55 = vpop.permute.xlu0 %3317 }
 0x2c2   : > { %9774 = vmatprep.subr.mxu1 %v10089_v0  ;;  %v3322_v57 = vsel %vm11120_vm7, %v3318_v55, %v3320_v51  ;;  %vm11122_vm7 = vcmask 883712  }
 0x2c3   : > { %vm11123_vm14 = vmmov %vm11122_vm7 }
 0x2c4   : > { %9772 = vmatmul.mubr.msk.f32.vlgmr.msra.gmra.mrb[34].mxu1 %vm2064_vm3, %v9467_v52 }
 0x2c5   : > { %9459 = vmatmul.mubr.msk.f32.vlgmr.msra.gmra.mrb[2].mxu0 %vm2064_vm3, %v9458_v36  ;;  %9776 = vmatprep.mubr.msk.f32.mxu1 %vm10090_vm0, %v10089_v0  ;;  %v3316_v59 = vpop.permute.xlu0 %3315 }
 0x2c6   : > { %3010 = vmatpush1.msra.mxu0 %v3001_v53  ;;  %3073 = vmatprep.mubr.f32.mxu0 %v10089_v0  ;;  %v3321_v60 = vsel %vm11121_vm13, %v3316_v59, %v3318_v55  ;;  %vm11125_vm13 = vmmov %vm11124_vm12 }
 0x2c7   : > { %3169 = vmatprep.subr.mxu0 %v3162_v54  ;;  %v3508_v54 = vld [vmem:[%s11097_s5] sm:$0xff] }
 0x2cd   : > { %9462 = vmatmul.mubr.msk.f32.vlgmr.msra.gmra.mrb[2].mxu0 %vm2064_vm3, %v9461_v39 }
 0x2ce   : > { %3170 = vmatpush1.msra.mxu0 %v3161_v56  ;;  %3233 = vmatprep.mubr.f32.mxu0 %v10089_v0  ;;  %v3477_v25 = vpop.permute.xlu1 %3476 }
 0x2cf   : > { %3329 = vmatprep.subr.mxu0 %v3322_v57 }
 0x2d5   : > { %9465 = vmatmul.mubr.msk.f32.vlgmr.msra.gmra.mrb[2].mxu0 %vm2064_vm3, %v9464_v49 }
 0x2d6   : > { %3330 = vmatpush1.msra.mxu0 %v3321_v60  ;;  %3393 = vmatprep.mubr.f32.mxu0 %v10089_v0  ;;  %v9475_v60 = vld [vmem:[%s11097_s5 + $0x10] sm:$0xff] }
 0x2dd   : > { %9468 = vmatmul.mubr.msk.f32.vlgmr.msra.gmra.mrb[2].mxu0 %vm2064_vm3, %v9467_v52 }
 0x2de   : > { %3592 = vmatprep.mubr.f32.mxu0 %v10089_v0 }
 0x36f   : > { %v2205_v61 = vpop.f32.mrb[18].mxu1 }
 0x370   : > { %v9733_v62 = vpop.f32.mrb[19].mxu1 }
 0x373   : > { %v2349_v1 = vpop.f32.mrb[20].mxu1 }
 0x374   : > { %v2350_v2 = vadd.f32 %v2349_v1, %v2205_v61  ;;  %v9738_v3 = vpop.f32.mrb[21].mxu1 }
 0x377   : > { %v2506_v4 = vpop.f32.mrb[22].mxu1 }
 0x378   : > { %v2512_v5 = vadd.f32 %v2506_v4, %v2350_v2  ;;  %v9743_v6 = vpop.f32.mrb[23].mxu1  ;;  %v9478_v2 = vld [vmem:[%s11097_s5 + $0x18] sm:$0xff] }
 0x379   : > { %v9481_v6 = vld [vmem:[%s11097_s5 + $0x20] sm:$0xff] }
 0x37b   : > { %v2666_v7 = vpop.f32.mrb[24].mxu1 }
 0x37c   : > { %v2672_v8 = vadd.f32 %v2666_v7, %v2512_v5  ;;  %v9748_v9 = vpop.f32.mrb[25].mxu1 }
 0x37f   : > { %v2826_v10 = vpop.f32.mrb[26].mxu1 }
 0x380   : > { %v2832_v11 = vadd.f32 %v2826_v10, %v2672_v8  ;;  %v9753_v12 = vpop.f32.mrb[27].mxu1 }
 0x386   : > { %v2986_v13 = vpop.f32.mrb[28].mxu1 }
 0x387   : > { %v2992_v14 = vadd.f32 %v2986_v13, %v2832_v11  ;;  %v9758_v15 = vpop.f32.mrb[29].mxu1  ;;  %v9484_v11 = vld [vmem:[%s11097_s5 + $0x28] sm:$0xff] }
 0x38a   : > { %v3146_v16 = vpop.f32.mrb[30].mxu1 }
 0x38b   : > { %v3152_v17 = vadd.f32 %v3146_v16, %v2992_v14  ;;  %v9763_v18 = vpop.f32.mrb[31].mxu1  ;;  %v9487_v14 = vld [vmem:[%s11097_s5 + $0x30] sm:$0xff] }
 0x393   : > { %v3306_v19 = vpop.f32.mrb[32].mxu1 }
 0x394   : > { %v3312_v20 = vadd.f32 %v3306_v19, %v3152_v17  ;;  %v9768_v21 = vpop.f32.mrb[33].mxu1 }
 0x395   : > { %v9490_v21 = vld [vmem:[%s11097_s5 + $0x38] sm:$0xff] }
 0x397   : > { %v3466_v22 = vpop.f32.mrb[34].mxu1 }
 0x398   : > { %v3472_v23 = vadd.f32 %v3466_v22, %v3312_v20  ;;  %v9773_v24 = vpop.f32.mrb[35].mxu1 }
 0x39a   : > { %v3481_v29 = vadd.f32 %v3477_v25, %v3472_v23 }
 0x39c   : > { %v3484_v34 = vmax.f32 %v3481_v29, 0.0 }
 0x39e   : > { %v3487_v36 = vsel %vm10382_vm15, %v3484_v34, 0.0 }
 0x3b0   : > { %v3395_v26 = vpop.f32.mrb[2].mxu0 }
 0x3b1   : > { %v3479_v27 = vadd.f32 %v3477_v25, %v3395_v26  ;;  %v3397_v28 = vpop.f32.mrb[3].mxu0  ;;  %v9493_v26 = vld [vmem:[%s11097_s5 + $0x40] sm:$0xff] }
 0x3b2   : > { %v3480_v30 = vadd.f32 %v3477_v25, %v3397_v28 }
 0x3b3   : > { %v3482_v31 = vmax.f32 %v3479_v27, 0.0 }
 0x3b4   : > { %v3483_v32 = vmax.f32 %v3480_v30, 0.0 }
 0x3b5   : > { %v3485_v33 = vsel %vm10393_vm8, %v3482_v31, 0.0 }
 0x3b6   : > { %3491 = vrot.lane.b32.xlu0 %v3485_v33, %s10100_s30  ;;  %v3486_v35 = vsel %vm10400_vm1, %v3483_v32, 0.0 }
 0x3b7   : > { %3493 = vrot.lane.b32.xlu1 %v3486_v35, %s10100_s30 }
 0x3ba   : > { %3495 = vrot.lane.b32.xlu0 %v3487_v36, %s10100_s30 }
 0x428   : > { %v3492_v37 = vpop.permute.xlu0 %3491 }
 0x429   : > { %3502 = vst.msk [vmem:[#allocation3] sm:$0xff] %vm2039_vm10, %v3492_v37  ;;  %v3494_v38 = vpop.permute.xlu1 %3493 }
 0x42a   : > { %v3497_v39 = vsel %vm441_vm11, %v3492_v37, %v3494_v38 }
 0x42b   : > { %3516 = vrot.lane.b32.xlu1 %v3497_v39, %s10091_s14 }
 0x42c   : > { %v3496_v40 = vpop.permute.xlu0 %3495 }
 0x42d   : > { %v3498_v41 = vsel %vm441_vm11, %v3494_v38, %v3496_v40 }
 0x42e   : > { %3504 = vst.msk [vmem:[#allocation3 + $0x10] sm:$0xff] %vm2042_vm9, %v3498_v41 }
 0x430   : > { %v3505_v43 = vld [vmem:[#allocation3] sm:$0xff] }
 0x431   : > { %3514 = vrot.lane.b32.xlu1 %v3505_v43, %s10091_s14 }
 0x435   : > { %v3507_v44 = vld [vmem:[#allocation3 + $0x10] sm:$0xff] }
 0x436   : > { %3518 = vrot.lane.b32.xlu0 %v3507_v44, %s10091_s14  ;;  %3819 = vrot.lane.b32.xlu1 %v3507_v44, %s10092_s15 }
 0x43a   : > { %3817 = vrot.lane.b32.xlu0 %v3497_v39, %s10092_s15  ;;  %3977 = vrot.lane.b32.xlu1 %v3497_v39, %s10093_s16 }
 0x43e   : > { %3815 = vrot.lane.b32.xlu0 %v3505_v43, %s10092_s15  ;;  %3975 = vrot.lane.b32.xlu1 %v3505_v43, %s10093_s16 }
 0x442   : > { %3979 = vrot.lane.b32.xlu0 %v3507_v44, %s10093_s16  ;;  %4139 = vrot.lane.b32.xlu1 %v3507_v44, %s10094_s17 }
 0x446   : > { %4137 = vrot.lane.b32.xlu0 %v3497_v39, %s10094_s17  ;;  %4297 = vrot.lane.b32.xlu1 %v3497_v39, %s10095_s18 }
 0x44a   : > { %4135 = vrot.lane.b32.xlu0 %v3505_v43, %s10094_s17  ;;  %4295 = vrot.lane.b32.xlu1 %v3505_v43, %s10095_s18 }
 0x44e   : > { %4299 = vrot.lane.b32.xlu0 %v3507_v44, %s10095_s18  ;;  %4459 = vrot.lane.b32.xlu1 %v3507_v44, %s10096_s19 }
 0x452   : > { %4457 = vrot.lane.b32.xlu0 %v3497_v39, %s10096_s19  ;;  %4617 = vrot.lane.b32.xlu1 %v3497_v39, %s10097_s20 }
 0x456   : > { %4455 = vrot.lane.b32.xlu0 %v3505_v43, %s10096_s19  ;;  %4615 = vrot.lane.b32.xlu1 %v3505_v43, %s10097_s20 }
 0x45a   : > { %4619 = vrot.lane.b32.xlu0 %v3507_v44, %s10097_s20  ;;  %4779 = vrot.lane.b32.xlu1 %v3507_v44, %s10098_s21 }
 0x45e   : > { %4777 = vrot.lane.b32.xlu0 %v3497_v39, %s10098_s21  ;;  %4936 = vperm.xlu1 %10079, %v4933_v45  }
 0x462   : > { %4775 = vrot.lane.b32.xlu0 %v3505_v43, %s10098_s21 }
 0x49d   : > { %v3517_v46 = vpop.permute.xlu1 %3516 }
 0x4a3   : > { %v3515_v47 = vpop.permute.xlu1 %3514 }
 0x4a4   : > { %v3520_v52 = vsel %vm516_vm2, %v3515_v47, %v3517_v46 }
 0x4a8   : > { %v3519_v49 = vpop.permute.xlu0 %3518  ;;  %v3820_v50 = vpop.permute.xlu1 %3819 }
 0x4a9   : > { %9775 = vmatpush3.msra.mxu1 %v3519_v49  ;;  %v3521_v51 = vsel %vm516_vm2, %v3517_v46, %v3519_v49 }
 0x4aa   : > { %3528 = vmatprep.subr.mxu0 %v3521_v51  ;;  %9777 = vmatmul.mubr.msk.f32.vlgmr.msra.gmra.mrb[36].mxu1 %vm2064_vm3, %v9470_v48 }
 0x4ab   : > { %9779 = vmatprep.subr.mxu1 %v10089_v0  ;;  %3529 = vmatpush1.msra.mxu0 %v3520_v52 }
 0x4ac   : > { %9780 = vmatpush3.msra.mxu1 %v3507_v44  ;;  %9471 = vmatmul.mubr.msk.f32.vlgmr.msra.gmra.mrb[4].mxu0 %vm2064_vm3, %v9470_v48  ;;  %v3818_v53 = vpop.permute.xlu0 %3817  ;;  %v3978_v55 = vpop.permute.xlu1 %3977 }
 0x4ad   : > { %3672 = vmatprep.subr.mxu0 %v3497_v39  ;;  %9781 = vmatprep.mubr.msk.f32.mxu1 %vm10090_vm0, %v10089_v0  ;;  %v3822_v56 = vsel %vm834_vm4, %v3818_v53, %v3820_v50 }
 0x4ae   : > { %3673 = vmatpush1.msra.mxu0 %v3505_v43  ;;  %9784 = vmatprep.subr.mxu1 %v10089_v0 }
 0x4af   : > { %9782 = vmatmul.mubr.msk.f32.vlgmr.msra.gmra.mrb[38].mxu1 %vm2064_vm3, %v3508_v54  ;;  %3829 = vmatprep.subr.mxu0 %v3822_v56 }
 0x4b0   : > { %9785 = vmatpush3.msra.mxu1 %v3820_v50  ;;  %v3816_v57 = vpop.permute.xlu0 %3815  ;;  %3736 = vmatprep.mubr.f32.mxu0 %v10089_v0  ;;  %v3976_v59 = vpop.permute.xlu1 %3975 }
 0x4b1   : > { %9786 = vmatprep.mubr.msk.f32.mxu1 %vm10090_vm0, %v10089_v0  ;;  %9789 = vmatprep.subr.mxu1 %v10089_v0  ;;  %v3821_v61 = vsel %vm834_vm4, %v3816_v57, %v3818_v53  ;;  %v3981_v7 = vsel %vm1003_vm5, %v3976_v59, %v3978_v55 }
 0x4b3   : > { %9787 = vmatmul.mubr.msk.f32.vlgmr.msra.gmra.mrb[40].mxu1 %vm2064_vm3, %v9475_v60 }
 0x4b4   : > { %9473 = vmatmul.mubr.msk.f32.vlgmr.msra.gmra.mrb[4].mxu0 %vm2064_vm3, %v3508_v54  ;;  %v3980_v62 = vpop.permute.xlu0 %3979  ;;  %v4140_v1 = vpop.permute.xlu1 %4139  ;;  %9791 = vmatprep.mubr.msk.f32.mxu1 %vm10090_vm0, %v10089_v0 }
 0x4b5   : > { %3830 = vmatpush1.msra.mxu0 %v3821_v61  ;;  %9790 = vmatpush3.msra.mxu1 %v3980_v62  ;;  %v3982_v3 = vsel %vm1003_vm5, %v3978_v55, %v3980_v62 }
 0x4b6   : > { %3989 = vmatprep.subr.mxu0 %v3982_v3  ;;  %9794 = vmatprep.subr.mxu1 %v10089_v0 }
 0x4b7   : > { %9792 = vmatmul.mubr.msk.f32.vlgmr.msra.gmra.mrb[42].mxu1 %vm2064_vm3, %v9478_v2  ;;  %3893 = vmatprep.mubr.f32.mxu0 %v10089_v0 }
 0x4b8   : > { %v4138_v4 = vpop.permute.xlu0 %4137  ;;  %9795 = vmatpush3.msra.mxu1 %v4140_v1  ;;  %v4298_v5 = vpop.permute.xlu1 %4297  ;;  %9796 = vmatprep.mubr.msk.f32.mxu1 %vm10090_vm0, %v10089_v0 }
 0x4b9   : > { %9799 = vmatprep.subr.mxu1 %v10089_v0  ;;  %v4142_v10 = vsel %vm1172_vm6, %v4138_v4, %v4140_v1 }
 0x4bb   : > { %9797 = vmatmul.mubr.msk.f32.vlgmr.msra.gmra.mrb[44].mxu1 %vm2064_vm3, %v9481_v6 }
 0x4bc   : > { %9476 = vmatmul.mubr.msk.f32.vlgmr.msra.gmra.mrb[4].mxu0 %vm2064_vm3, %v9475_v60  ;;  %v4136_v8 = vpop.permute.xlu0 %4135  ;;  %v4296_v9 = vpop.permute.xlu1 %4295  ;;  %9801 = vmatprep.mubr.msk.f32.mxu1 %vm10090_vm0, %v10089_v0 }
 0x4bd   : > { %3990 = vmatpush1.msra.mxu0 %v3981_v7  ;;  %4053 = vmatprep.mubr.f32.mxu0 %v10089_v0  ;;  %v4141_v15 = vsel %vm1172_vm6, %v4136_v8, %v4138_v4  ;;  %v4301_v22 = vsel %vm11123_vm14, %v4296_v9, %v4298_v5 }
 0x4be   : > { %4149 = vmatprep.subr.mxu0 %v4142_v10 }
 0x4c0   : > { %v4300_v12 = vpop.permute.xlu0 %4299  ;;  %v4460_v13 = vpop.permute.xlu1 %4459 }
 0x4c1   : > { %9800 = vmatpush3.msra.mxu1 %v4300_v12  ;;  %v4302_v18 = vsel %vm11122_vm7, %v4298_v5, %v4300_v12  ;;  %vm11126_vm7 = vcmask 744448  }
 0x4c2   : > { %9804 = vmatprep.subr.mxu1 %v10089_v0  ;;  %9802 = vmatmul.mubr.msk.f32.vlgmr.msra.gmra.mrb[46].mxu1 %vm2064_vm3, %v9484_v11  ;;  %vm11127_vm14 = vmmov %vm11126_vm7 }
 0x4c3   : > { %9805 = vmatpush3.msra.mxu1 %v4460_v13  ;;  %9806 = vmatprep.mubr.msk.f32.mxu1 %vm10090_vm0, %v10089_v0 }
 0x4c4   : > { %9479 = vmatmul.mubr.msk.f32.vlgmr.msra.gmra.mrb[4].mxu0 %vm2064_vm3, %v9478_v2  ;;  %v4458_v16 = vpop.permute.xlu0 %4457  ;;  %v4618_v17 = vpop.permute.xlu1 %4617  ;;  %9809 = vmatprep.subr.mxu1 %v10089_v0 }
 0x4c5   : > { %4150 = vmatpush1.msra.mxu0 %v4141_v15  ;;  %4213 = vmatprep.mubr.f32.mxu0 %v10089_v0  ;;  %v4462_v24 = vsel %vm11124_vm12, %v4458_v16, %v4460_v13  ;;  %vm11128_vm12 = vcmask 736256  }
 0x4c6   : > { %4309 = vmatprep.subr.mxu0 %v4302_v18  ;;  %9807 = vmatmul.mubr.msk.f32.vlgmr.msra.gmra.mrb[48].mxu1 %vm2064_vm3, %v9487_v14 }
 0x4c7   : > { %9811 = vmatprep.mubr.msk.f32.mxu1 %vm10090_vm0, %v10089_v0 }
 0x4c8   : > { %v4456_v19 = vpop.permute.xlu0 %4455  ;;  %v4616_v20 = vpop.permute.xlu1 %4615 }
 0x4c9   : > { %v4461_v27 = vsel %vm11125_vm13, %v4456_v19, %v4458_v16  ;;  %v4621_v30 = vsel %vm11127_vm14, %v4616_v20, %v4618_v17  ;;  %vm11129_vm13 = vmmov %vm11128_vm12  ;;  %v6393_v19 = vld [vmem:[%s11100_s8] sm:$0xff] }
 0x4cc   : > { %9482 = vmatmul.mubr.msk.f32.vlgmr.msra.gmra.mrb[4].mxu0 %vm2064_vm3, %v9481_v6  ;;  %v4620_v23 = vpop.permute.xlu0 %4619  ;;  %v4780_v25 = vpop.permute.xlu1 %4779 }
 0x4cd   : > { %4310 = vmatpush1.msra.mxu0 %v4301_v22  ;;  %9810 = vmatpush3.msra.mxu1 %v4620_v23  ;;  %v4622_v28 = vsel %vm11126_vm7, %v4618_v17, %v4620_v23  ;;  %v9496_v22 = vld [vmem:[%s11099_s7 + $0x8] sm:$0xff]  ;;  %vm11130_vm7 = vcmask 883712  }
 0x4ce   : > { %4469 = vmatprep.subr.mxu0 %v4462_v24  ;;  %9812 = vmatmul.mubr.msk.f32.vlgmr.msra.gmra.mrb[50].mxu1 %vm2064_vm3, %v9490_v21  ;;  %vm11131_vm14 = vmmov %vm11130_vm7 }
 0x4cf   : > { %9814 = vmatprep.subr.mxu1 %v10089_v0  ;;  %9816 = vmatprep.mubr.msk.f32.mxu1 %vm10090_vm0, %v10089_v0 }
 0x4d0   : > { %9815 = vmatpush3.msra.mxu1 %v4780_v25  ;;  %4373 = vmatprep.mubr.f32.mxu0 %v10089_v0  ;;  %v4778_v29 = vpop.permute.xlu0 %4777 }
 0x4d1   : > { %9819 = vmatprep.subr.mxu1 %v10089_v0  ;;  %v4782_v31 = vsel %vm11128_vm12, %v4778_v29, %v4780_v25  ;;  %vm11132_vm12 = vcmask 752640  }
 0x4d2   : > { %9817 = vmatmul.mubr.msk.f32.vlgmr.msra.gmra.mrb[52].mxu1 %vm2064_vm3, %v9493_v26 }
 0x4d3   : > { %9821 = vmatprep.mubr.msk.f32.mxu1 %vm10090_vm0, %v10089_v0 }
 0x4d4   : > { %9485 = vmatmul.mubr.msk.f32.vlgmr.msra.gmra.mrb[4].mxu0 %vm2064_vm3, %v9484_v11  ;;  %v4776_v32 = vpop.permute.xlu0 %4775 }
 0x4d5   : > { %4470 = vmatpush1.msra.mxu0 %v4461_v27  ;;  %4533 = vmatprep.mubr.f32.mxu0 %v10089_v0  ;;  %v4781_v33 = vsel %vm11129_vm13, %v4776_v32, %v4778_v29  ;;  %v9501_v32 = vld [vmem:[%s11099_s7 + $0x10] sm:$0xff]  ;;  %vm11133_vm13 = vmmov %vm11132_vm12 }
 0x4d6   : > { %4629 = vmatprep.subr.mxu0 %v4622_v28  ;;  %v4968_v28 = vld [vmem:[%s11099_s7] sm:$0xff] }
 0x4dc   : > { %9488 = vmatmul.mubr.msk.f32.vlgmr.msra.gmra.mrb[4].mxu0 %vm2064_vm3, %v9487_v14 }
 0x4dd   : > { %4630 = vmatpush1.msra.mxu0 %v4621_v30  ;;  %4693 = vmatprep.mubr.f32.mxu0 %v10089_v0  ;;  %v4937_v62 = vpop.permute.xlu1 %4936 }
 0x4de   : > { %4789 = vmatprep.subr.mxu0 %v4782_v31 }
 0x4e4   : > { %9491 = vmatmul.mubr.msk.f32.vlgmr.msra.gmra.mrb[4].mxu0 %vm2064_vm3, %v9490_v21 }
 0x4e5   : > { %4790 = vmatpush1.msra.mxu0 %v4781_v33  ;;  %4853 = vmatprep.mubr.f32.mxu0 %v10089_v0 }
 0x4ec   : > { %9494 = vmatmul.mubr.msk.f32.vlgmr.msra.gmra.mrb[4].mxu0 %vm2064_vm3, %v9493_v26 }
 0x4ed   : > { %5052 = vmatprep.mubr.f32.mxu0 %v10089_v0 }
 0x57d   : > { %v3665_v34 = vpop.f32.mrb[36].mxu1 }
 0x57e   : > { %v9778_v35 = vpop.f32.mrb[37].mxu1 }
 0x582   : > { %v3809_v36 = vpop.f32.mrb[38].mxu1 }
 0x583   : > { %v3810_v37 = vadd.f32 %v3809_v36, %v3665_v34  ;;  %v9783_v38 = vpop.f32.mrb[39].mxu1 }
 0x586   : > { %v3966_v39 = vpop.f32.mrb[40].mxu1 }
 0x587   : > { %v3972_v40 = vadd.f32 %v3966_v39, %v3810_v37  ;;  %v9788_v41 = vpop.f32.mrb[41].mxu1  ;;  %v9504_v37 = vld [vmem:[%s11099_s7 + $0x18] sm:$0xff] }
 0x588   : > { %v9507_v41 = vld [vmem:[%s11099_s7 + $0x20] sm:$0xff] }
 0x58a   : > { %v4126_v43 = vpop.f32.mrb[42].mxu1 }
 0x58b   : > { %v4132_v44 = vadd.f32 %v4126_v43, %v3972_v40  ;;  %v9793_v45 = vpop.f32.mrb[43].mxu1 }
 0x58e   : > { %v4286_v46 = vpop.f32.mrb[44].mxu1 }
 0x58f   : > { %v4292_v47 = vadd.f32 %v4286_v46, %v4132_v44  ;;  %v9798_v48 = vpop.f32.mrb[45].mxu1 }
 0x595   : > { %v4446_v49 = vpop.f32.mrb[46].mxu1 }
 0x596   : > { %v4452_v50 = vadd.f32 %v4446_v49, %v4292_v47  ;;  %v9803_v51 = vpop.f32.mrb[47].mxu1  ;;  %v9510_v47 = vld [vmem:[%s11099_s7 + $0x28] sm:$0xff] }
 0x599   : > { %v4606_v52 = vpop.f32.mrb[48].mxu1 }
 0x59a   : > { %v4612_v53 = vadd.f32 %v4606_v52, %v4452_v50  ;;  %v9808_v54 = vpop.f32.mrb[49].mxu1  ;;  %v9513_v50 = vld [vmem:[%s11099_s7 + $0x30] sm:$0xff] }
 0x5a1   : > { %v4766_v55 = vpop.f32.mrb[50].mxu1 }
 0x5a2   : > { %v4772_v56 = vadd.f32 %v4766_v55, %v4612_v53  ;;  %v9813_v57 = vpop.f32.mrb[51].mxu1 }
 0x5a3   : > { %v9516_v57 = vld [vmem:[%s11099_s7 + $0x38] sm:$0xff] }
 0x5a5   : > { %v4926_v59 = vpop.f32.mrb[52].mxu1 }
 0x5a6   : > { %v4932_v60 = vadd.f32 %v4926_v59, %v4772_v56  ;;  %v9818_v61 = vpop.f32.mrb[53].mxu1 }
 0x5a8   : > { %v4941_v2 = vadd.f32 %v4937_v62, %v4932_v60 }
 0x5aa   : > { %v4944_v8 = vmax.f32 %v4941_v2, 0.0 }
 0x5ac   : > { %v4947_v11 = vsel %vm10382_vm15, %v4944_v8, 0.0 }
 0x5bf   : > { %v4855_v1 = vpop.f32.mrb[4].mxu0 }
 0x5c0   : > { %v4939_v3 = vadd.f32 %v4937_v62, %v4855_v1  ;;  %v4857_v4 = vpop.f32.mrb[5].mxu0  ;;  %v9519_v1 = vld [vmem:[%s11099_s7 + $0x40] sm:$0xff] }
 0x5c1   : > { %v4940_v5 = vadd.f32 %v4937_v62, %v4857_v4 }
 0x5c2   : > { %v4942_v6 = vmax.f32 %v4939_v3, 0.0 }
 0x5c3   : > { %v4943_v7 = vmax.f32 %v4940_v5, 0.0 }
 0x5c4   : > { %v4945_v9 = vsel %vm10393_vm8, %v4942_v6, 0.0 }
 0x5c5   : > { %4951 = vrot.lane.b32.xlu0 %v4945_v9, %s10100_s30  ;;  %v4946_v10 = vsel %vm10400_vm1, %v4943_v7, 0.0 }
 0x5c6   : > { %4953 = vrot.lane.b32.xlu1 %v4946_v10, %s10100_s30 }
 0x5c9   : > { %4955 = vrot.lane.b32.xlu0 %v4947_v11, %s10100_s30 }
 0x637   : > { %v4952_v12 = vpop.permute.xlu0 %4951 }
 0x638   : > { %4962 = vst.msk [vmem:[#allocation2] sm:$0xff] %vm2039_vm10, %v4952_v12  ;;  %v4954_v13 = vpop.permute.xlu1 %4953 }
 0x639   : > { %v4957_v14 = vsel %vm441_vm11, %v4952_v12, %v4954_v13 }
 0x63a   : > { %4976 = vrot.lane.b32.xlu1 %v4957_v14, %s10091_s14 }
 0x63b   : > { %v4956_v15 = vpop.permute.xlu0 %4955 }
 0x63c   : > { %v4958_v16 = vsel %vm441_vm11, %v4954_v13, %v4956_v15 }
 0x63d   : > { %4964 = vst.msk [vmem:[#allocation2 + $0x10] sm:$0xff] %vm2042_vm9, %v4958_v16 }
 0x63f   : > { %v4965_v17 = vld [vmem:[#allocation2] sm:$0xff] }
 0x640   : > { %4974 = vrot.lane.b32.xlu1 %v4965_v17, %s10091_s14 }
 0x644   : > { %v4967_v18 = vld [vmem:[#allocation2 + $0x10] sm:$0xff] }
 0x645   : > { %4978 = vrot.lane.b32.xlu0 %v4967_v18, %s10091_s14  ;;  %5279 = vrot.lane.b32.xlu1 %v4967_v18, %s10092_s15 }
 0x649   : > { %5277 = vrot.lane.b32.xlu0 %v4957_v14, %s10092_s15  ;;  %5437 = vrot.lane.b32.xlu1 %v4957_v14, %s10093_s16 }
 0x64d   : > { %5275 = vrot.lane.b32.xlu0 %v4965_v17, %s10092_s15  ;;  %5435 = vrot.lane.b32.xlu1 %v4965_v17, %s10093_s16 }
 0x651   : > { %5439 = vrot.lane.b32.xlu0 %v4967_v18, %s10093_s16  ;;  %5599 = vrot.lane.b32.xlu1 %v4967_v18, %s10094_s17 }
 0x655   : > { %5597 = vrot.lane.b32.xlu0 %v4957_v14, %s10094_s17  ;;  %5757 = vrot.lane.b32.xlu1 %v4957_v14, %s10095_s18 }
 0x659   : > { %5595 = vrot.lane.b32.xlu0 %v4965_v17, %s10094_s17  ;;  %5755 = vrot.lane.b32.xlu1 %v4965_v17, %s10095_s18 }
 0x65d   : > { %5759 = vrot.lane.b32.xlu0 %v4967_v18, %s10095_s18  ;;  %5919 = vrot.lane.b32.xlu1 %v4967_v18, %s10096_s19 }
 0x661   : > { %5917 = vrot.lane.b32.xlu0 %v4957_v14, %s10096_s19  ;;  %6077 = vrot.lane.b32.xlu1 %v4957_v14, %s10097_s20 }
 0x665   : > { %5915 = vrot.lane.b32.xlu0 %v4965_v17, %s10096_s19  ;;  %6075 = vrot.lane.b32.xlu1 %v4965_v17, %s10097_s20 }
 0x669   : > { %6079 = vrot.lane.b32.xlu0 %v4967_v18, %s10097_s20  ;;  %6239 = vrot.lane.b32.xlu1 %v4967_v18, %s10098_s21 }
 0x66d   : > { %6237 = vrot.lane.b32.xlu0 %v4957_v14, %s10098_s21  ;;  %6396 = vperm.xlu1 %10079, %v6393_v19  }
 0x671   : > { %6235 = vrot.lane.b32.xlu0 %v4965_v17, %s10098_s21 }
 0x6ac   : > { %v4977_v20 = vpop.permute.xlu1 %4976 }
 0x6b2   : > { %v4975_v21 = vpop.permute.xlu1 %4974 }
 0x6b3   : > { %v4980_v26 = vsel %vm516_vm2, %v4975_v21, %v4977_v20 }
 0x6b7   : > { %v4979_v23 = vpop.permute.xlu0 %4978  ;;  %v5280_v24 = vpop.permute.xlu1 %5279 }
 0x6b8   : > { %9820 = vmatpush3.msra.mxu1 %v4979_v23  ;;  %v4981_v25 = vsel %vm516_vm2, %v4977_v20, %v4979_v23 }
 0x6b9   : > { %4988 = vmatprep.subr.mxu0 %v4981_v25  ;;  %9822 = vmatmul.mubr.msk.f32.vlgmr.msra.gmra.mrb[54].mxu1 %vm2064_vm3, %v9496_v22 }
 0x6ba   : > { %9824 = vmatprep.subr.mxu1 %v10089_v0  ;;  %4989 = vmatpush1.msra.mxu0 %v4980_v26 }
 0x6bb   : > { %9825 = vmatpush3.msra.mxu1 %v4967_v18  ;;  %v5278_v27 = vpop.permute.xlu0 %5277  ;;  %9497 = vmatmul.mubr.msk.f32.vlgmr.msra.gmra.mrb[6].mxu0 %vm2064_vm3, %v9496_v22  ;;  %v5438_v29 = vpop.permute.xlu1 %5437 }
 0x6bc   : > { %5132 = vmatprep.subr.mxu0 %v4957_v14  ;;  %9826 = vmatprep.mubr.msk.f32.mxu1 %vm10090_vm0, %v10089_v0  ;;  %v5282_v30 = vsel %vm834_vm4, %v5278_v27, %v5280_v24 }
 0x6bd   : > { %5133 = vmatpush1.msra.mxu0 %v4965_v17  ;;  %9829 = vmatprep.subr.mxu1 %v10089_v0 }
 0x6be   : > { %9827 = vmatmul.mubr.msk.f32.vlgmr.msra.gmra.mrb[56].mxu1 %vm2064_vm3, %v4968_v28  ;;  %5289 = vmatprep.subr.mxu0 %v5282_v30 }
 0x6bf   : > { %9830 = vmatpush3.msra.mxu1 %v5280_v24  ;;  %v5276_v31 = vpop.permute.xlu0 %5275  ;;  %5196 = vmatprep.mubr.f32.mxu0 %v10089_v0  ;;  %v5436_v33 = vpop.permute.xlu1 %5435 }
 0x6c0   : > { %9831 = vmatprep.mubr.msk.f32.mxu1 %vm10090_vm0, %v10089_v0  ;;  %9834 = vmatprep.subr.mxu1 %v10089_v0  ;;  %v5281_v34 = vsel %vm834_vm4, %v5276_v31, %v5278_v27  ;;  %v5441_v43 = vsel %vm1003_vm5, %v5436_v33, %v5438_v29 }
 0x6c2   : > { %9832 = vmatmul.mubr.msk.f32.vlgmr.msra.gmra.mrb[58].mxu1 %vm2064_vm3, %v9501_v32 }
 0x6c3   : > { %v5440_v35 = vpop.permute.xlu0 %5439  ;;  %9499 = vmatmul.mubr.msk.f32.vlgmr.msra.gmra.mrb[6].mxu0 %vm2064_vm3, %v4968_v28  ;;  %9836 = vmatprep.mubr.msk.f32.mxu1 %vm10090_vm0, %v10089_v0  ;;  %v5600_v36 = vpop.permute.xlu1 %5599 }
 0x6c4   : > { %5290 = vmatpush1.msra.mxu0 %v5281_v34  ;;  %9835 = vmatpush3.msra.mxu1 %v5440_v35  ;;  %v5442_v38 = vsel %vm1003_vm5, %v5438_v29, %v5440_v35 }
 0x6c5   : > { %5449 = vmatprep.subr.mxu0 %v5442_v38  ;;  %9839 = vmatprep.subr.mxu1 %v10089_v0 }
 0x6c6   : > { %9837 = vmatmul.mubr.msk.f32.vlgmr.msra.gmra.mrb[60].mxu1 %vm2064_vm3, %v9504_v37  ;;  %5353 = vmatprep.mubr.f32.mxu0 %v10089_v0 }
 0x6c7   : > { %v5598_v39 = vpop.permute.xlu0 %5597  ;;  %9840 = vmatpush3.msra.mxu1 %v5600_v36  ;;  %v5758_v40 = vpop.permute.xlu1 %5757  ;;  %9841 = vmatprep.mubr.msk.f32.mxu1 %vm10090_vm0, %v10089_v0 }
 0x6c8   : > { %9844 = vmatprep.subr.mxu1 %v10089_v0  ;;  %v5602_v46 = vsel %vm1172_vm6, %v5598_v39, %v5600_v36 }
 0x6ca   : > { %9842 = vmatmul.mubr.msk.f32.vlgmr.msra.gmra.mrb[62].mxu1 %vm2064_vm3, %v9507_v41 }
 0x6cb   : > { %v5596_v44 = vpop.permute.xlu0 %5595  ;;  %9502 = vmatmul.mubr.msk.f32.vlgmr.msra.gmra.mrb[6].mxu0 %vm2064_vm3, %v9501_v32  ;;  %v5756_v45 = vpop.permute.xlu1 %5755  ;;  %9846 = vmatprep.mubr.msk.f32.mxu1 %vm10090_vm0, %v10089_v0 }
 0x6cc   : > { %5450 = vmatpush1.msra.mxu0 %v5441_v43  ;;  %5513 = vmatprep.mubr.f32.mxu0 %v10089_v0  ;;  %v5601_v51 = vsel %vm1172_vm6, %v5596_v44, %v5598_v39  ;;  %v5761_v59 = vsel %vm11131_vm14, %v5756_v45, %v5758_v40 }
 0x6cd   : > { %5609 = vmatprep.subr.mxu0 %v5602_v46 }
 0x6cf   : > { %v5760_v48 = vpop.permute.xlu0 %5759  ;;  %v5920_v49 = vpop.permute.xlu1 %5919 }
 0x6d0   : > { %9845 = vmatpush3.msra.mxu1 %v5760_v48  ;;  %v5762_v54 = vsel %vm11130_vm7, %v5758_v40, %v5760_v48  ;;  %vm11134_vm7 = vcmask 744448  }
 0x6d1   : > { %9849 = vmatprep.subr.mxu1 %v10089_v0  ;;  %9847 = vmatmul.mubr.msk.f32.vlgmr.msra.gmra.mrb[64].mxu1 %vm2064_vm3, %v9510_v47  ;;  %vm11135_vm14 = vmmov %vm11134_vm7 }
 0x6d2   : > { %9850 = vmatpush3.msra.mxu1 %v5920_v49  ;;  %9851 = vmatprep.mubr.msk.f32.mxu1 %vm10090_vm0, %v10089_v0 }
 0x6d3   : > { %v5918_v52 = vpop.permute.xlu0 %5917  ;;  %9505 = vmatmul.mubr.msk.f32.vlgmr.msra.gmra.mrb[6].mxu0 %vm2064_vm3, %v9504_v37  ;;  %v6078_v53 = vpop.permute.xlu1 %6077  ;;  %9854 = vmatprep.subr.mxu1 %v10089_v0 }
 0x6d4   : > { %5610 = vmatpush1.msra.mxu0 %v5601_v51  ;;  %5673 = vmatprep.mubr.f32.mxu0 %v10089_v0  ;;  %v5922_v61 = vsel %vm11132_vm12, %v5918_v52, %v5920_v49  ;;  %vm11136_vm12 = vcmask 736256  }
 0x6d5   : > { %5769 = vmatprep.subr.mxu0 %v5762_v54  ;;  %9852 = vmatmul.mubr.msk.f32.vlgmr.msra.gmra.mrb[66].mxu1 %vm2064_vm3, %v9513_v50 }
 0x6d6   : > { %9856 = vmatprep.mubr.msk.f32.mxu1 %vm10090_vm0, %v10089_v0 }
 0x6d7   : > { %v5916_v55 = vpop.permute.xlu0 %5915  ;;  %v6076_v56 = vpop.permute.xlu1 %6075 }
 0x6d8   : > { %v5921_v2 = vsel %vm11133_vm13, %v5916_v55, %v5918_v52  ;;  %v6081_v5 = vsel %vm11135_vm14, %v6076_v56, %v6078_v53  ;;  %vm11137_vm13 = vmmov %vm11136_vm12  ;;  %v7853_v55 = vld [vmem:[%s11102_s10] sm:$0xff] }
 0x6db   : > { %v6080_v60 = vpop.permute.xlu0 %6079  ;;  %9508 = vmatmul.mubr.msk.f32.vlgmr.msra.gmra.mrb[6].mxu0 %vm2064_vm3, %v9507_v41  ;;  %v6240_v62 = vpop.permute.xlu1 %6239 }
 0x6dc   : > { %5770 = vmatpush1.msra.mxu0 %v5761_v59  ;;  %9855 = vmatpush3.msra.mxu1 %v6080_v60  ;;  %v6082_v3 = vsel %vm11134_vm7, %v6078_v53, %v6080_v60  ;;  %v9522_v59 = vld [vmem:[%s11101_s9 + $0x8] sm:$0xff]  ;;  %vm11138_vm7 = vcmask 883712  }
 0x6dd   : > { %5929 = vmatprep.subr.mxu0 %v5922_v61  ;;  %9857 = vmatmul.mubr.msk.f32.vlgmr.msra.gmra.mrb[68].mxu1 %vm2064_vm3, %v9516_v57  ;;  %vm11139_vm14 = vmmov %vm11138_vm7 }
 0x6de   : > { %9859 = vmatprep.subr.mxu1 %v10089_v0  ;;  %9861 = vmatprep.mubr.msk.f32.mxu1 %vm10090_vm0, %v10089_v0 }
 0x6df   : > { %9860 = vmatpush3.msra.mxu1 %v6240_v62  ;;  %5833 = vmatprep.mubr.f32.mxu0 %v10089_v0  ;;  %v6238_v4 = vpop.permute.xlu0 %6237 }
 0x6e0   : > { %9864 = vmatprep.subr.mxu1 %v10089_v0  ;;  %v6242_v6 = vsel %vm11136_vm12, %v6238_v4, %v6240_v62  ;;  %vm11140_vm12 = vcmask 752640  }
 0x6e1   : > { %9862 = vmatmul.mubr.msk.f32.vlgmr.msra.gmra.mrb[70].mxu1 %vm2064_vm3, %v9519_v1 }
 0x6e2   : > { %9866 = vmatprep.mubr.msk.f32.mxu1 %vm10090_vm0, %v10089_v0 }
 0x6e3   : > { %9511 = vmatmul.mubr.msk.f32.vlgmr.msra.gmra.mrb[6].mxu0 %vm2064_vm3, %v9510_v47  ;;  %v6236_v7 = vpop.permute.xlu0 %6235 }
 0x6e4   : > { %5930 = vmatpush1.msra.mxu0 %v5921_v2  ;;  %5993 = vmatprep.mubr.f32.mxu0 %v10089_v0  ;;  %v6241_v8 = vsel %vm11137_vm13, %v6236_v7, %v6238_v4  ;;  %vm11141_vm13 = vmmov %vm11140_vm12 }
 0x6e5   : > { %6089 = vmatprep.subr.mxu0 %v6082_v3  ;;  %v6428_v3 = vld [vmem:[%s11101_s9] sm:$0xff] }
 0x6eb   : > { %9514 = vmatmul.mubr.msk.f32.vlgmr.msra.gmra.mrb[6].mxu0 %vm2064_vm3, %v9513_v50 }
 0x6ec   : > { %6090 = vmatpush1.msra.mxu0 %v6081_v5  ;;  %6153 = vmatprep.mubr.f32.mxu0 %v10089_v0  ;;  %v6397_v35 = vpop.permute.xlu1 %6396 }
 0x6ed   : > { %6249 = vmatprep.subr.mxu0 %v6242_v6 }
 0x6f3   : > { %9517 = vmatmul.mubr.msk.f32.vlgmr.msra.gmra.mrb[6].mxu0 %vm2064_vm3, %v9516_v57 }
 0x6f4   : > { %6250 = vmatpush1.msra.mxu0 %v6241_v8  ;;  %6313 = vmatprep.mubr.f32.mxu0 %v10089_v0  ;;  %v9527_v8 = vld [vmem:[%s11101_s9 + $0x10] sm:$0xff] }
 0x6fb   : > { %9520 = vmatmul.mubr.msk.f32.vlgmr.msra.gmra.mrb[6].mxu0 %vm2064_vm3, %v9519_v1 }
 0x6fc   : > { %6512 = vmatprep.mubr.f32.mxu0 %v10089_v0 }
 0x78c   : > { %v5125_v9 = vpop.f32.mrb[54].mxu1 }
 0x78d   : > { %v9823_v10 = vpop.f32.mrb[55].mxu1 }
 0x791   : > { %v5269_v11 = vpop.f32.mrb[56].mxu1 }
 0x792   : > { %v5270_v12 = vadd.f32 %v5269_v11, %v5125_v9  ;;  %v9828_v13 = vpop.f32.mrb[57].mxu1 }
 0x795   : > { %v5426_v14 = vpop.f32.mrb[58].mxu1 }
 0x796   : > { %v5432_v15 = vadd.f32 %v5426_v14, %v5270_v12  ;;  %v9833_v16 = vpop.f32.mrb[59].mxu1  ;;  %v9530_v12 = vld [vmem:[%s11101_s9 + $0x18] sm:$0xff] }
 0x797   : > { %v9533_v16 = vld [vmem:[%s11101_s9 + $0x20] sm:$0xff] }
 0x799   : > { %v5586_v17 = vpop.f32.mrb[60].mxu1 }
 0x79a   : > { %v5592_v18 = vadd.f32 %v5586_v17, %v5432_v15  ;;  %v9838_v19 = vpop.f32.mrb[61].mxu1 }
 0x79d   : > { %v5746_v20 = vpop.f32.mrb[62].mxu1 }
 0x79e   : > { %v5752_v21 = vadd.f32 %v5746_v20, %v5592_v18  ;;  %v9843_v22 = vpop.f32.mrb[63].mxu1 }
 0x7a4   : > { %v5906_v23 = vpop.f32.mrb[64].mxu1 }
 0x7a5   : > { %v5912_v24 = vadd.f32 %v5906_v23, %v5752_v21  ;;  %v9848_v25 = vpop.f32.mrb[65].mxu1  ;;  %v9536_v21 = vld [vmem:[%s11101_s9 + $0x28] sm:$0xff] }
 0x7a8   : > { %v6066_v26 = vpop.f32.mrb[66].mxu1 }
 0x7a9   : > { %v6072_v27 = vadd.f32 %v6066_v26, %v5912_v24  ;;  %v9853_v28 = vpop.f32.mrb[67].mxu1  ;;  %v9539_v24 = vld [vmem:[%s11101_s9 + $0x30] sm:$0xff] }
 0x7b0   : > { %v6226_v29 = vpop.f32.mrb[68].mxu1 }
 0x7b1   : > { %v6232_v30 = vadd.f32 %v6226_v29, %v6072_v27  ;;  %v9858_v31 = vpop.f32.mrb[69].mxu1 }
 0x7b2   : > { %v9542_v31 = vld [vmem:[%s11101_s9 + $0x38] sm:$0xff] }
 0x7b4   : > { %v6386_v32 = vpop.f32.mrb[70].mxu1 }
 0x7b5   : > { %v6392_v33 = vadd.f32 %v6386_v32, %v6232_v30  ;;  %v9863_v34 = vpop.f32.mrb[71].mxu1 }
 0x7b7   : > { %v6401_v37 = vadd.f32 %v6397_v35, %v6392_v33 }
 0x7b9   : > { %v6404_v44 = vmax.f32 %v6401_v37, 0.0 }
 0x7bb   : > { %v6407_v47 = vsel %vm10382_vm15, %v6404_v44, 0.0 }
 0x7ce   : > { %v6315_v36 = vpop.f32.mrb[6].mxu0 }
 0x7cf   : > { %v6399_v38 = vadd.f32 %v6397_v35, %v6315_v36  ;;  %v6317_v39 = vpop.f32.mrb[7].mxu0  ;;  %v9545_v36 = vld [vmem:[%s11101_s9 + $0x40] sm:$0xff] }
 0x7d0   : > { %v6400_v40 = vadd.f32 %v6397_v35, %v6317_v39 }
 0x7d1   : > { %v6402_v41 = vmax.f32 %v6399_v38, 0.0 }
 0x7d2   : > { %v6403_v43 = vmax.f32 %v6400_v40, 0.0 }
 0x7d3   : > { %v6405_v45 = vsel %vm10393_vm8, %v6402_v41, 0.0 }
 0x7d4   : > { %v6406_v46 = vsel %vm10400_vm1, %v6403_v43, 0.0  ;;  %6411 = vrot.lane.b32.xlu0 %v6405_v45, %s10100_s30 }
 0x7d5   : > { %6413 = vrot.lane.b32.xlu1 %v6406_v46, %s10100_s30 }
 0x7d8   : > { %6415 = vrot.lane.b32.xlu0 %v6407_v47, %s10100_s30 }
 0x846   : > { %v6412_v48 = vpop.permute.xlu0 %6411 }
 0x847   : > { %6422 = vst.msk [vmem:[#allocation3] sm:$0xff] %vm2039_vm10, %v6412_v48  ;;  %v6414_v49 = vpop.permute.xlu1 %6413 }
 0x848   : > { %v6417_v50 = vsel %vm441_vm11, %v6412_v48, %v6414_v49 }
 0x849   : > { %6436 = vrot.lane.b32.xlu1 %v6417_v50, %s10091_s14 }
 0x84a   : > { %v6416_v51 = vpop.permute.xlu0 %6415 }
 0x84b   : > { %v6418_v52 = vsel %vm441_vm11, %v6414_v49, %v6416_v51 }
 0x84c   : > { %6424 = vst.msk [vmem:[#allocation3 + $0x10] sm:$0xff] %vm2042_vm9, %v6418_v52 }
 0x84e   : > { %v6425_v53 = vld [vmem:[#allocation3] sm:$0xff] }
 0x84f   : > { %6434 = vrot.lane.b32.xlu1 %v6425_v53, %s10091_s14 }
 0x853   : > { %v6427_v54 = vld [vmem:[#allocation3 + $0x10] sm:$0xff] }
 0x854   : > { %6438 = vrot.lane.b32.xlu0 %v6427_v54, %s10091_s14  ;;  %6739 = vrot.lane.b32.xlu1 %v6427_v54, %s10092_s15 }
 0x858   : > { %6737 = vrot.lane.b32.xlu0 %v6417_v50, %s10092_s15  ;;  %6897 = vrot.lane.b32.xlu1 %v6417_v50, %s10093_s16 }
 0x85c   : > { %6735 = vrot.lane.b32.xlu0 %v6425_v53, %s10092_s15  ;;  %6895 = vrot.lane.b32.xlu1 %v6425_v53, %s10093_s16 }
 0x860   : > { %6899 = vrot.lane.b32.xlu0 %v6427_v54, %s10093_s16  ;;  %7059 = vrot.lane.b32.xlu1 %v6427_v54, %s10094_s17 }
 0x864   : > { %7057 = vrot.lane.b32.xlu0 %v6417_v50, %s10094_s17  ;;  %7217 = vrot.lane.b32.xlu1 %v6417_v50, %s10095_s18 }
 0x868   : > { %7055 = vrot.lane.b32.xlu0 %v6425_v53, %s10094_s17  ;;  %7215 = vrot.lane.b32.xlu1 %v6425_v53, %s10095_s18 }
 0x86c   : > { %7219 = vrot.lane.b32.xlu0 %v6427_v54, %s10095_s18  ;;  %7379 = vrot.lane.b32.xlu1 %v6427_v54, %s10096_s19 }
 0x870   : > { %7377 = vrot.lane.b32.xlu0 %v6417_v50, %s10096_s19  ;;  %7537 = vrot.lane.b32.xlu1 %v6417_v50, %s10097_s20 }
 0x874   : > { %7375 = vrot.lane.b32.xlu0 %v6425_v53, %s10096_s19  ;;  %7535 = vrot.lane.b32.xlu1 %v6425_v53, %s10097_s20 }
 0x878   : > { %7539 = vrot.lane.b32.xlu0 %v6427_v54, %s10097_s20  ;;  %7699 = vrot.lane.b32.xlu1 %v6427_v54, %s10098_s21 }
 0x87c   : > { %7697 = vrot.lane.b32.xlu0 %v6417_v50, %s10098_s21  ;;  %7856 = vperm.xlu1 %10079, %v7853_v55  }
 0x880   : > { %7695 = vrot.lane.b32.xlu0 %v6425_v53, %s10098_s21 }
 0x8bb   : > { %v6437_v56 = vpop.permute.xlu1 %6436 }
 0x8c1   : > { %v6435_v57 = vpop.permute.xlu1 %6434 }
 0x8c2   : > { %v6440_v1 = vsel %vm516_vm2, %v6435_v57, %v6437_v56 }
 0x8c6   : > { %v6439_v60 = vpop.permute.xlu0 %6438  ;;  %v6740_v61 = vpop.permute.xlu1 %6739 }
 0x8c7   : > { %9865 = vmatpush3.msra.mxu1 %v6439_v60  ;;  %v6441_v62 = vsel %vm516_vm2, %v6437_v56, %v6439_v60 }
 0x8c8   : > { %6448 = vmatprep.subr.mxu0 %v6441_v62  ;;  %9867 = vmatmul.mubr.msk.f32.vlgmr.msra.gmra.mrb[72].mxu1 %vm2064_vm3, %v9522_v59 }
 0x8c9   : > { %9869 = vmatprep.subr.mxu1 %v10089_v0  ;;  %6449 = vmatpush1.msra.mxu0 %v6440_v1 }
 0x8ca   : > { %9870 = vmatpush3.msra.mxu1 %v6427_v54  ;;  %9523 = vmatmul.mubr.msk.f32.vlgmr.msra.gmra.mrb[8].mxu0 %vm2064_vm3, %v9522_v59  ;;  %v6738_v2 = vpop.permute.xlu0 %6737  ;;  %v6898_v4 = vpop.permute.xlu1 %6897 }
 0x8cb   : > { %6592 = vmatprep.subr.mxu0 %v6417_v50  ;;  %9871 = vmatprep.mubr.msk.f32.mxu1 %vm10090_vm0, %v10089_v0  ;;  %v6742_v5 = vsel %vm834_vm4, %v6738_v2, %v6740_v61 }
 0x8cc   : > { %6593 = vmatpush1.msra.mxu0 %v6425_v53  ;;  %9874 = vmatprep.subr.mxu1 %v10089_v0 }
 0x8cd   : > { %9872 = vmatmul.mubr.msk.f32.vlgmr.msra.gmra.mrb[74].mxu1 %vm2064_vm3, %v6428_v3  ;;  %6749 = vmatprep.subr.mxu0 %v6742_v5 }
 0x8ce   : > { %9875 = vmatpush3.msra.mxu1 %v6740_v61  ;;  %v6736_v6 = vpop.permute.xlu0 %6735  ;;  %6656 = vmatprep.mubr.f32.mxu0 %v10089_v0  ;;  %v6896_v7 = vpop.permute.xlu1 %6895 }
 0x8cf   : > { %9876 = vmatprep.mubr.msk.f32.mxu1 %vm10090_vm0, %v10089_v0  ;;  %9879 = vmatprep.subr.mxu1 %v10089_v0  ;;  %v6741_v9 = vsel %vm834_vm4, %v6736_v6, %v6738_v2  ;;  %v6901_v17 = vsel %vm1003_vm5, %v6896_v7, %v6898_v4 }
 0x8d1   : > { %9877 = vmatmul.mubr.msk.f32.vlgmr.msra.gmra.mrb[76].mxu1 %vm2064_vm3, %v9527_v8 }
 0x8d2   : > { %9525 = vmatmul.mubr.msk.f32.vlgmr.msra.gmra.mrb[8].mxu0 %vm2064_vm3, %v6428_v3  ;;  %v6900_v10 = vpop.permute.xlu0 %6899  ;;  %v7060_v11 = vpop.permute.xlu1 %7059  ;;  %9881 = vmatprep.mubr.msk.f32.mxu1 %vm10090_vm0, %v10089_v0 }
 0x8d3   : > { %6750 = vmatpush1.msra.mxu0 %v6741_v9  ;;  %9880 = vmatpush3.msra.mxu1 %v6900_v10  ;;  %v6902_v13 = vsel %vm1003_vm5, %v6898_v4, %v6900_v10 }
 0x8d4   : > { %6909 = vmatprep.subr.mxu0 %v6902_v13  ;;  %9884 = vmatprep.subr.mxu1 %v10089_v0 }
 0x8d5   : > { %9882 = vmatmul.mubr.msk.f32.vlgmr.msra.gmra.mrb[78].mxu1 %vm2064_vm3, %v9530_v12  ;;  %6813 = vmatprep.mubr.f32.mxu0 %v10089_v0 }
 0x8d6   : > { %v7058_v14 = vpop.permute.xlu0 %7057  ;;  %9885 = vmatpush3.msra.mxu1 %v7060_v11  ;;  %v7218_v15 = vpop.permute.xlu1 %7217  ;;  %9886 = vmatprep.mubr.msk.f32.mxu1 %vm10090_vm0, %v10089_v0 }
 0x8d7   : > { %9889 = vmatprep.subr.mxu1 %v10089_v0  ;;  %v7062_v20 = vsel %vm1172_vm6, %v7058_v14, %v7060_v11 }
 0x8d9   : > { %9887 = vmatmul.mubr.msk.f32.vlgmr.msra.gmra.mrb[80].mxu1 %vm2064_vm3, %v9533_v16 }
 0x8da   : > { %9528 = vmatmul.mubr.msk.f32.vlgmr.msra.gmra.mrb[8].mxu0 %vm2064_vm3, %v9527_v8  ;;  %v7056_v18 = vpop.permute.xlu0 %7055  ;;  %v7216_v19 = vpop.permute.xlu1 %7215  ;;  %9891 = vmatprep.mubr.msk.f32.mxu1 %vm10090_vm0, %v10089_v0 }
 0x8db   : > { %6910 = vmatpush1.msra.mxu0 %v6901_v17  ;;  %6973 = vmatprep.mubr.f32.mxu0 %v10089_v0  ;;  %v7061_v25 = vsel %vm1172_vm6, %v7056_v18, %v7058_v14  ;;  %v7221_v32 = vsel %vm11139_vm14, %v7216_v19, %v7218_v15 }
 0x8dc   : > { %7069 = vmatprep.subr.mxu0 %v7062_v20 }
 0x8de   : > { %v7220_v22 = vpop.permute.xlu0 %7219  ;;  %v7380_v23 = vpop.permute.xlu1 %7379 }
 0x8df   : > { %9890 = vmatpush3.msra.mxu1 %v7220_v22  ;;  %v7222_v28 = vsel %vm11138_vm7, %v7218_v15, %v7220_v22  ;;  %vm11142_vm7 = vcmask 744448  }
 0x8e0   : > { %9894 = vmatprep.subr.mxu1 %v10089_v0  ;;  %9892 = vmatmul.mubr.msk.f32.vlgmr.msra.gmra.mrb[82].mxu1 %vm2064_vm3, %v9536_v21  ;;  %vm11143_vm14 = vmmov %vm11142_vm7 }
 0x8e1   : > { %9895 = vmatpush3.msra.mxu1 %v7380_v23  ;;  %9896 = vmatprep.mubr.msk.f32.mxu1 %vm10090_vm0, %v10089_v0 }
 0x8e2   : > { %9531 = vmatmul.mubr.msk.f32.vlgmr.msra.gmra.mrb[8].mxu0 %vm2064_vm3, %v9530_v12  ;;  %v7378_v26 = vpop.permute.xlu0 %7377  ;;  %v7538_v27 = vpop.permute.xlu1 %7537  ;;  %9899 = vmatprep.subr.mxu1 %v10089_v0 }
 0x8e3   : > { %7070 = vmatpush1.msra.mxu0 %v7061_v25  ;;  %7133 = vmatprep.mubr.f32.mxu0 %v10089_v0  ;;  %v7382_v34 = vsel %vm11140_vm12, %v7378_v26, %v7380_v23  ;;  %vm11144_vm12 = vcmask 736256  }
 0x8e4   : > { %7229 = vmatprep.subr.mxu0 %v7222_v28  ;;  %9897 = vmatmul.mubr.msk.f32.vlgmr.msra.gmra.mrb[84].mxu1 %vm2064_vm3, %v9539_v24 }
 0x8e5   : > { %9901 = vmatprep.mubr.msk.f32.mxu1 %vm10090_vm0, %v10089_v0 }
 0x8e6   : > { %v7376_v29 = vpop.permute.xlu0 %7375  ;;  %v7536_v30 = vpop.permute.xlu1 %7535 }
 0x8e7   : > { %v7381_v37 = vsel %vm11141_vm13, %v7376_v29, %v7378_v26  ;;  %v7541_v40 = vsel %vm11143_vm14, %v7536_v30, %v7538_v27  ;;  %vm11145_vm13 = vmmov %vm11144_vm12  ;;  %v9313_v29 = vld [vmem:[%s11104_s12] sm:$0xff] }
 0x8ea   : > { %9534 = vmatmul.mubr.msk.f32.vlgmr.msra.gmra.mrb[8].mxu0 %vm2064_vm3, %v9533_v16  ;;  %v7540_v33 = vpop.permute.xlu0 %7539  ;;  %v7700_v35 = vpop.permute.xlu1 %7699 }
 0x8eb   : > { %7230 = vmatpush1.msra.mxu0 %v7221_v32  ;;  %9900 = vmatpush3.msra.mxu1 %v7540_v33  ;;  %v7542_v38 = vsel %vm11142_vm7, %v7538_v27, %v7540_v33  ;;  %v9548_v32 = vld [vmem:[%s11103_s11 + $0x8] sm:$0xff] }
 0x8ec   : > { %7389 = vmatprep.subr.mxu0 %v7382_v34  ;;  %9902 = vmatmul.mubr.msk.f32.vlgmr.msra.gmra.mrb[86].mxu1 %vm2064_vm3, %v9542_v31 }
 0x8ed   : > { %9904 = vmatprep.subr.mxu1 %v10089_v0  ;;  %9906 = vmatprep.mubr.msk.f32.mxu1 %vm10090_vm0, %v10089_v0 }
 0x8ee   : > { %9905 = vmatpush3.msra.mxu1 %v7700_v35  ;;  %7293 = vmatprep.mubr.f32.mxu0 %v10089_v0  ;;  %v7698_v39 = vpop.permute.xlu0 %7697 }
 0x8ef   : > { %9909 = vmatprep.subr.mxu1 %v10089_v0  ;;  %v7702_v41 = vsel %vm11144_vm12, %v7698_v39, %v7700_v35 }
 0x8f0   : > { %9907 = vmatmul.mubr.msk.f32.vlgmr.msra.gmra.mrb[88].mxu1 %vm2064_vm3, %v9545_v36 }
 0x8f1   : > { %9911 = vmatprep.mubr.msk.f32.mxu1 %vm10090_vm0, %v10089_v0 }
 0x8f2   : > { %9537 = vmatmul.mubr.msk.f32.vlgmr.msra.gmra.mrb[8].mxu0 %vm2064_vm3, %v9536_v21  ;;  %v7696_v43 = vpop.permute.xlu0 %7695 }
 0x8f3   : > { %7390 = vmatpush1.msra.mxu0 %v7381_v37  ;;  %7453 = vmatprep.mubr.f32.mxu0 %v10089_v0  ;;  %v7701_v44 = vsel %vm11145_vm13, %v7696_v43, %v7698_v39  ;;  %v9553_v43 = vld [vmem:[%s11103_s11 + $0x10] sm:$0xff] }
 0x8f4   : > { %7549 = vmatprep.subr.mxu0 %v7542_v38  ;;  %v7888_v38 = vld [vmem:[%s11103_s11] sm:$0xff] }
 0x8fa   : > { %9540 = vmatmul.mubr.msk.f32.vlgmr.msra.gmra.mrb[8].mxu0 %vm2064_vm3, %v9539_v24 }
 0x8fb   : > { %7550 = vmatpush1.msra.mxu0 %v7541_v40  ;;  %7613 = vmatprep.mubr.f32.mxu0 %v10089_v0  ;;  %v7857_v10 = vpop.permute.xlu1 %7856 }
 0x8fc   : > { %7709 = vmatprep.subr.mxu0 %v7702_v41 }
 0x902   : > { %9543 = vmatmul.mubr.msk.f32.vlgmr.msra.gmra.mrb[8].mxu0 %vm2064_vm3, %v9542_v31 }
 0x903   : > { %7710 = vmatpush1.msra.mxu0 %v7701_v44  ;;  %7773 = vmatprep.mubr.f32.mxu0 %v10089_v0 }
 0x90a   : > { %9546 = vmatmul.mubr.msk.f32.vlgmr.msra.gmra.mrb[8].mxu0 %vm2064_vm3, %v9545_v36 }
 0x90b   : > { %7972 = vmatprep.mubr.f32.mxu0 %v10089_v0 }
 0x99b   : > { %v6585_v45 = vpop.f32.mrb[72].mxu1 }
 0x99c   : > { %v9868_v46 = vpop.f32.mrb[73].mxu1 }
 0x9a0   : > { %v6729_v47 = vpop.f32.mrb[74].mxu1 }
 0x9a1   : > { %v6730_v48 = vadd.f32 %v6729_v47, %v6585_v45  ;;  %v9873_v49 = vpop.f32.mrb[75].mxu1 }
 0x9a4   : > { %v6886_v50 = vpop.f32.mrb[76].mxu1 }
 0x9a5   : > { %v6892_v51 = vadd.f32 %v6886_v50, %v6730_v48  ;;  %v9878_v52 = vpop.f32.mrb[77].mxu1  ;;  %v9556_v48 = vld [vmem:[%s11103_s11 + $0x18] sm:$0xff] }
 0x9a6   : > { %v9559_v52 = vld [vmem:[%s11103_s11 + $0x20] sm:$0xff] }
 0x9a8   : > { %v7046_v53 = vpop.f32.mrb[78].mxu1 }
 0x9a9   : > { %v7052_v54 = vadd.f32 %v7046_v53, %v6892_v51  ;;  %v9883_v55 = vpop.f32.mrb[79].mxu1 }
 0x9ac   : > { %v7206_v56 = vpop.f32.mrb[80].mxu1 }
 0x9ad   : > { %v7212_v57 = vadd.f32 %v7206_v56, %v7052_v54  ;;  %v9888_v59 = vpop.f32.mrb[81].mxu1 }
 0x9b3   : > { %v7366_v60 = vpop.f32.mrb[82].mxu1 }
 0x9b4   : > { %v7372_v61 = vadd.f32 %v7366_v60, %v7212_v57  ;;  %v9893_v62 = vpop.f32.mrb[83].mxu1  ;;  %v9562_v57 = vld [vmem:[%s11103_s11 + $0x28] sm:$0xff] }
 0x9b7   : > { %v7526_v1 = vpop.f32.mrb[84].mxu1 }
 0x9b8   : > { %v7532_v2 = vadd.f32 %v7526_v1, %v7372_v61  ;;  %v9898_v3 = vpop.f32.mrb[85].mxu1  ;;  %v9565_v61 = vld [vmem:[%s11103_s11 + $0x30] sm:$0xff] }
 0x9bf   : > { %v7686_v4 = vpop.f32.mrb[86].mxu1 }
 0x9c0   : > { %v7692_v5 = vadd.f32 %v7686_v4, %v7532_v2  ;;  %v9903_v6 = vpop.f32.mrb[87].mxu1 }
 0x9c1   : > { %v9568_v6 = vld [vmem:[%s11103_s11 + $0x38] sm:$0xff] }
 0x9c3   : > { %v7846_v7 = vpop.f32.mrb[88].mxu1 }
 0x9c4   : > { %v7852_v8 = vadd.f32 %v7846_v7, %v7692_v5  ;;  %v9908_v9 = vpop.f32.mrb[89].mxu1 }
 0x9c6   : > { %v7861_v12 = vadd.f32 %v7857_v10, %v7852_v8 }
 0x9c8   : > { %v7864_v18 = vmax.f32 %v7861_v12, 0.0 }
 0x9ca   : > { %v7867_v21 = vsel %vm10382_vm15, %v7864_v18, 0.0 }
 0x9dd   : > { %v7775_v11 = vpop.f32.mrb[8].mxu0 }
 0x9de   : > { %v7859_v13 = vadd.f32 %v7857_v10, %v7775_v11  ;;  %v7777_v14 = vpop.f32.mrb[9].mxu0  ;;  %v9571_v11 = vld [vmem:[%s11103_s11 + $0x40] sm:$0xff] }
 0x9df   : > { %v7860_v15 = vadd.f32 %v7857_v10, %v7777_v14 }
 0x9e0   : > { %v7862_v16 = vmax.f32 %v7859_v13, 0.0 }
 0x9e1   : > { %v7863_v17 = vmax.f32 %v7860_v15, 0.0 }
 0x9e2   : > { %v7865_v19 = vsel %vm10393_vm8, %v7862_v16, 0.0 }
 0x9e3   : > { %v7866_v20 = vsel %vm10400_vm1, %v7863_v17, 0.0  ;;  %7871 = vrot.lane.b32.xlu0 %v7865_v19, %s10100_s30 }
 0x9e4   : > { %7873 = vrot.lane.b32.xlu1 %v7866_v20, %s10100_s30 }
 0x9e7   : > { %7875 = vrot.lane.b32.xlu0 %v7867_v21, %s10100_s30 }
 0xa55   : > { %v7872_v22 = vpop.permute.xlu0 %7871 }
 0xa56   : > { %7882 = vst.msk [vmem:[#allocation2] sm:$0xff] %vm2039_vm10, %v7872_v22  ;;  %v7874_v23 = vpop.permute.xlu1 %7873  ;;  %vm11152_vm10 = vmmov %vm11144_vm12 }
 0xa57   : > { %v7877_v24 = vsel %vm441_vm11, %v7872_v22, %v7874_v23 }
 0xa58   : > { %7896 = vrot.lane.b32.xlu1 %v7877_v24, %s10091_s14 }
 0xa59   : > { %v7876_v25 = vpop.permute.xlu0 %7875 }
 0xa5a   : > { %v7878_v26 = vsel %vm441_vm11, %v7874_v23, %v7876_v25  ;;  %vm11150_vm11 = vmmov %vm11142_vm7 }
 0xa5b   : > { %7884 = vst.msk [vmem:[#allocation2 + $0x10] sm:$0xff] %vm2042_vm9, %v7878_v26  ;;  %vm11153_vm9 = vmmov %vm11152_vm10 }
 0xa5d   : > { %v7885_v27 = vld [vmem:[#allocation2] sm:$0xff] }
 0xa5e   : > { %7894 = vrot.lane.b32.xlu1 %v7885_v27, %s10091_s14 }
 0xa62   : > { %v7887_v28 = vld [vmem:[#allocation2 + $0x10] sm:$0xff] }
 0xa63   : > { %7898 = vrot.lane.b32.xlu0 %v7887_v28, %s10091_s14  ;;  %8199 = vrot.lane.b32.xlu1 %v7887_v28, %s10092_s15 }
 0xa67   : > { %8197 = vrot.lane.b32.xlu0 %v7877_v24, %s10092_s15  ;;  %8357 = vrot.lane.b32.xlu1 %v7877_v24, %s10093_s16 }
 0xa6b   : > { %8195 = vrot.lane.b32.xlu0 %v7885_v27, %s10092_s15  ;;  %8355 = vrot.lane.b32.xlu1 %v7885_v27, %s10093_s16 }
 0xa6f   : > { %8359 = vrot.lane.b32.xlu0 %v7887_v28, %s10093_s16  ;;  %8519 = vrot.lane.b32.xlu1 %v7887_v28, %s10094_s17 }
 0xa73   : > { %8517 = vrot.lane.b32.xlu0 %v7877_v24, %s10094_s17  ;;  %8677 = vrot.lane.b32.xlu1 %v7877_v24, %s10095_s18 }
 0xa77   : > { %8515 = vrot.lane.b32.xlu0 %v7885_v27, %s10094_s17  ;;  %8675 = vrot.lane.b32.xlu1 %v7885_v27, %s10095_s18 }
 0xa7b   : > { %8679 = vrot.lane.b32.xlu0 %v7887_v28, %s10095_s18  ;;  %8839 = vrot.lane.b32.xlu1 %v7887_v28, %s10096_s19 }
 0xa7f   : > { %8837 = vrot.lane.b32.xlu0 %v7877_v24, %s10096_s19  ;;  %8997 = vrot.lane.b32.xlu1 %v7877_v24, %s10097_s20 }
 0xa83   : > { %8835 = vrot.lane.b32.xlu0 %v7885_v27, %s10096_s19  ;;  %8995 = vrot.lane.b32.xlu1 %v7885_v27, %s10097_s20  ;;  %s10051_s19 = smul.u32 24, %s11155_s26 }
 0xa85   : > { %s440_s30 = scalar_lea.vmem %s11105_s13, %s10051_s19 }
 0xa87   : > { %8999 = vrot.lane.b32.xlu0 %v7887_v28, %s10097_s20  ;;  %9159 = vrot.lane.b32.xlu1 %v7887_v28, %s10098_s21 }
 0xa8b   : > { %9157 = vrot.lane.b32.xlu0 %v7877_v24, %s10098_s21  ;;  %9316 = vperm.xlu1 %10079, %v9313_v29  }
 0xa8f   : > { %9155 = vrot.lane.b32.xlu0 %v7885_v27, %s10098_s21 }
 0xaca   : > { %v7897_v30 = vpop.permute.xlu1 %7896 }
 0xad0   : > { %v7895_v31 = vpop.permute.xlu1 %7894 }
 0xad1   : > { %v7900_v36 = vsel %vm516_vm2, %v7895_v31, %v7897_v30 }
 0xad5   : > { %v7899_v33 = vpop.permute.xlu0 %7898  ;;  %v8200_v34 = vpop.permute.xlu1 %8199 }
 0xad6   : > { %9910 = vmatpush3.msra.mxu1 %v7899_v33  ;;  %v7901_v35 = vsel %vm516_vm2, %v7897_v30, %v7899_v33  ;;  %vm11146_vm2 = vcmask 883712  }
 0xad7   : > { %7908 = vmatprep.subr.mxu0 %v7901_v35  ;;  %9912 = vmatmul.mubr.msk.f32.vlgmr.msra.gmra.mrb[90].mxu1 %vm2064_vm3, %v9548_v32 }
 0xad8   : > { %9914 = vmatprep.subr.mxu1 %v10089_v0  ;;  %7909 = vmatpush1.msra.mxu0 %v7900_v36 }
 0xad9   : > { %9915 = vmatpush3.msra.mxu1 %v7887_v28  ;;  %v8198_v37 = vpop.permute.xlu0 %8197  ;;  %9549 = vmatmul.mubr.msk.f32.vlgmr.msra.gmra.mrb[10].mxu0 %vm2064_vm3, %v9548_v32  ;;  %v8358_v39 = vpop.permute.xlu1 %8357 }
 0xada   : > { %8052 = vmatprep.subr.mxu0 %v7877_v24  ;;  %9916 = vmatprep.mubr.msk.f32.mxu1 %vm10090_vm0, %v10089_v0  ;;  %v8202_v40 = vsel %vm834_vm4, %v8198_v37, %v8200_v34 }
 0xadb   : > { %8053 = vmatpush1.msra.mxu0 %v7885_v27  ;;  %9919 = vmatprep.subr.mxu1 %v10089_v0 }
 0xadc   : > { %9917 = vmatmul.mubr.msk.f32.vlgmr.msra.gmra.mrb[92].mxu1 %vm2064_vm3, %v7888_v38  ;;  %8209 = vmatprep.subr.mxu0 %v8202_v40 }
 0xadd   : > { %9920 = vmatpush3.msra.mxu1 %v8200_v34  ;;  %v8196_v41 = vpop.permute.xlu0 %8195  ;;  %8116 = vmatprep.mubr.f32.mxu0 %v10089_v0  ;;  %v8356_v44 = vpop.permute.xlu1 %8355 }
 0xade   : > { %9921 = vmatprep.mubr.msk.f32.mxu1 %vm10090_vm0, %v10089_v0  ;;  %9924 = vmatprep.subr.mxu1 %v10089_v0  ;;  %v8201_v45 = vsel %vm834_vm4, %v8196_v41, %v8198_v37  ;;  %v8361_v53 = vsel %vm1003_vm5, %v8356_v44, %v8358_v39  ;;  %vm11147_vm4 = vmmov %vm11146_vm2 }
 0xae0   : > { %9922 = vmatmul.mubr.msk.f32.vlgmr.msra.gmra.mrb[94].mxu1 %vm2064_vm3, %v9553_v43 }
 0xae1   : > { %v8360_v46 = vpop.permute.xlu0 %8359  ;;  %9551 = vmatmul.mubr.msk.f32.vlgmr.msra.gmra.mrb[10].mxu0 %vm2064_vm3, %v7888_v38  ;;  %9926 = vmatprep.mubr.msk.f32.mxu1 %vm10090_vm0, %v10089_v0  ;;  %v8520_v47 = vpop.permute.xlu1 %8519 }
 0xae2   : > { %8210 = vmatpush1.msra.mxu0 %v8201_v45  ;;  %9925 = vmatpush3.msra.mxu1 %v8360_v46  ;;  %v8362_v49 = vsel %vm1003_vm5, %v8358_v39, %v8360_v46  ;;  %vm11148_vm5 = vcmask 752640  }
 0xae3   : > { %8369 = vmatprep.subr.mxu0 %v8362_v49  ;;  %9929 = vmatprep.subr.mxu1 %v10089_v0 }
 0xae4   : > { %9927 = vmatmul.mubr.msk.f32.vlgmr.msra.gmra.mrb[96].mxu1 %vm2064_vm3, %v9556_v48  ;;  %8273 = vmatprep.mubr.f32.mxu0 %v10089_v0 }
 0xae5   : > { %v8518_v50 = vpop.permute.xlu0 %8517  ;;  %9930 = vmatpush3.msra.mxu1 %v8520_v47  ;;  %v8678_v51 = vpop.permute.xlu1 %8677  ;;  %9931 = vmatprep.mubr.msk.f32.mxu1 %vm10090_vm0, %v10089_v0 }
 0xae6   : > { %9934 = vmatprep.subr.mxu1 %v10089_v0  ;;  %v8522_v56 = vsel %vm1172_vm6, %v8518_v50, %v8520_v47 }
 0xae8   : > { %9932 = vmatmul.mubr.msk.f32.vlgmr.msra.gmra.mrb[98].mxu1 %vm2064_vm3, %v9559_v52 }
 0xae9   : > { %v8516_v54 = vpop.permute.xlu0 %8515  ;;  %9554 = vmatmul.mubr.msk.f32.vlgmr.msra.gmra.mrb[10].mxu0 %vm2064_vm3, %v9553_v43  ;;  %v8676_v55 = vpop.permute.xlu1 %8675  ;;  %9936 = vmatprep.mubr.msk.f32.mxu1 %vm10090_vm0, %v10089_v0 }
 0xaea   : > { %8370 = vmatpush1.msra.mxu0 %v8361_v53  ;;  %8433 = vmatprep.mubr.f32.mxu0 %v10089_v0  ;;  %v8521_v62 = vsel %vm1172_vm6, %v8516_v54, %v8518_v50  ;;  %v8681_v7 = vsel %vm11147_vm4, %v8676_v55, %v8678_v51  ;;  %vm11149_vm6 = vmmov %vm11148_vm5 }
 0xaeb   : > { %8529 = vmatprep.subr.mxu0 %v8522_v56 }
 0xaed   : > { %v8680_v59 = vpop.permute.xlu0 %8679  ;;  %v8840_v60 = vpop.permute.xlu1 %8839 }
 0xaee   : > { %9935 = vmatpush3.msra.mxu1 %v8680_v59  ;;  %v8682_v3 = vsel %vm11146_vm2, %v8678_v51, %v8680_v59 }
 0xaef   : > { %9939 = vmatprep.subr.mxu1 %v10089_v0  ;;  %9937 = vmatmul.mubr.msk.f32.vlgmr.msra.gmra.mrb[100].mxu1 %vm2064_vm3, %v9562_v57 }
 0xaf0   : > { %9940 = vmatpush3.msra.mxu1 %v8840_v60  ;;  %9941 = vmatprep.mubr.msk.f32.mxu1 %vm10090_vm0, %v10089_v0 }
 0xaf1   : > { %v8838_v1 = vpop.permute.xlu0 %8837  ;;  %9557 = vmatmul.mubr.msk.f32.vlgmr.msra.gmra.mrb[10].mxu0 %vm2064_vm3, %v9556_v48  ;;  %v8998_v2 = vpop.permute.xlu1 %8997  ;;  %9944 = vmatprep.subr.mxu1 %v10089_v0 }
 0xaf2   : > { %8530 = vmatpush1.msra.mxu0 %v8521_v62  ;;  %8593 = vmatprep.mubr.f32.mxu0 %v10089_v0  ;;  %v8842_v9 = vsel %vm11148_vm5, %v8838_v1, %v8840_v60 }
 0xaf3   : > { %8689 = vmatprep.subr.mxu0 %v8682_v3  ;;  %9942 = vmatmul.mubr.msk.f32.vlgmr.msra.gmra.mrb[102].mxu1 %vm2064_vm3, %v9565_v61 }
 0xaf4   : > { %9946 = vmatprep.mubr.msk.f32.mxu1 %vm10090_vm0, %v10089_v0 }
 0xaf5   : > { %v8836_v4 = vpop.permute.xlu0 %8835  ;;  %v8996_v5 = vpop.permute.xlu1 %8995 }
 0xaf6   : > { %v8841_v12 = vsel %vm11149_vm6, %v8836_v4, %v8838_v1 }
 0xaf9   : > { %v9000_v8 = vpop.permute.xlu0 %8999  ;;  %9560 = vmatmul.mubr.msk.f32.vlgmr.msra.gmra.mrb[10].mxu0 %vm2064_vm3, %v9559_v52  ;;  %v9160_v10 = vpop.permute.xlu1 %9159 }
 0xafa   : > { %8690 = vmatpush1.msra.mxu0 %v8681_v7  ;;  %9945 = vmatpush3.msra.mxu1 %v9000_v8  ;;  %v9002_v13 = vsel %vm11150_vm11, %v8998_v2, %v9000_v8 }
 0xafb   : > { %8849 = vmatprep.subr.mxu0 %v8842_v9  ;;  %9947 = vmatmul.mubr.msk.f32.vlgmr.msra.gmra.mrb[104].mxu1 %vm2064_vm3, %v9568_v6 }
 0xafc   : > { %9949 = vmatprep.subr.mxu1 %v10089_v0  ;;  %9951 = vmatprep.mubr.msk.f32.mxu1 %vm10090_vm0, %v10089_v0  ;;  %vm11151_vm0 = vmmov %vm11142_vm7 }
 0xafd   : > { %9950 = vmatpush3.msra.mxu1 %v9160_v10  ;;  %8753 = vmatprep.mubr.f32.mxu0 %v10089_v0  ;;  %v9158_v14 = vpop.permute.xlu0 %9157  ;;  %v9001_v15 = vsel %vm11151_vm0, %v8996_v5, %v8998_v2 }
 0xafe   : > { %v9162_v16 = vsel %vm11152_vm10, %v9158_v14, %v9160_v10 }
 0xaff   : > { %9952 = vmatmul.mubr.msk.f32.vlgmr.msra.gmra.mrb[106].mxu1 %vm2064_vm3, %v9571_v11 }
 0xb01   : > { %9563 = vmatmul.mubr.msk.f32.vlgmr.msra.gmra.mrb[10].mxu0 %vm2064_vm3, %v9562_v57  ;;  %v9156_v17 = vpop.permute.xlu0 %9155 }
 0xb02   : > { %8850 = vmatpush1.msra.mxu0 %v8841_v12  ;;  %8913 = vmatprep.mubr.f32.mxu0 %v10089_v0  ;;  %v9161_v18 = vsel %vm11153_vm9, %v9156_v17, %v9158_v14 }
 0xb03   : > { %9009 = vmatprep.subr.mxu0 %v9002_v13 }
 0xb09   : > { %9566 = vmatmul.mubr.msk.f32.vlgmr.msra.gmra.mrb[10].mxu0 %vm2064_vm3, %v9565_v61 }
 0xb0a   : > { %9010 = vmatpush1.msra.mxu0 %v9001_v15  ;;  %9073 = vmatprep.mubr.f32.mxu0 %v10089_v0  ;;  %v9317_v45 = vpop.permute.xlu1 %9316 }
 0xb0b   : > { %9169 = vmatprep.subr.mxu0 %v9162_v16 }
 0xb11   : > { %9569 = vmatmul.mubr.msk.f32.vlgmr.msra.gmra.mrb[10].mxu0 %vm2064_vm3, %v9568_v6 }
 0xb12   : > { %9170 = vmatpush1.msra.mxu0 %v9161_v18  ;;  %9233 = vmatprep.mubr.f32.mxu0 %v10089_v0 }
 0xb19   : > { %9572 = vmatmul.mubr.msk.f32.vlgmr.msra.gmra.mrb[10].mxu0 %vm2064_vm3, %v9571_v11  ;;  %vm9327_vm3 = vcmask 261120  }
 0xbaa   : > { %v8045_v19 = vpop.f32.mrb[90].mxu1 }
 0xbab   : > { %v9913_v20 = vpop.f32.mrb[91].mxu1 }
 0xbaf   : > { %v8189_v21 = vpop.f32.mrb[92].mxu1 }
 0xbb0   : > { %v8190_v22 = vadd.f32 %v8189_v21, %v8045_v19  ;;  %v9918_v23 = vpop.f32.mrb[93].mxu1 }
 0xbb3   : > { %v8346_v24 = vpop.f32.mrb[94].mxu1 }
 0xbb4   : > { %v8352_v25 = vadd.f32 %v8346_v24, %v8190_v22  ;;  %v9923_v26 = vpop.f32.mrb[95].mxu1 }
 0xbb7   : > { %v8506_v27 = vpop.f32.mrb[96].mxu1 }
 0xbb8   : > { %v8512_v28 = vadd.f32 %v8506_v27, %v8352_v25  ;;  %v9928_v29 = vpop.f32.mrb[97].mxu1 }
 0xbbb   : > { %v8666_v30 = vpop.f32.mrb[98].mxu1 }
 0xbbc   : > { %v8672_v31 = vadd.f32 %v8666_v30, %v8512_v28  ;;  %v9933_v32 = vpop.f32.mrb[99].mxu1 }
 0xbc2   : > { %v8826_v33 = vpop.f32.mrb[100].mxu1 }
 0xbc3   : > { %v8832_v34 = vadd.f32 %v8826_v33, %v8672_v31  ;;  %v9938_v0 = vpop.f32.mrb[101].mxu1 }
 0xbc6   : > { %v8986_v35 = vpop.f32.mrb[102].mxu1 }
 0xbc7   : > { %v8992_v36 = vadd.f32 %v8986_v35, %v8832_v34  ;;  %v9943_v37 = vpop.f32.mrb[103].mxu1 }
 0xbce   : > { %v9146_v38 = vpop.f32.mrb[104].mxu1 }
 0xbcf   : > { %v9152_v39 = vadd.f32 %v9146_v38, %v8992_v36  ;;  %v9948_v40 = vpop.f32.mrb[105].mxu1 }
 0xbd2   : > { %v9306_v41 = vpop.f32.mrb[106].mxu1 }
 0xbd3   : > { %v9312_v43 = vadd.f32 %v9306_v41, %v9152_v39  ;;  %v9953_v44 = vpop.f32.mrb[107].mxu1 }
 0xbd5   : > { %v9321_v46 = vadd.f32 %v9317_v45, %v9312_v43 }
 0xbd7   : > { %v9324_v47 = vsel %vm10382_vm15, %v9321_v46, 0.0 }
 0xbd8   : > { %9328 = vst.msk [vmem:[%s440_s30 + $0x10] sm:$0xff] %vm9327_vm3, %v9324_v47 }
 0xbec   : > { %v9235_v48 = vpop.f32.mrb[10].mxu0 }
 0xbed   : > { %v9319_v49 = vadd.f32 %v9317_v45, %v9235_v48  ;;  %v9237_v50 = vpop.f32.mrb[11].mxu0 }
 0xbee   : > { %v9320_v51 = vadd.f32 %v9317_v45, %v9237_v50 }
 0xbef   : > { %v9322_v52 = vsel %vm10393_vm8, %v9319_v49, 0.0 }
 0xbf0   : > { %9325 = vst [vmem:[%s440_s30] sm:$0xff] %v9322_v52  ;;  %v9323_v53 = vsel %vm10400_vm1, %v9320_v51, 0.0 }
 0xbf1   : > { %9326 = vst [vmem:[%s440_s30 + $0x8] sm:$0xff] %v9323_v53 }
 0xbf2 PF: > { %s23_s25 = sadd.s32 1, %s10087_s25  }
 0xbf3   : > { %p20_p4 = scmp.ge.s32.totalorder %s23_s25, 4  }
 0xbf5   :  { %22 = sbr.rel (!%p20_p4) target bundleno = 1 (0x1), region = 150 }

</bundles_post_ra>
